<compile_context>
chip_gen: v7x
topology: tpu7x:2x2x1
jax: 0.10.0
libtpu: 0.0.40
codegen_flags: <defaults>
</compile_context>

<pallas_src>
import functools
import math

import jax
import jax.numpy as jnp
from jax.experimental import pallas as pl
from jax.experimental.pallas import tpu as pltpu


def _round_up(a, b):
    return ((a + b - 1) // b) * b


def _attnpool_kernel(x_ref, posg_ref, qc_ref, kc_ref, vc_ref,
                     wqt_ref, wkt_ref, bk_ref, wvt_ref, bv_ref,
                     wct_ref, bc_ref, hmat_ref, hmatt_ref, mask_ref,
                     o_ref, *, hw_true):
    # x_ref   : (TB, HWp, C)  f32 activations (lane-dense, HW padded to mult of 8)
    # posg_ref: (HWp, C)      f32 spatial positional embedding (pad rows = 0)
    # qc/kc/vc: (1, C)        f32 folded constants for the pooled (mean) token
    # w*t_ref : (C, X)        bf16 pre-transposed weights (scale folded into Wq)
    # b*_ref  : (1, X)        f32 biases
    # hmat    : (C, nh) bf16  0/1 head-membership; hmatt = its transpose
    # mask    : (HWp, nh) f32 additive score mask (-1e30 on padded tokens)
    # o_ref   : (TB, Cout_pad)
    TB, HWp, C = x_ref.shape
    nh = hmat_ref.shape[1]
    f32 = jnp.float32
    bf16 = jnp.bfloat16
    inv_hw = 1.0 / hw_true

    xb = x_ref[...]                                      # (TB, HWp, C) f32
    tok3 = xb + posg_ref[...][None, :, :]                # f32 VPU add
    tok = tok3.reshape(TB * HWp, C).astype(bf16)         # bf16 MXU operand

    # Query from the pooled (mean) token; 1/sqrt(hd), pos0 and bq folded already.
    mean_x = jnp.sum(xb, axis=1) * inv_hw                # (TB, C) f32 (pad rows are 0)
    q = jnp.dot(mean_x.astype(bf16), wqt_ref[...],
                preferred_element_type=f32) + qc_ref[...]            # (TB, C)

    # Spatial keys / values: the two dominant MXU matmuls.
    k_g = jnp.dot(tok, wkt_ref[...], preferred_element_type=f32) + bk_ref[...]
    v_g = jnp.dot(tok, wvt_ref[...], preferred_element_type=f32) + bv_ref[...]
    k_g3 = k_g.reshape(TB, HWp, C)
    v_g3 = v_g.reshape(TB, HWp, C)

    # Pooled-token key/value via linearity (pad/bias corrections precomputed).
    k_0 = jnp.sum(k_g3, axis=1) * inv_hw + kc_ref[...]   # (TB, C)
    v_0 = jnp.sum(v_g3, axis=1) * inv_hw + vc_ref[...]   # (TB, C)

    # Head-batched scores via the 0/1 head-membership matrix (one MXU matmul).
    hmat = hmat_ref[...]                                 # (C, nh) bf16
    qk_g = (q[:, None, :] * k_g3).reshape(TB * HWp, C)   # f32 VPU
    s_g = jnp.dot(qk_g.astype(bf16), hmat,
                  preferred_element_type=f32).reshape(TB, HWp, nh)
    s_0 = jnp.dot((q * k_0).astype(bf16), hmat,
                  preferred_element_type=f32)            # (TB, nh)

    s_g = s_g + mask_ref[...][None, :, :]                # -1e30 on padded tokens

    # Softmax over (pooled token + spatial tokens), normalized in head space.
    m = jnp.maximum(jnp.max(s_g, axis=1), s_0)           # (TB, nh)
    p_g = jnp.exp(s_g - m[:, None, :])                   # (TB, HWp, nh) f32
    p_0 = jnp.exp(s_0 - m)                               # (TB, nh)
    inv_den = pl.reciprocal(jnp.sum(p_g, axis=1) + p_0, approx=True)   # EUP
    p_g = p_g * inv_den[:, None, :]
    p_0 = p_0 * inv_den

    # Broadcast normalized per-head weights back to channels (one matmul each).
    hmatt = hmatt_ref[...]                               # (nh, C) bf16
    p_g_c = jnp.dot(p_g.reshape(TB * HWp, nh).astype(bf16), hmatt,
                    preferred_element_type=f32).reshape(TB, HWp, C)
    p_0_c = jnp.dot(p_0.astype(bf16), hmatt, preferred_element_type=f32)   # (TB, C)

    attn = jnp.sum(p_g_c * v_g3, axis=1) + p_0_c * v_0   # (TB, C) f32

    out = jnp.dot(attn.astype(bf16), wct_ref[...],
                  preferred_element_type=f32) + bc_ref[...]            # (TB, Cout_pad)
    o_ref[...] = out.astype(o_ref.dtype)


def _pick_tb(N, C, HWp, Cout_pad, num_heads, block_batch):
    """Derive the batch tile TB and vmem_limit from an explicit VMEM model."""
    try:
        info = pltpu.get_tpu_info()
        vmem_cap = int(getattr(info, "vmem_capacity_bytes", 0)) or (64 << 20)
    except Exception:
        vmem_cap = 64 << 20                       # conservative (v7x per-TC)
    budget = int(0.85 * vmem_cap)

    # Single-buffered bf16 weights + f32 constants.
    weight_bytes = (2 * (3 * C * C + C * Cout_pad + 2 * C * num_heads)
                    + 4 * (HWp * C + HWp * num_heads + 8 * C + 2 * Cout_pad))
    # Per-TB: double-buffered f32 x block, bf16 tok, f32 k/v/qk/p_c temporaries,
    # bf16 casts, (TB, C) temps and the output block.
    per_tb = (HWp * C * (2 * 4 + 2 + 4 * 4 + 2 * 2 + 4)
              + 16 * C * 4 + 2 * Cout_pad * 4)

    tb_fit = (budget - weight_bytes) // max(per_tb, 1)
    tb_fit = max(8, (tb_fit // 8) * 8)

    n8 = _round_up(N, 8)
    TB = max(8, min(tb_fit, _round_up(min(block_batch, n8), 8)))
    # Prefer >= 2 grid steps so both megacore/v7x TensorCores get work.
    if TB >= 16 and n8 // TB < 2:
        TB = _round_up(max(TB // 2, 8), 8)

    vmem_limit = int(min(int(0.9 * vmem_cap),
                         max(32 << 20, weight_bytes + TB * per_tb + (8 << 20))))
    return TB, vmem_limit


def attention_pool2d(x, pos, wq, bq, wk, bk, wv, bv, wc, bc, *,
                     num_heads, block_batch=128):
    """x: (N, C, H, W).  Weights in PyTorch (out, in) layout.  Returns (N, Cout)."""
    N, C, H, W = x.shape
    HW = H * W
    Cout = wc.shape[0]
    assert C % num_heads == 0
    assert pos.shape == (HW + 1, C)
    hd = C // num_heads
    scale = 1.0 / math.sqrt(hd)
    f32, bf16 = jnp.float32, jnp.bfloat16

    HWp = _round_up(HW, 8)                      # sublane-aligned token count
    n_pad_hw = HWp - HW
    Cout_pad = _round_up(max(Cout, 128), 128)   # lane-dense output slab

    TB, vmem_limit = _pick_tb(N, C, HWp, Cout_pad, num_heads, block_batch)
    N_pad = _round_up(N, TB)

    # Activations: single wrapper-side transpose to lane-dense (.., C) layout.
    x3 = jnp.transpose(x.reshape(N, C, HW), (0, 2, 1)).astype(f32)   # (N, HW, C)
    x3 = jnp.pad(x3, ((0, N_pad - N), (0, n_pad_hw), (0, 0)))

    pos = pos.astype(f32)
    pos0, posg = pos[:1], pos[1:]
    posg_p = jnp.pad(posg, ((0, n_pad_hw), (0, 0)))

    # Constants folded in the wrapper (all tiny, computed once in f32).
    q_const = (pos0 @ wq.T + bq[None, :]) * scale
    pos_diff = pos0 - jnp.mean(posg, axis=0, keepdims=True)
    k_const = pos_diff @ wk.T - (n_pad_hw / HW) * bk[None, :]
    v_const = pos_diff @ wv.T - (n_pad_hw / HW) * bv[None, :]

    # Pre-transposed bf16 weights (scale folded into Wq), lane-padded Wc/bc.
    wqt = (wq.T * scale).astype(bf16)
    wkt = wk.T.astype(bf16)
    wvt = wv.T.astype(bf16)
    wct = jnp.pad(wc, ((0, Cout_pad - Cout), (0, 0))).T.astype(bf16)
    bk2 = bk.reshape(1, C).astype(f32)
    bv2 = bv.reshape(1, C).astype(f32)
    bc2 = jnp.pad(bc, (0, Cout_pad - Cout)).reshape(1, Cout_pad).astype(f32)

    # 0/1 head-membership matrix and its transpose (constants).
    head_of_chan = jnp.arange(C, dtype=jnp.int32) // hd
    hmat = (head_of_chan[:, None]
            == jnp.arange(num_heads, dtype=jnp.int32)[None, :]).astype(bf16)
    hmatt = jnp.transpose(hmat)

    # Additive score mask for the padded spatial tokens.
    valid = (jnp.arange(HWp) < HW)[:, None]
    neg_mask = (jnp.where(valid, 0.0, -1e30)
                * jnp.ones((1, num_heads))).astype(f32)          # (HWp, nh)

    cost = pl.CostEstimate(
        flops=int(N_pad * (2 * C * C * (2 * HWp + 1) + 2 * C * Cout_pad
                           + 4 * HWp * C * num_heads + 4 * C * num_heads
                           + 12 * HWp * C)),
        transcendentals=int(N_pad * (HWp + 2) * num_heads),
        bytes_accessed=int(4 * N_pad * (HWp * C + Cout_pad)
                           + 2 * (3 * C * C + C * Cout_pad)
                           + 4 * (HWp * C + 8 * C)))

    kernel = functools.partial(_attnpool_kernel, hw_true=HW)
    args = (x3, posg_p, q_const, k_const, v_const,
            wqt, wkt, bk2, wvt, bv2, wct, bc2, hmat, hmatt, neg_mask)
    const_shapes = [a.shape for a in args[1:]]

    def _run(single_buffer_consts):
        def cspec(shape):
            ndim = len(shape)
            idx = lambda b, _n=ndim: (0,) * _n
            if single_buffer_consts and hasattr(pl, "Buffered"):
                try:
                    return pl.BlockSpec(shape, idx, pipeline_mode=pl.Buffered(1))
                except TypeError:
                    pass
            return pl.BlockSpec(shape, idx)

        in_specs = [pl.BlockSpec((TB, HWp, C), lambda b: (b, 0, 0))]   # activations
        in_specs += [cspec(s) for s in const_shapes]                   # constants

        return pl.pallas_call(
            kernel,
            out_shape=jax.ShapeDtypeStruct((N_pad, Cout_pad), x.dtype),
            grid=(N_pad // TB,),
            in_specs=in_specs,
            out_specs=pl.BlockSpec((TB, Cout_pad), lambda b: (b, 0)),
            compiler_params=pltpu.CompilerParams(
                dimension_semantics=("parallel",),
                vmem_limit_bytes=vmem_limit),
            cost_estimate=cost,
        )(*args)

    try:
        out = _run(True)           # single-buffered constant inputs
    except Exception:
        out = _run(False)          # fallback: default double-buffering

    return out[:N, :Cout]


def _reference(x, pos, wq, bq, wk, bk, wv, bv, wc, bc, *, num_heads):
    """Pure-JAX port of the PyTorch forward (full MHA, take token 0)."""
    N, C, H, W = x.shape
    t = jnp.transpose(x.reshape(N, C, H * W), (2, 0, 1))          # (HW, N, C)
    t = jnp.concatenate([t.mean(axis=0, keepdims=True), t], 0)    # (S, N, C)
    t = t + pos[:, None, :]
    q = t @ wq.T + bq
    k = t @ wk.T + bk
    v = t @ wv.T + bv
    S = t.shape[0]
    hd = C // num_heads
    split = lambda a: a.reshape(S, N, num_heads, hd).transpose(1, 2, 0, 3)
    qh, kh, vh = split(q), split(k), split(v)                     # (N, H, S, hd)
    s = jnp.einsum('nhqd,nhkd->nhqk', qh / math.sqrt(hd), kh)
    p = jax.nn.softmax(s, axis=-1)
    o = jnp.einsum('nhqk,nhkd->nhqd', p, vh)
    o = o.transpose(2, 0, 1, 3).reshape(S, N, C)
    out = o @ wc.T + bc
    return out[0]                                                  # (N, Cout)


if __name__ == "__main__":
    # Module config: spacial_dim=4 -> HW=16, embed_dim=32, num_heads=4, output_dim=16
    spacial_dim, embed_dim, num_heads, output_dim = 4, 32, 4, 16
    N = 16
    S = spacial_dim ** 2 + 1

    key = jax.random.PRNGKey(0)
    ks = jax.random.split(key, 11)
    x = jax.random.normal(ks[0], (N, embed_dim, spacial_dim, spacial_dim),
                          dtype=jnp.float32)
    pos = jax.random.normal(ks[1], (S, embed_dim), jnp.float32) / embed_dim ** 0.5
    wq = jax.random.normal(ks[2], (embed_dim, embed_dim), jnp.float32) * 0.05
    bq = jax.random.normal(ks[3], (embed_dim,), jnp.float32) * 0.05
    wk = jax.random.normal(ks[4], (embed_dim, embed_dim), jnp.float32) * 0.05
    bk = jax.random.normal(ks[5], (embed_dim,), jnp.float32) * 0.05
    wv = jax.random.normal(ks[6], (embed_dim, embed_dim), jnp.float32) * 0.05
    bv = jax.random.normal(ks[7], (embed_dim,), jnp.float32) * 0.05
    wc = jax.random.normal(ks[8], (output_dim, embed_dim), jnp.float32) * 0.05
    bc = jax.random.normal(ks[9], (output_dim,), jnp.float32) * 0.05

    out = attention_pool2d(x, pos, wq, bq, wk, bk, wv, bv, wc, bc,
                           num_heads=num_heads)
    out = jax.block_until_ready(out)

    ref = _reference(x, pos, wq, bq, wk, bk, wv, bv, wc, bc, num_heads=num_heads)
    assert out.shape == (N, output_dim)
    # bf16 MXU operands + approx reciprocal -> slightly loosened tolerance
    assert jnp.allclose(out, ref, atol=1e-2, rtol=1e-2), "mismatch vs reference"
    print("KERNEL_OK")
</pallas_src>

<mosaic_0001>
module attributes {stable_mosaic.version = 11 : i64} {
  func.func @_attnpool_kernel(%arg0: i32, %arg1: memref<8x16x32xf32, #tpu.memory_space<vmem>>, %arg2: memref<16x32xf32, #tpu.memory_space<vmem>>, %arg3: memref<1x32xf32, #tpu.memory_space<vmem>>, %arg4: memref<1x32xf32, #tpu.memory_space<vmem>>, %arg5: memref<1x32xf32, #tpu.memory_space<vmem>>, %arg6: memref<32x32xbf16, #tpu.memory_space<vmem>>, %arg7: memref<32x32xbf16, #tpu.memory_space<vmem>>, %arg8: memref<1x32xf32, #tpu.memory_space<vmem>>, %arg9: memref<32x32xbf16, #tpu.memory_space<vmem>>, %arg10: memref<1x32xf32, #tpu.memory_space<vmem>>, %arg11: memref<32x128xbf16, #tpu.memory_space<vmem>>, %arg12: memref<1x128xf32, #tpu.memory_space<vmem>>, %arg13: memref<32x4xbf16, #tpu.memory_space<vmem>>, %arg14: memref<4x32xbf16, #tpu.memory_space<vmem>>, %arg15: memref<16x4xf32, #tpu.memory_space<vmem>>, %arg16: memref<8x128xf32, #tpu.memory_space<vmem>>) attributes {dimension_semantics = [#tpu.dimension_semantics<parallel>], iteration_bounds = array<i64: 2>, scalar_prefetch = 0 : i64, scratch_operands = 0 : i64, tpu.core_type = #tpu.core_type<tc>, window_params = [{transform_indices = @transform_0, window_bounds = array<i64: 8, 16, 32>}, {pipeline_mode = #tpu.pipeline_mode<synchronous>, transform_indices = @transform_1, window_bounds = array<i64: 16, 32>}, {pipeline_mode = #tpu.pipeline_mode<synchronous>, transform_indices = @transform_2, window_bounds = array<i64: 1, 32>}, {pipeline_mode = #tpu.pipeline_mode<synchronous>, transform_indices = @transform_3, window_bounds = array<i64: 1, 32>}, {pipeline_mode = #tpu.pipeline_mode<synchronous>, transform_indices = @transform_4, window_bounds = array<i64: 1, 32>}, {pipeline_mode = #tpu.pipeline_mode<synchronous>, transform_indices = @transform_5, window_bounds = array<i64: 32, 32>}, {pipeline_mode = #tpu.pipeline_mode<synchronous>, transform_indices = @transform_6, window_bounds = array<i64: 32, 32>}, {pipeline_mode = #tpu.pipeline_mode<synchronous>, transform_indices = @transform_7, window_bounds = array<i64: 1, 32>}, {pipeline_mode = #tpu.pipeline_mode<synchronous>, transform_indices = @transform_8, window_bounds = array<i64: 32, 32>}, {pipeline_mode = #tpu.pipeline_mode<synchronous>, transform_indices = @transform_9, window_bounds = array<i64: 1, 32>}, {pipeline_mode = #tpu.pipeline_mode<synchronous>, transform_indices = @transform_10, window_bounds = array<i64: 32, 128>}, {pipeline_mode = #tpu.pipeline_mode<synchronous>, transform_indices = @transform_11, window_bounds = array<i64: 1, 128>}, {pipeline_mode = #tpu.pipeline_mode<synchronous>, transform_indices = @transform_12, window_bounds = array<i64: 32, 4>}, {pipeline_mode = #tpu.pipeline_mode<synchronous>, transform_indices = @transform_13, window_bounds = array<i64: 4, 32>}, {pipeline_mode = #tpu.pipeline_mode<synchronous>, transform_indices = @transform_14, window_bounds = array<i64: 16, 4>}, {transform_indices = @transform_15, window_bounds = array<i64: 8, 128>}]} {
    %c0 = arith.constant 0 : index
    %c0_0 = arith.constant 0 : index
    %c0_1 = arith.constant 0 : index
    %0 = vector.load %arg1[%c0, %c0_0, %c0_1] : memref<8x16x32xf32, #tpu.memory_space<vmem>>, vector<8x16x32xf32>
    %c0_2 = arith.constant 0 : index
    %c0_3 = arith.constant 0 : index
    %1 = vector.load %arg2[%c0_2, %c0_3] : memref<16x32xf32, #tpu.memory_space<vmem>>, vector<16x32xf32>
    %2 = vector.shape_cast %1 : vector<16x32xf32> to vector<1x16x32xf32>
    %3 = vector.broadcast %2 : vector<1x16x32xf32> to vector<8x16x32xf32>
    %4 = arith.addf %0, %3 : vector<8x16x32xf32>
    %5 = vector.shape_cast %4 : vector<8x16x32xf32> to vector<128x32xf32>
    %6 = arith.truncf %5 : vector<128x32xf32> to vector<128x32xbf16>
    %cst = arith.constant dense<0.000000e+00> : vector<8x32xf32>
    %7 = vector.multi_reduction <add>, %0, %cst [1] : vector<8x16x32xf32> to vector<8x32xf32>
    %cst_4 = arith.constant 6.250000e-02 : f32
    %8 = vector.broadcast %cst_4 : f32 to vector<8x32xf32>
    %9 = arith.mulf %7, %8 : vector<8x32xf32>
    %10 = arith.truncf %9 : vector<8x32xf32> to vector<8x32xbf16>
    %c0_5 = arith.constant 0 : index
    %c0_6 = arith.constant 0 : index
    %11 = vector.load %arg6[%c0_5, %c0_6] : memref<32x32xbf16, #tpu.memory_space<vmem>>, vector<32x32xbf16>
    %cst_7 = arith.constant dense<0.000000e+00> : vector<8x32xf32>
    %12 = tpu.matmul %10, %11, %cst_7 {dimension_numbers = #tpu.dot_dimension_numbers<[1], [0], [0], [1], [0, 0, 1, 1], [], []>} : vector<8x32xbf16>, vector<32x32xbf16>, vector<8x32xf32> -> vector<8x32xf32>
    %c0_8 = arith.constant 0 : index
    %c0_9 = arith.constant 0 : index
    %13 = vector.load %arg3[%c0_8, %c0_9] : memref<1x32xf32, #tpu.memory_space<vmem>>, vector<1x32xf32>
    %14 = vector.broadcast %13 : vector<1x32xf32> to vector<8x32xf32>
    %15 = arith.addf %12, %14 : vector<8x32xf32>
    %c0_10 = arith.constant 0 : index
    %c0_11 = arith.constant 0 : index
    %16 = vector.load %arg7[%c0_10, %c0_11] : memref<32x32xbf16, #tpu.memory_space<vmem>>, vector<32x32xbf16>
    %cst_12 = arith.constant dense<0.000000e+00> : vector<128x32xf32>
    %17 = tpu.matmul %6, %16, %cst_12 {dimension_numbers = #tpu.dot_dimension_numbers<[1], [0], [0], [1], [0, 0, 1, 1], [], []>} : vector<128x32xbf16>, vector<32x32xbf16>, vector<128x32xf32> -> vector<128x32xf32>
    %c0_13 = arith.constant 0 : index
    %c0_14 = arith.constant 0 : index
    %18 = vector.load %arg8[%c0_13, %c0_14] : memref<1x32xf32, #tpu.memory_space<vmem>>, vector<1x32xf32>
    %19 = vector.broadcast %18 : vector<1x32xf32> to vector<128x32xf32>
    %20 = arith.addf %17, %19 : vector<128x32xf32>
    %c0_15 = arith.constant 0 : index
    %c0_16 = arith.constant 0 : index
    %21 = vector.load %arg9[%c0_15, %c0_16] : memref<32x32xbf16, #tpu.memory_space<vmem>>, vector<32x32xbf16>
    %cst_17 = arith.constant dense<0.000000e+00> : vector<128x32xf32>
    %22 = tpu.matmul %6, %21, %cst_17 {dimension_numbers = #tpu.dot_dimension_numbers<[1], [0], [0], [1], [0, 0, 1, 1], [], []>} : vector<128x32xbf16>, vector<32x32xbf16>, vector<128x32xf32> -> vector<128x32xf32>
    %c0_18 = arith.constant 0 : index
    %c0_19 = arith.constant 0 : index
    %23 = vector.load %arg10[%c0_18, %c0_19] : memref<1x32xf32, #tpu.memory_space<vmem>>, vector<1x32xf32>
    %24 = vector.broadcast %23 : vector<1x32xf32> to vector<128x32xf32>
    %25 = arith.addf %22, %24 : vector<128x32xf32>
    %26 = vector.shape_cast %20 : vector<128x32xf32> to vector<8x16x32xf32>
    %27 = vector.shape_cast %25 : vector<128x32xf32> to vector<8x16x32xf32>
    %cst_20 = arith.constant dense<0.000000e+00> : vector<8x32xf32>
    %28 = vector.multi_reduction <add>, %26, %cst_20 [1] : vector<8x16x32xf32> to vector<8x32xf32>
    %cst_21 = arith.constant 6.250000e-02 : f32
    %29 = vector.broadcast %cst_21 : f32 to vector<8x32xf32>
    %30 = arith.mulf %28, %29 : vector<8x32xf32>
    %c0_22 = arith.constant 0 : index
    %c0_23 = arith.constant 0 : index
    %31 = vector.load %arg4[%c0_22, %c0_23] : memref<1x32xf32, #tpu.memory_space<vmem>>, vector<1x32xf32>
    %32 = vector.broadcast %31 : vector<1x32xf32> to vector<8x32xf32>
    %33 = arith.addf %30, %32 : vector<8x32xf32>
    %cst_24 = arith.constant dense<0.000000e+00> : vector<8x32xf32>
    %34 = vector.multi_reduction <add>, %27, %cst_24 [1] : vector<8x16x32xf32> to vector<8x32xf32>
    %cst_25 = arith.constant 6.250000e-02 : f32
    %35 = vector.broadcast %cst_25 : f32 to vector<8x32xf32>
    %36 = arith.mulf %34, %35 : vector<8x32xf32>
    %c0_26 = arith.constant 0 : index
    %c0_27 = arith.constant 0 : index
    %37 = vector.load %arg5[%c0_26, %c0_27] : memref<1x32xf32, #tpu.memory_space<vmem>>, vector<1x32xf32>
    %38 = vector.broadcast %37 : vector<1x32xf32> to vector<8x32xf32>
    %39 = arith.addf %36, %38 : vector<8x32xf32>
    %c0_28 = arith.constant 0 : index
    %c0_29 = arith.constant 0 : index
    %40 = vector.load %arg13[%c0_28, %c0_29] : memref<32x4xbf16, #tpu.memory_space<vmem>>, vector<32x4xbf16>
    %41 = vector.shape_cast %15 : vector<8x32xf32> to vector<8x1x32xf32>
    %42 = vector.broadcast %41 : vector<8x1x32xf32> to vector<8x16x32xf32>
    %43 = arith.mulf %42, %26 : vector<8x16x32xf32>
    %44 = vector.shape_cast %43 : vector<8x16x32xf32> to vector<128x32xf32>
    %45 = arith.truncf %44 : vector<128x32xf32> to vector<128x32xbf16>
    %cst_30 = arith.constant dense<0.000000e+00> : vector<128x4xf32>
    %46 = tpu.matmul %45, %40, %cst_30 {dimension_numbers = #tpu.dot_dimension_numbers<[1], [0], [0], [1], [0, 0, 1, 1], [], []>} : vector<128x32xbf16>, vector<32x4xbf16>, vector<128x4xf32> -> vector<128x4xf32>
    %47 = vector.shape_cast %46 : vector<128x4xf32> to vector<8x16x4xf32>
    %48 = arith.mulf %15, %33 : vector<8x32xf32>
    %49 = arith.truncf %48 : vector<8x32xf32> to vector<8x32xbf16>
    %cst_31 = arith.constant dense<0.000000e+00> : vector<8x4xf32>
    %50 = tpu.matmul %49, %40, %cst_31 {dimension_numbers = #tpu.dot_dimension_numbers<[1], [0], [0], [1], [0, 0, 1, 1], [], []>} : vector<8x32xbf16>, vector<32x4xbf16>, vector<8x4xf32> -> vector<8x4xf32>
    %c0_32 = arith.constant 0 : index
    %c0_33 = arith.constant 0 : index
    %51 = vector.load %arg15[%c0_32, %c0_33] : memref<16x4xf32, #tpu.memory_space<vmem>>, vector<16x4xf32>
    %52 = vector.shape_cast %51 : vector<16x4xf32> to vector<1x16x4xf32>
    %53 = vector.broadcast %52 : vector<1x16x4xf32> to vector<8x16x4xf32>
    %54 = arith.addf %47, %53 : vector<8x16x4xf32>
    %cst_34 = arith.constant dense<0xFF800000> : vector<8x4xf32>
    %55 = vector.multi_reduction <maximumf>, %54, %cst_34 [1] : vector<8x16x4xf32> to vector<8x4xf32>
    %56 = arith.maximumf %55, %50 : vector<8x4xf32>
    %57 = vector.shape_cast %56 : vector<8x4xf32> to vector<8x1x4xf32>
    %58 = vector.broadcast %57 : vector<8x1x4xf32> to vector<8x16x4xf32>
    %59 = arith.subf %54, %58 : vector<8x16x4xf32>
    %60 = math.exp %59 : vector<8x16x4xf32>
    %61 = arith.subf %50, %56 : vector<8x4xf32>
    %62 = math.exp %61 : vector<8x4xf32>
    %cst_35 = arith.constant dense<0.000000e+00> : vector<8x4xf32>
    %63 = vector.multi_reduction <add>, %60, %cst_35 [1] : vector<8x16x4xf32> to vector<8x4xf32>
    %64 = arith.addf %63, %62 : vector<8x4xf32>
    %65 = tpu.reciprocal %64 {approx = true} : vector<8x4xf32> -> vector<8x4xf32>
    %66 = vector.shape_cast %65 : vector<8x4xf32> to vector<8x1x4xf32>
    %67 = vector.broadcast %66 : vector<8x1x4xf32> to vector<8x16x4xf32>
    %68 = arith.mulf %60, %67 : vector<8x16x4xf32>
    %69 = arith.mulf %62, %65 : vector<8x4xf32>
    %c0_36 = arith.constant 0 : index
    %c0_37 = arith.constant 0 : index
    %70 = vector.load %arg14[%c0_36, %c0_37] : memref<4x32xbf16, #tpu.memory_space<vmem>>, vector<4x32xbf16>
    %71 = vector.shape_cast %68 : vector<8x16x4xf32> to vector<128x4xf32>
    %72 = arith.truncf %71 : vector<128x4xf32> to vector<128x4xbf16>
    %cst_38 = arith.constant dense<0.000000e+00> : vector<128x32xf32>
    %73 = tpu.matmul %72, %70, %cst_38 {dimension_numbers = #tpu.dot_dimension_numbers<[1], [0], [0], [1], [0, 0, 1, 1], [], []>} : vector<128x4xbf16>, vector<4x32xbf16>, vector<128x32xf32> -> vector<128x32xf32>
    %74 = vector.shape_cast %73 : vector<128x32xf32> to vector<8x16x32xf32>
    %75 = arith.truncf %69 : vector<8x4xf32> to vector<8x4xbf16>
    %cst_39 = arith.constant dense<0.000000e+00> : vector<8x32xf32>
    %76 = tpu.matmul %75, %70, %cst_39 {dimension_numbers = #tpu.dot_dimension_numbers<[1], [0], [0], [1], [0, 0, 1, 1], [], []>} : vector<8x4xbf16>, vector<4x32xbf16>, vector<8x32xf32> -> vector<8x32xf32>
    %77 = arith.mulf %74, %27 : vector<8x16x32xf32>
    %cst_40 = arith.constant dense<0.000000e+00> : vector<8x32xf32>
    %78 = vector.multi_reduction <add>, %77, %cst_40 [1] : vector<8x16x32xf32> to vector<8x32xf32>
    %79 = arith.mulf %76, %39 : vector<8x32xf32>
    %80 = arith.addf %78, %79 : vector<8x32xf32>
    %81 = arith.truncf %80 : vector<8x32xf32> to vector<8x32xbf16>
    %c0_41 = arith.constant 0 : index
    %c0_42 = arith.constant 0 : index
    %82 = vector.load %arg11[%c0_41, %c0_42] : memref<32x128xbf16, #tpu.memory_space<vmem>>, vector<32x128xbf16>
    %cst_43 = arith.constant dense<0.000000e+00> : vector<8x128xf32>
    %83 = tpu.matmul %81, %82, %cst_43 {dimension_numbers = #tpu.dot_dimension_numbers<[1], [0], [0], [1], [0, 0, 1, 1], [], []>} : vector<8x32xbf16>, vector<32x128xbf16>, vector<8x128xf32> -> vector<8x128xf32>
    %c0_44 = arith.constant 0 : index
    %c0_45 = arith.constant 0 : index
    %84 = vector.load %arg12[%c0_44, %c0_45] : memref<1x128xf32, #tpu.memory_space<vmem>>, vector<1x128xf32>
    %85 = vector.broadcast %84 : vector<1x128xf32> to vector<8x128xf32>
    %86 = arith.addf %83, %85 : vector<8x128xf32>
    %c0_46 = arith.constant 0 : index
    %c0_47 = arith.constant 0 : index
    %87 = vector.load %arg16[%c0_46, %c0_47] : memref<8x128xf32, #tpu.memory_space<vmem>>, vector<8x128xf32>
    tpu.vector_store %arg16[%c0_46, %c0_47], %86 {strides = array<i32>} : memref<8x128xf32, #tpu.memory_space<vmem>>, vector<8x128xf32>,
    return
  }
  func.func @transform_0(%arg0: i32) -> (i32, i32, i32) {
    %c0_i32 = arith.constant 0 : i32
    %c0_i32_0 = arith.constant 0 : i32
    %c0_i32_1 = arith.constant 0 : i32
    return %arg0, %c0_i32, %c0_i32_0 : i32, i32, i32
  }
  func.func @transform_1(%arg0: i32) -> (i32, i32) {
    %c0_i32 = arith.constant 0 : i32
    %c0_i32_0 = arith.constant 0 : i32
    %c0_i32_1 = arith.constant 0 : i32
    return %c0_i32, %c0_i32_0 : i32, i32
  }
  func.func @transform_2(%arg0: i32) -> (i32, i32) {
    %c0_i32 = arith.constant 0 : i32
    %c0_i32_0 = arith.constant 0 : i32
    %c0_i32_1 = arith.constant 0 : i32
    return %c0_i32, %c0_i32_0 : i32, i32
  }
  func.func @transform_3(%arg0: i32) -> (i32, i32) {
    %c0_i32 = arith.constant 0 : i32
    %c0_i32_0 = arith.constant 0 : i32
    %c0_i32_1 = arith.constant 0 : i32
    return %c0_i32, %c0_i32_0 : i32, i32
  }
  func.func @transform_4(%arg0: i32) -> (i32, i32) {
    %c0_i32 = arith.constant 0 : i32
    %c0_i32_0 = arith.constant 0 : i32
    %c0_i32_1 = arith.constant 0 : i32
    return %c0_i32, %c0_i32_0 : i32, i32
  }
  func.func @transform_5(%arg0: i32) -> (i32, i32) {
    %c0_i32 = arith.constant 0 : i32
    %c0_i32_0 = arith.constant 0 : i32
    %c0_i32_1 = arith.constant 0 : i32
    return %c0_i32, %c0_i32_0 : i32, i32
  }
  func.func @transform_6(%arg0: i32) -> (i32, i32) {
    %c0_i32 = arith.constant 0 : i32
    %c0_i32_0 = arith.constant 0 : i32
    %c0_i32_1 = arith.constant 0 : i32
    return %c0_i32, %c0_i32_0 : i32, i32
  }
  func.func @transform_7(%arg0: i32) -> (i32, i32) {
    %c0_i32 = arith.constant 0 : i32
    %c0_i32_0 = arith.constant 0 : i32
    %c0_i32_1 = arith.constant 0 : i32
    return %c0_i32, %c0_i32_0 : i32, i32
  }
  func.func @transform_8(%arg0: i32) -> (i32, i32) {
    %c0_i32 = arith.constant 0 : i32
    %c0_i32_0 = arith.constant 0 : i32
    %c0_i32_1 = arith.constant 0 : i32
    return %c0_i32, %c0_i32_0 : i32, i32
  }
  func.func @transform_9(%arg0: i32) -> (i32, i32) {
    %c0_i32 = arith.constant 0 : i32
    %c0_i32_0 = arith.constant 0 : i32
    %c0_i32_1 = arith.constant 0 : i32
    return %c0_i32, %c0_i32_0 : i32, i32
  }
  func.func @transform_10(%arg0: i32) -> (i32, i32) {
    %c0_i32 = arith.constant 0 : i32
    %c0_i32_0 = arith.constant 0 : i32
    %c0_i32_1 = arith.constant 0 : i32
    return %c0_i32, %c0_i32_0 : i32, i32
  }
  func.func @transform_11(%arg0: i32) -> (i32, i32) {
    %c0_i32 = arith.constant 0 : i32
    %c0_i32_0 = arith.constant 0 : i32
    %c0_i32_1 = arith.constant 0 : i32
    return %c0_i32, %c0_i32_0 : i32, i32
  }
  func.func @transform_12(%arg0: i32) -> (i32, i32) {
    %c0_i32 = arith.constant 0 : i32
    %c0_i32_0 = arith.constant 0 : i32
    %c0_i32_1 = arith.constant 0 : i32
    return %c0_i32, %c0_i32_0 : i32, i32
  }
  func.func @transform_13(%arg0: i32) -> (i32, i32) {
    %c0_i32 = arith.constant 0 : i32
    %c0_i32_0 = arith.constant 0 : i32
    %c0_i32_1 = arith.constant 0 : i32
    return %c0_i32, %c0_i32_0 : i32, i32
  }
  func.func @transform_14(%arg0: i32) -> (i32, i32) {
    %c0_i32 = arith.constant 0 : i32
    %c0_i32_0 = arith.constant 0 : i32
    %c0_i32_1 = arith.constant 0 : i32
    return %c0_i32, %c0_i32_0 : i32, i32
  }
  func.func @transform_15(%arg0: i32) -> (i32, i32) {
    %c0_i32 = arith.constant 0 : i32
    %c0_i32_0 = arith.constant 0 : i32
    return %arg0, %c0_i32 : i32, i32
  }
}

module attributes {stable_mosaic.version = 11 : i64} {
  func.func @_attnpool_kernel(%arg0: i32, %arg1: memref<8x16x32xf32, #tpu.memory_space<vmem>>, %arg2: memref<16x32xf32, #tpu.memory_space<vmem>>, %arg3: memref<1x32xf32, #tpu.memory_space<vmem>>, %arg4: memref<1x32xf32, #tpu.memory_space<vmem>>, %arg5: memref<1x32xf32, #tpu.memory_space<vmem>>, %arg6: memref<32x32xbf16, #tpu.memory_space<vmem>>, %arg7: memref<32x32xbf16, #tpu.memory_space<vmem>>, %arg8: memref<1x32xf32, #tpu.memory_space<vmem>>, %arg9: memref<32x32xbf16, #tpu.memory_space<vmem>>, %arg10: memref<1x32xf32, #tpu.memory_space<vmem>>, %arg11: memref<32x128xbf16, #tpu.memory_space<vmem>>, %arg12: memref<1x128xf32, #tpu.memory_space<vmem>>, %arg13: memref<32x4xbf16, #tpu.memory_space<vmem>>, %arg14: memref<4x32xbf16, #tpu.memory_space<vmem>>, %arg15: memref<16x4xf32, #tpu.memory_space<vmem>>, %arg16: memref<8x128xf32, #tpu.memory_space<vmem>>) attributes {dimension_semantics = [#tpu.dimension_semantics<parallel>], iteration_bounds = array<i64: 2>, scalar_prefetch = 0 : i64, scratch_operands = 0 : i64, tpu.core_type = #tpu.core_type<tc>, window_params = [{transform_indices = @transform_0, window_bounds = array<i64: 8, 16, 32>}, {pipeline_mode = #tpu.pipeline_mode<synchronous>, transform_indices = @transform_1, window_bounds = array<i64: 16, 32>}, {pipeline_mode = #tpu.pipeline_mode<synchronous>, transform_indices = @transform_2, window_bounds = array<i64: 1, 32>}, {pipeline_mode = #tpu.pipeline_mode<synchronous>, transform_indices = @transform_3, window_bounds = array<i64: 1, 32>}, {pipeline_mode = #tpu.pipeline_mode<synchronous>, transform_indices = @transform_4, window_bounds = array<i64: 1, 32>}, {pipeline_mode = #tpu.pipeline_mode<synchronous>, transform_indices = @transform_5, window_bounds = array<i64: 32, 32>}, {pipeline_mode = #tpu.pipeline_mode<synchronous>, transform_indices = @transform_6, window_bounds = array<i64: 32, 32>}, {pipeline_mode = #tpu.pipeline_mode<synchronous>, transform_indices = @transform_7, window_bounds = array<i64: 1, 32>}, {pipeline_mode = #tpu.pipeline_mode<synchronous>, transform_indices = @transform_8, window_bounds = array<i64: 32, 32>}, {pipeline_mode = #tpu.pipeline_mode<synchronous>, transform_indices = @transform_9, window_bounds = array<i64: 1, 32>}, {pipeline_mode = #tpu.pipeline_mode<synchronous>, transform_indices = @transform_10, window_bounds = array<i64: 32, 128>}, {pipeline_mode = #tpu.pipeline_mode<synchronous>, transform_indices = @transform_11, window_bounds = array<i64: 1, 128>}, {pipeline_mode = #tpu.pipeline_mode<synchronous>, transform_indices = @transform_12, window_bounds = array<i64: 32, 4>}, {pipeline_mode = #tpu.pipeline_mode<synchronous>, transform_indices = @transform_13, window_bounds = array<i64: 4, 32>}, {pipeline_mode = #tpu.pipeline_mode<synchronous>, transform_indices = @transform_14, window_bounds = array<i64: 16, 4>}, {transform_indices = @transform_15, window_bounds = array<i64: 8, 128>}]} {
    %c0 = arith.constant 0 : index
    %c0_0 = arith.constant 0 : index
    %c0_1 = arith.constant 0 : index
    %0 = vector.load %arg1[%c0, %c0_0, %c0_1] : memref<8x16x32xf32, #tpu.memory_space<vmem>>, vector<8x16x32xf32>
    %c0_2 = arith.constant 0 : index
    %c0_3 = arith.constant 0 : index
    %1 = vector.load %arg2[%c0_2, %c0_3] : memref<16x32xf32, #tpu.memory_space<vmem>>, vector<16x32xf32>
    %2 = vector.shape_cast %1 : vector<16x32xf32> to vector<1x16x32xf32>
    %3 = vector.broadcast %2 : vector<1x16x32xf32> to vector<8x16x32xf32>
    %4 = arith.addf %0, %3 : vector<8x16x32xf32>
    %5 = vector.shape_cast %4 : vector<8x16x32xf32> to vector<128x32xf32>
    %6 = arith.truncf %5 : vector<128x32xf32> to vector<128x32xbf16>
    %cst = arith.constant dense<0.000000e+00> : vector<8x32xf32>
    %7 = vector.multi_reduction <add>, %0, %cst [1] : vector<8x16x32xf32> to vector<8x32xf32>
    %cst_4 = arith.constant 6.250000e-02 : f32
    %8 = vector.broadcast %cst_4 : f32 to vector<8x32xf32>
    %9 = arith.mulf %7, %8 : vector<8x32xf32>
    %10 = arith.truncf %9 : vector<8x32xf32> to vector<8x32xbf16>
    %c0_5 = arith.constant 0 : index
    %c0_6 = arith.constant 0 : index
    %11 = vector.load %arg6[%c0_5, %c0_6] : memref<32x32xbf16, #tpu.memory_space<vmem>>, vector<32x32xbf16>
    %cst_7 = arith.constant dense<0.000000e+00> : vector<8x32xf32>
    %12 = tpu.matmul %10, %11, %cst_7 {dimension_numbers = #tpu.dot_dimension_numbers<[1], [0], [0], [1], [0, 0, 1, 1], [], []>} : vector<8x32xbf16>, vector<32x32xbf16>, vector<8x32xf32> -> vector<8x32xf32>
    %c0_8 = arith.constant 0 : index
    %c0_9 = arith.constant 0 : index
    %13 = vector.load %arg3[%c0_8, %c0_9] : memref<1x32xf32, #tpu.memory_space<vmem>>, vector<1x32xf32>
    %14 = vector.broadcast %13 : vector<1x32xf32> to vector<8x32xf32>
    %15 = arith.addf %12, %14 : vector<8x32xf32>
    %c0_10 = arith.constant 0 : index
    %c0_11 = arith.constant 0 : index
    %16 = vector.load %arg7[%c0_10, %c0_11] : memref<32x32xbf16, #tpu.memory_space<vmem>>, vector<32x32xbf16>
    %cst_12 = arith.constant dense<0.000000e+00> : vector<128x32xf32>
    %17 = tpu.matmul %6, %16, %cst_12 {dimension_numbers = #tpu.dot_dimension_numbers<[1], [0], [0], [1], [0, 0, 1, 1], [], []>} : vector<128x32xbf16>, vector<32x32xbf16>, vector<128x32xf32> -> vector<128x32xf32>
    %c0_13 = arith.constant 0 : index
    %c0_14 = arith.constant 0 : index
    %18 = vector.load %arg8[%c0_13, %c0_14] : memref<1x32xf32, #tpu.memory_space<vmem>>, vector<1x32xf32>
    %19 = vector.broadcast %18 : vector<1x32xf32> to vector<128x32xf32>
    %20 = arith.addf %17, %19 : vector<128x32xf32>
    %c0_15 = arith.constant 0 : index
    %c0_16 = arith.constant 0 : index
    %21 = vector.load %arg9[%c0_15, %c0_16] : memref<32x32xbf16, #tpu.memory_space<vmem>>, vector<32x32xbf16>
    %cst_17 = arith.constant dense<0.000000e+00> : vector<128x32xf32>
    %22 = tpu.matmul %6, %21, %cst_17 {dimension_numbers = #tpu.dot_dimension_numbers<[1], [0], [0], [1], [0, 0, 1, 1], [], []>} : vector<128x32xbf16>, vector<32x32xbf16>, vector<128x32xf32> -> vector<128x32xf32>
    %c0_18 = arith.constant 0 : index
    %c0_19 = arith.constant 0 : index
    %23 = vector.load %arg10[%c0_18, %c0_19] : memref<1x32xf32, #tpu.memory_space<vmem>>, vector<1x32xf32>
    %24 = vector.broadcast %23 : vector<1x32xf32> to vector<128x32xf32>
    %25 = arith.addf %22, %24 : vector<128x32xf32>
    %26 = vector.shape_cast %20 : vector<128x32xf32> to vector<8x16x32xf32>
    %27 = vector.shape_cast %25 : vector<128x32xf32> to vector<8x16x32xf32>
    %cst_20 = arith.constant dense<0.000000e+00> : vector<8x32xf32>
    %28 = vector.multi_reduction <add>, %26, %cst_20 [1] : vector<8x16x32xf32> to vector<8x32xf32>
    %cst_21 = arith.constant 6.250000e-02 : f32
    %29 = vector.broadcast %cst_21 : f32 to vector<8x32xf32>
    %30 = arith.mulf %28, %29 : vector<8x32xf32>
    %c0_22 = arith.constant 0 : index
    %c0_23 = arith.constant 0 : index
    %31 = vector.load %arg4[%c0_22, %c0_23] : memref<1x32xf32, #tpu.memory_space<vmem>>, vector<1x32xf32>
    %32 = vector.broadcast %31 : vector<1x32xf32> to vector<8x32xf32>
    %33 = arith.addf %30, %32 : vector<8x32xf32>
    %cst_24 = arith.constant dense<0.000000e+00> : vector<8x32xf32>
    %34 = vector.multi_reduction <add>, %27, %cst_24 [1] : vector<8x16x32xf32> to vector<8x32xf32>
    %cst_25 = arith.constant 6.250000e-02 : f32
    %35 = vector.broadcast %cst_25 : f32 to vector<8x32xf32>
    %36 = arith.mulf %34, %35 : vector<8x32xf32>
    %c0_26 = arith.constant 0 : index
    %c0_27 = arith.constant 0 : index
    %37 = vector.load %arg5[%c0_26, %c0_27] : memref<1x32xf32, #tpu.memory_space<vmem>>, vector<1x32xf32>
    %38 = vector.broadcast %37 : vector<1x32xf32> to vector<8x32xf32>
    %39 = arith.addf %36, %38 : vector<8x32xf32>
    %c0_28 = arith.constant 0 : index
    %c0_29 = arith.constant 0 : index
    %40 = vector.load %arg13[%c0_28, %c0_29] : memref<32x4xbf16, #tpu.memory_space<vmem>>, vector<32x4xbf16>
    %41 = vector.shape_cast %15 : vector<8x32xf32> to vector<8x1x32xf32>
    %42 = vector.broadcast %41 : vector<8x1x32xf32> to vector<8x16x32xf32>
    %43 = arith.mulf %42, %26 : vector<8x16x32xf32>
    %44 = vector.shape_cast %43 : vector<8x16x32xf32> to vector<128x32xf32>
    %45 = arith.truncf %44 : vector<128x32xf32> to vector<128x32xbf16>
    %cst_30 = arith.constant dense<0.000000e+00> : vector<128x4xf32>
    %46 = tpu.matmul %45, %40, %cst_30 {dimension_numbers = #tpu.dot_dimension_numbers<[1], [0], [0], [1], [0, 0, 1, 1], [], []>} : vector<128x32xbf16>, vector<32x4xbf16>, vector<128x4xf32> -> vector<128x4xf32>
    %47 = vector.shape_cast %46 : vector<128x4xf32> to vector<8x16x4xf32>
    %48 = arith.mulf %15, %33 : vector<8x32xf32>
    %49 = arith.truncf %48 : vector<8x32xf32> to vector<8x32xbf16>
    %cst_31 = arith.constant dense<0.000000e+00> : vector<8x4xf32>
    %50 = tpu.matmul %49, %40, %cst_31 {dimension_numbers = #tpu.dot_dimension_numbers<[1], [0], [0], [1], [0, 0, 1, 1], [], []>} : vector<8x32xbf16>, vector<32x4xbf16>, vector<8x4xf32> -> vector<8x4xf32>
    %c0_32 = arith.constant 0 : index
    %c0_33 = arith.constant 0 : index
    %51 = vector.load %arg15[%c0_32, %c0_33] : memref<16x4xf32, #tpu.memory_space<vmem>>, vector<16x4xf32>
    %52 = vector.shape_cast %51 : vector<16x4xf32> to vector<1x16x4xf32>
    %53 = vector.broadcast %52 : vector<1x16x4xf32> to vector<8x16x4xf32>
    %54 = arith.addf %47, %53 : vector<8x16x4xf32>
    %cst_34 = arith.constant dense<0xFF800000> : vector<8x4xf32>
    %55 = vector.multi_reduction <maximumf>, %54, %cst_34 [1] : vector<8x16x4xf32> to vector<8x4xf32>
    %56 = arith.maximumf %55, %50 : vector<8x4xf32>
    %57 = vector.shape_cast %56 : vector<8x4xf32> to vector<8x1x4xf32>
    %58 = vector.broadcast %57 : vector<8x1x4xf32> to vector<8x16x4xf32>
    %59 = arith.subf %54, %58 : vector<8x16x4xf32>
    %60 = math.exp %59 : vector<8x16x4xf32>
    %61 = arith.subf %50, %56 : vector<8x4xf32>
    %62 = math.exp %61 : vector<8x4xf32>
    %cst_35 = arith.constant dense<0.000000e+00> : vector<8x4xf32>
    %63 = vector.multi_reduction <add>, %60, %cst_35 [1] : vector<8x16x4xf32> to vector<8x4xf32>
    %64 = arith.addf %63, %62 : vector<8x4xf32>
    %65 = tpu.reciprocal %64 {approx = true} : vector<8x4xf32> -> vector<8x4xf32>
    %66 = vector.shape_cast %65 : vector<8x4xf32> to vector<8x1x4xf32>
    %67 = vector.broadcast %66 : vector<8x1x4xf32> to vector<8x16x4xf32>
    %68 = arith.mulf %60, %67 : vector<8x16x4xf32>
    %69 = arith.mulf %62, %65 : vector<8x4xf32>
    %c0_36 = arith.constant 0 : index
    %c0_37 = arith.constant 0 : index
    %70 = vector.load %arg14[%c0_36, %c0_37] : memref<4x32xbf16, #tpu.memory_space<vmem>>, vector<4x32xbf16>
    %71 = vector.shape_cast %68 : vector<8x16x4xf32> to vector<128x4xf32>
    %72 = arith.truncf %71 : vector<128x4xf32> to vector<128x4xbf16>
    %cst_38 = arith.constant dense<0.000000e+00> : vector<128x32xf32>
    %73 = tpu.matmul %72, %70, %cst_38 {dimension_numbers = #tpu.dot_dimension_numbers<[1], [0], [0], [1], [0, 0, 1, 1], [], []>} : vector<128x4xbf16>, vector<4x32xbf16>, vector<128x32xf32> -> vector<128x32xf32>
    %74 = vector.shape_cast %73 : vector<128x32xf32> to vector<8x16x32xf32>
    %75 = arith.truncf %69 : vector<8x4xf32> to vector<8x4xbf16>
    %cst_39 = arith.constant dense<0.000000e+00> : vector<8x32xf32>
    %76 = tpu.matmul %75, %70, %cst_39 {dimension_numbers = #tpu.dot_dimension_numbers<[1], [0], [0], [1], [0, 0, 1, 1], [], []>} : vector<8x4xbf16>, vector<4x32xbf16>, vector<8x32xf32> -> vector<8x32xf32>
    %77 = arith.mulf %74, %27 : vector<8x16x32xf32>
    %cst_40 = arith.constant dense<0.000000e+00> : vector<8x32xf32>
    %78 = vector.multi_reduction <add>, %77, %cst_40 [1] : vector<8x16x32xf32> to vector<8x32xf32>
    %79 = arith.mulf %76, %39 : vector<8x32xf32>
    %80 = arith.addf %78, %79 : vector<8x32xf32>
    %81 = arith.truncf %80 : vector<8x32xf32> to vector<8x32xbf16>
    %c0_41 = arith.constant 0 : index
    %c0_42 = arith.constant 0 : index
    %82 = vector.load %arg11[%c0_41, %c0_42] : memref<32x128xbf16, #tpu.memory_space<vmem>>, vector<32x128xbf16>
    %cst_43 = arith.constant dense<0.000000e+00> : vector<8x128xf32>
    %83 = tpu.matmul %81, %82, %cst_43 {dimension_numbers = #tpu.dot_dimension_numbers<[1], [0], [0], [1], [0, 0, 1, 1], [], []>} : vector<8x32xbf16>, vector<32x128xbf16>, vector<8x128xf32> -> vector<8x128xf32>
    %c0_44 = arith.constant 0 : index
    %c0_45 = arith.constant 0 : index
    %84 = vector.load %arg12[%c0_44, %c0_45] : memref<1x128xf32, #tpu.memory_space<vmem>>, vector<1x128xf32>
    %85 = vector.broadcast %84 : vector<1x128xf32> to vector<8x128xf32>
    %86 = arith.addf %83, %85 : vector<8x128xf32>
    %c0_46 = arith.constant 0 : index
    %c0_47 = arith.constant 0 : index
    %87 = vector.load %arg16[%c0_46, %c0_47] : memref<8x128xf32, #tpu.memory_space<vmem>>, vector<8x128xf32>
    tpu.vector_store %arg16[%c0_46, %c0_47], %86 {strides = array<i32>} : memref<8x128xf32, #tpu.memory_space<vmem>>, vector<8x128xf32>,
    return
  }
  func.func @transform_0(%arg0: i32) -> (i32, i32, i32) {
    %c0_i32 = arith.constant 0 : i32
    %c0_i32_0 = arith.constant 0 : i32
    %c0_i32_1 = arith.constant 0 : i32
    return %arg0, %c0_i32, %c0_i32_0 : i32, i32, i32
  }
  func.func @transform_1(%arg0: i32) -> (i32, i32) {
    %c0_i32 = arith.constant 0 : i32
    %c0_i32_0 = arith.constant 0 : i32
    %c0_i32_1 = arith.constant 0 : i32
    return %c0_i32, %c0_i32_0 : i32, i32
  }
  func.func @transform_2(%arg0: i32) -> (i32, i32) {
    %c0_i32 = arith.constant 0 : i32
    %c0_i32_0 = arith.constant 0 : i32
    %c0_i32_1 = arith.constant 0 : i32
    return %c0_i32, %c0_i32_0 : i32, i32
  }
  func.func @transform_3(%arg0: i32) -> (i32, i32) {
    %c0_i32 = arith.constant 0 : i32
    %c0_i32_0 = arith.constant 0 : i32
    %c0_i32_1 = arith.constant 0 : i32
    return %c0_i32, %c0_i32_0 : i32, i32
  }
  func.func @transform_4(%arg0: i32) -> (i32, i32) {
    %c0_i32 = arith.constant 0 : i32
    %c0_i32_0 = arith.constant 0 : i32
    %c0_i32_1 = arith.constant 0 : i32
    return %c0_i32, %c0_i32_0 : i32, i32
  }
  func.func @transform_5(%arg0: i32) -> (i32, i32) {
    %c0_i32 = arith.constant 0 : i32
    %c0_i32_0 = arith.constant 0 : i32
    %c0_i32_1 = arith.constant 0 : i32
    return %c0_i32, %c0_i32_0 : i32, i32
  }
  func.func @transform_6(%arg0: i32) -> (i32, i32) {
    %c0_i32 = arith.constant 0 : i32
    %c0_i32_0 = arith.constant 0 : i32
    %c0_i32_1 = arith.constant 0 : i32
    return %c0_i32, %c0_i32_0 : i32, i32
  }
  func.func @transform_7(%arg0: i32) -> (i32, i32) {
    %c0_i32 = arith.constant 0 : i32
    %c0_i32_0 = arith.constant 0 : i32
    %c0_i32_1 = arith.constant 0 : i32
    return %c0_i32, %c0_i32_0 : i32, i32
  }
  func.func @transform_8(%arg0: i32) -> (i32, i32) {
    %c0_i32 = arith.constant 0 : i32
    %c0_i32_0 = arith.constant 0 : i32
    %c0_i32_1 = arith.constant 0 : i32
    return %c0_i32, %c0_i32_0 : i32, i32
  }
  func.func @transform_9(%arg0: i32) -> (i32, i32) {
    %c0_i32 = arith.constant 0 : i32
    %c0_i32_0 = arith.constant 0 : i32
    %c0_i32_1 = arith.constant 0 : i32
    return %c0_i32, %c0_i32_0 : i32, i32
  }
  func.func @transform_10(%arg0: i32) -> (i32, i32) {
    %c0_i32 = arith.constant 0 : i32
    %c0_i32_0 = arith.constant 0 : i32
    %c0_i32_1 = arith.constant 0 : i32
    return %c0_i32, %c0_i32_0 : i32, i32
  }
  func.func @transform_11(%arg0: i32) -> (i32, i32) {
    %c0_i32 = arith.constant 0 : i32
    %c0_i32_0 = arith.constant 0 : i32
    %c0_i32_1 = arith.constant 0 : i32
    return %c0_i32, %c0_i32_0 : i32, i32
  }
  func.func @transform_12(%arg0: i32) -> (i32, i32) {
    %c0_i32 = arith.constant 0 : i32
    %c0_i32_0 = arith.constant 0 : i32
    %c0_i32_1 = arith.constant 0 : i32
    return %c0_i32, %c0_i32_0 : i32, i32
  }
  func.func @transform_13(%arg0: i32) -> (i32, i32) {
    %c0_i32 = arith.constant 0 : i32
    %c0_i32_0 = arith.constant 0 : i32
    %c0_i32_1 = arith.constant 0 : i32
    return %c0_i32, %c0_i32_0 : i32, i32
  }
  func.func @transform_14(%arg0: i32) -> (i32, i32) {
    %c0_i32 = arith.constant 0 : i32
    %c0_i32_0 = arith.constant 0 : i32
    %c0_i32_1 = arith.constant 0 : i32
    return %c0_i32, %c0_i32_0 : i32, i32
  }
  func.func @transform_15(%arg0: i32) -> (i32, i32) {
    %c0_i32 = arith.constant 0 : i32
    %c0_i32_0 = arith.constant 0 : i32
    return %arg0, %c0_i32 : i32, i32
  }
}

</mosaic_0001>

<bundles_post_ra>
// kernel: tpu_custom_call.1
= control target key start
LH: loop header
LB: loop body
LE: loop exit
PB: predicated region body
PF: predicated region fallthrough
CT: control target
= control target key end

     0   :  { %s4352_s0 = inlined_call_operand.hbm [shape: f32[16,16,32], index: 0, kind: input, shape index: {}]   ;;  %s4353_s1 = inlined_call_operand.vmem [shape: f32[16,32], index: 1, kind: input, shape index: {}]   ;;  %s4354_s2 = inlined_call_operand.hbm [shape: f32[1,32], index: 2, kind: input, shape index: {}]   ;;  %s4355_s3 = inlined_call_operand.hbm [shape: f32[1,32], index: 3, kind: input, shape index: {}]   ;;  %s4356_s4 = inlined_call_operand.hbm [shape: f32[1,32], index: 4, kind: input, shape index: {}]   ;;  %s4357_s5 = inlined_call_operand.vmem [shape: bf16[32,32], index: 5, kind: input, shape index: {}]   ;;  %s4358_s6 = inlined_call_operand.vmem [shape: bf16[32,32], index: 6, kind: input, shape index: {}]   ;;  %s4359_s7 = inlined_call_operand.hbm [shape: f32[1,32], index: 7, kind: input, shape index: {}]   ;;  %s4360_s8 = inlined_call_operand.vmem [shape: bf16[32,32], index: 8, kind: input, shape index: {}]   ;;  %s4361_s9 = inlined_call_operand.hbm [shape: f32[1,32], index: 9, kind: input, shape index: {}]   ;;  %s4362_s10 = inlined_call_operand.hbm [shape: bf16[32,128], index: 10, kind: input, shape index: {}]   ;;  %s4363_s11 = inlined_call_operand.vmem [shape: f32[1,128], index: 11, kind: input, shape index: {}]   ;;  %s4364_s12 = inlined_call_operand.vmem [shape: bf16[32,4], index: 12, kind: input, shape index: {}]   ;;  %s4365_s13 = inlined_call_operand.vmem [shape: bf16[4,32], index: 13, kind: input, shape index: {}]   ;;  %s4366_s14 = inlined_call_operand.vmem [shape: f32[16,4], index: 14, kind: input, shape index: {}]   ;;  %s4367_s15 = inlined_call_operand.hbm [shape: f32[16,128], index: 15, kind: output, shape index: {}]  }
   0x1   :  { %4377 = sst [smem:[#allocation20_spill]] %s4352_s0 }
   0x2   :  { %4378 = sst [smem:[#allocation21_spill]] %s4353_s1 }
   0x3   :  { %4379 = sst [smem:[#allocation22_spill]] %s4354_s2 }
   0x4   :  { %4380 = sst [smem:[#allocation23_spill]] %s4360_s8 }
   0x5   :  { %4381 = sst [smem:[#allocation24_spill]] %s4363_s11 }
   0x6   :  { %4382 = sst [smem:[#allocation25_spill]] %s4364_s12 }
   0x7   :  { %4383 = sst [smem:[#allocation26_spill]] %s4365_s13 }
   0x8   :  { %4384 = sst [smem:[#allocation27_spill]] %s4366_s14 }
   0x9   :  { %4385 = sst [smem:[#allocation28_spill]] %s4367_s15 }
   0xa   :  { %20 = vsyncpa [#allocation3], 0 }
   0xb   :  { %22 = vsyncpa [#allocation3 + $0x1], 0 }
   0xc   :  { %23 = vsyncpa [#allocation6], 0 }
   0xd   :  { %24 = vsyncpa [#allocation9], 0 }
   0xe   :  { %25 = vsyncpa [#allocation12], 0 }
   0xf   :  { %26 = vsyncpa [#allocation4], 0 }
  0x10   :  { %28 = vsyncpa [#allocation4 + $0x1], 0  ;;  %s3338_s18 = smov 0   ;;  %s3340_s19 = smov 0  }
  0x11   :  { %s3342_s20 = smov 0   ;;  %s3344_s21 = smov 0  }
  0x12 LB: > { %s3243_s22 = smov [#allocation5]   ;;  %s3359_s24 = sadd.s32 4294967295, %s3241_s21   ;;  %s3241_s21 = sphi %s3344_s21, %s4419_s21   ;;  %s3237_s20 = sphi %s3342_s20, %s4418_s20   ;;  %s3233_s19 = sphi %s3340_s19, %s4417_s19   ;;  %s3229_s18 = sphi %s3338_s18, %s4416_s18  }
  0x13   : > { %s401_s23 = sshll.u32 %s3243_s22, 4  ;;  %p2553_p0 = scmp.ge.s32.totalorder %s3241_s21, 1  ;;  %s3364_s23 = int_to_ptr.vmem [resolvable:$true] %s401_s23 }
  0x14   : > { %p4372_p1 = scmp.eq.s32.totalorder %s3359_s24, 0  ;;  %p385_p2 = scmp.lt.s32.totalorder %s3241_s21, 3 }
  0x15   : > { %s3244_s26 = smov [#allocation8]   ;;  %s3245_s28 = smov [#allocation11]  }
  0x16   : > { %p3366_p3 = pnand %p2553_p0, %p385_p2  ;;  %s423_s27 = sshll.u32 %s3244_s26, 4  ;;  %s3373_s27 = int_to_ptr.vmem [resolvable:$true] %s423_s27 }
  0x17   : > { %s454_s29 = sshll.u32 %s3245_s28, 4  ;;  %s3246_s16 = smov [#allocation7]   ;;  %s3381_s29 = int_to_ptr.vmem [resolvable:$true] %s454_s29 }
  0x18   : > { %s4386_s25 = scalar_select %p3366_p3, 1, 0 }
  0x19   : > { %p2819_p5 = pneg %p3366_p3  ;;  %s3383_s17 = sshll.u32 %s3246_s16, 4  ;;  %s413_s17 = int_to_ptr.vmem [resolvable:$true] %s3383_s17 }
  0x1a   : > { %s4388_s2 = sld [smem:[#allocation22_spill]] }
  0x1b   : > { %p3377_p6 = pnand %p2819_p5, %p4372_p1 }
  0x1d   : > { %p3393_p8 = pneg %p3377_p6 }
  0x20   : > { %s2965_s11 = scalar_lea.hbm %s4388_s2, 16 }
  0x21   : > { %p2966_p7 = scmp.ne.s32.totalorder %s4388_s2, %s2965_s11  ;;  %p2972_p11 = scmp.lt.u32.totalorder %s2965_s11, %s4388_s2 }
  0x23   : > { %p2968_p9 = pnand %p3393_p8, %p2966_p7 }
  0x25   : > { %p2969_p10 = pneg %p2968_p9 }
  0x27   : > { %p2974_p12 = pnand %p2972_p11, %p2969_p10 }
  0x29   : > { %2977 = shalt.err (!%p2974_p12)
}
  0x2a   : > { %s2978_s14 = scalar_lea.vmem %s3364_s23, 16  ;;  %s2985_s15 = scalar_lea.vmem %s3364_s23, 32 }
  0x2b   : > { %p2979_p13 = scmp.ne.s32.totalorder %s3364_s23, %s2978_s14  ;;  %p2986_p5 = scmp.lt.s32.totalorder %s3364_s23, %s3364_s23 }
  0x2c   : > { %p2987_p7 = scmp.lt.s32.totalorder %s2985_s15, %s2978_s14 }
  0x2d   : > { %p2981_p0 = pnand %p2979_p13, %p3393_p8 }
  0x2e   : > { %p2988_p9 = por %p2987_p7, %p2986_p5 }
  0x2f   : > { %p2982_p2 = pneg %p2981_p0 }
  0x31   : > { %p2989_p4 = pnand %p2988_p9, %p2982_p2 }
  0x33   : > { %2992 = shalt.err (!%p2989_p4)
}
  0x34   : > { %2822 = dma.hbm_to_vmem [thread:$0]  (!%p3377_p6), %s4388_s2, 16, %s3364_s23, [#allocation6]  }
  0x35   : > { %s2993_s16 = scalar_lea.hbm %s4356_s4, 16 }
  0x36   : > { %p2994_p10 = scmp.ne.s32.totalorder %s4356_s4, %s2993_s16  ;;  %p3000_p4 = scmp.lt.u32.totalorder %s2993_s16, %s4356_s4 }
  0x38   : > { %p2996_p11 = pnand %p2994_p10, %p3393_p8 }
  0x3a   : > { %p2997_p12 = pneg %p2996_p11 }
  0x3c   : > { %p3002_p13 = pnand %p3000_p4, %p2997_p12 }
  0x3e   : > { %3005 = shalt.err (!%p3002_p13)
}
  0x3f   : > { %s3006_s23 = scalar_lea.vmem %s3373_s27, 16  ;;  %s3013_s8 = scalar_lea.vmem %s3373_s27, 32 }
  0x40   : > { %p3007_p0 = scmp.ne.s32.totalorder %s3373_s27, %s3006_s23  ;;  %p3014_p7 = scmp.lt.s32.totalorder %s3373_s27, %s3373_s27 }
  0x41   : > { %p3015_p9 = scmp.lt.s32.totalorder %s3013_s8, %s3006_s23 }
  0x42   : > { %p3009_p2 = pnand %p3007_p0, %p3393_p8 }
  0x43   : > { %p3016_p10 = por %p3015_p9, %p3014_p7 }
  0x44   : > { %p3010_p5 = pneg %p3009_p2 }
  0x46   : > { %p3017_p11 = pnand %p3016_p10, %p3010_p5 }
  0x48   : > { %3020 = shalt.err (!%p3017_p11)
}
  0x49   : > { %2828 = dma.hbm_to_vmem [thread:$0]  (!%p3377_p6), %s4356_s4, 16, %s3373_s27, [#allocation9]  }
  0x4a   : > { %s3021_s26 = scalar_lea.hbm %s4361_s9, 16 }
  0x4b   : > { %p3022_p12 = scmp.ne.s32.totalorder %s4361_s9, %s3021_s26  ;;  %p3028_p0 = scmp.lt.u32.totalorder %s3021_s26, %s4361_s9 }
  0x4d   : > { %p3024_p4 = pnand %p3022_p12, %p3393_p8 }
  0x4f   : > { %p3025_p13 = pneg %p3024_p4 }
  0x51   : > { %p3030_p2 = pnand %p3028_p0, %p3025_p13 }
  0x53   : > { %3033 = shalt.err (!%p3030_p2)
}
  0x54   : > { %s3034_s27 = scalar_lea.vmem %s3381_s29, 16  ;;  %s3041_s8 = scalar_lea.vmem %s3381_s29, 32 }
  0x55   : > { %p3035_p5 = scmp.ne.s32.totalorder %s3381_s29, %s3034_s27  ;;  %p3042_p10 = scmp.lt.s32.totalorder %s3381_s29, %s3381_s29 }
  0x56   : > { %p3043_p11 = scmp.lt.s32.totalorder %s3041_s8, %s3034_s27 }
  0x57   : > { %p3037_p7 = pnand %p3035_p5, %p3393_p8 }
  0x58   : > { %p3044_p12 = por %p3043_p11, %p3042_p10 }
  0x59   : > { %p3038_p9 = pneg %p3037_p7 }
  0x5b   : > { %p3045_p4 = pnand %p3044_p12, %p3038_p9 }
  0x5d   : > { %3048 = shalt.err (!%p3045_p4)
}
  0x5e   : > { %2834 = dma.hbm_to_vmem [thread:$0]  (!%p3377_p6), %s4361_s9, 16, %s3381_s29, [#allocation12]  }
  0x5f   : > { %s3247_s13 = smov [#allocation10]   ;;  %s3049_s14 = scalar_lea.hbm %s4355_s3, 16 }
  0x60   : > { %s440_s22 = sshll.u32 %s3247_s13, 4  ;;  %p3050_p13 = scmp.ne.s32.totalorder %s4355_s3, %s3049_s14  ;;  %s441_s22 = int_to_ptr.vmem [resolvable:$true] %s440_s22 }
  0x61   : > { %p3056_p5 = scmp.lt.u32.totalorder %s3049_s14, %s4355_s3 }
  0x62   : > { %p3052_p0 = pnand %p3050_p13, %p3393_p8 }
  0x64   : > { %p3053_p2 = pneg %p3052_p0 }
  0x66   : > { %p3058_p7 = pnand %p3056_p5, %p3053_p2 }
  0x68   : > { %3061 = shalt.err (!%p3058_p7)
}
  0x69   : > { %s3062_s29 = scalar_lea.vmem %s413_s17, 16  ;;  %s3069_s12 = scalar_lea.vmem %s413_s17, 32 }
  0x6a   : > { %p3063_p9 = scmp.ne.s32.totalorder %s413_s17, %s3062_s29  ;;  %p3070_p12 = scmp.lt.s32.totalorder %s413_s17, %s413_s17 }
  0x6b   : > { %p3071_p4 = scmp.lt.s32.totalorder %s3069_s12, %s3062_s29 }
  0x6c   : > { %p3065_p10 = pnand %p3063_p9, %p3393_p8 }
  0x6d   : > { %p3072_p1 = por %p3071_p4, %p3070_p12 }
  0x6e   : > { %p3066_p11 = pneg %p3065_p10 }
  0x70   : > { %p3073_p3 = pnand %p3072_p1, %p3066_p11 }
  0x72   : > { %3076 = shalt.err (!%p3073_p3)
}
  0x73   : > { %2825 = dma.hbm_to_vmem [thread:$0]  (!%p3377_p6), %s4355_s3, 16, %s413_s17, [#allocation6]  }
  0x74   : > { %s3077_s14 = scalar_lea.hbm %s4359_s7, 16 }
  0x75   : > { %p3078_p13 = scmp.ne.s32.totalorder %s4359_s7, %s3077_s14  ;;  %p3084_p3 = scmp.lt.u32.totalorder %s3077_s14, %s4359_s7 }
  0x77   : > { %p3080_p0 = pnand %p3078_p13, %p3393_p8 }
  0x79   : > { %p3081_p1 = pneg %p3080_p0 }
  0x7b   : > { %p3086_p2 = pnand %p3084_p3, %p3081_p1 }
  0x7d   : > { %3089 = shalt.err (!%p3086_p2)
}
  0x7e   : > { %s3090_s29 = scalar_lea.vmem %s441_s22, 16  ;;  %s3097_s17 = scalar_lea.vmem %s441_s22, 32 }
  0x7f   : > { %p3091_p5 = scmp.ne.s32.totalorder %s441_s22, %s3090_s29  ;;  %p3098_p10 = scmp.lt.s32.totalorder %s441_s22, %s441_s22 }
  0x80   : > { %p3099_p11 = scmp.lt.s32.totalorder %s3097_s17, %s3090_s29 }
  0x81   : > { %p3093_p7 = pnand %p3091_p5, %p3393_p8 }
  0x82   : > { %p3100_p12 = por %p3099_p11, %p3098_p10 }
  0x83   : > { %p3094_p9 = pneg %p3093_p7 }
  0x85   : > { %p3101_p4 = pnand %p3100_p12, %p3094_p9 }
  0x87   : > { %3104 = shalt.err (!%p3101_p4)
}
  0x88   : > { %2831 = dma.hbm_to_vmem [thread:$0]  (!%p3377_p6), %s4359_s7, 16, %s441_s22, [#allocation9]  }
  0x89   : > { %s3248_s13 = smov [#allocation13]   ;;  %s3105_s15 = scalar_lea.hbm %s4362_s10, 256 }
  0x8a   : > { %s464_s26 = sshll.u32 %s3248_s13, 4  ;;  %p3106_p13 = scmp.ne.s32.totalorder %s4362_s10, %s3105_s15  ;;  %s465_s26 = int_to_ptr.vmem [resolvable:$true] %s464_s26 }
  0x8b   : > { %p3112_p3 = scmp.lt.u32.totalorder %s3105_s15, %s4362_s10 }
  0x8c   : > { %p3108_p0 = pnand %p3106_p13, %p3393_p8 }
  0x8e   : > { %p3109_p1 = pneg %p3108_p0 }
  0x90   : > { %p3114_p2 = pnand %p3112_p3, %p3109_p1 }
  0x92   : > { %3117 = shalt.err (!%p3114_p2)
}
  0x93   : > { %s3118_s22 = scalar_lea.vmem %s465_s26, 256  ;;  %p3126_p10 = scmp.lt.s32.totalorder %s465_s26, %s465_s26 }
  0x94   : > { %p3119_p5 = scmp.ne.s32.totalorder %s465_s26, %s3118_s22  ;;  %p3127_p11 = scmp.lt.s32.totalorder %s3118_s22, %s3118_s22 }
  0x96   : > { %p3121_p7 = pnand %p3119_p5, %p3393_p8  ;;  %p3128_p12 = por %p3127_p11, %p3126_p10 }
  0x98   : > { %p3122_p9 = pneg %p3121_p7 }
  0x9a   : > { %p3129_p4 = pnand %p3128_p12, %p3122_p9 }
  0x9c   : > { %3132 = shalt.err (!%p3129_p4)
}
  0x9d   : > { %s3249_s17 = smov 64   ;;  %s3250_s28 = smov 4  }
  0x9e   : > { %2837 = dma.hbm_to_vmem [thread:$0]  (!%p3377_p6), %s4362_s10, 256, %s465_s26, [#allocation12], %s3249_s17, %s3249_s17, %s3250_s28  }
  0x9f   : > { %s2552_s13 = sadd.s32 4294967294, %s3241_s21   ;;  %s3520_s16 = sadd.s32 1, %s3241_s21  }
  0xa0   : > { %s38_s14 = ssub.s32 %s3241_s21, %s3520_s16  ;;  %s41_s15 = sadd.s32 1, %s3237_s20 }
  0xa1   : > { %p39_p8 = scmp.eq.s32.totalorder %s38_s14, 0  ;;  %p48_p13 = scmp.ne.s32.totalorder %s3237_s20, %s3233_s19 }
  0xa2   : > { %p49_p0 = scmp.eq.s32.totalorder %s3241_s21, 0  ;;  %p54_p1 = scmp.ne.s32.totalorder %s3233_s19, %s3229_s18 }
  0xa3   : > { %s3531_s23 = scalar_select %p39_p8, %s3237_s20, %s41_s15  }
  0xa4   : > { %p3533_p3 = por %p49_p0, %p48_p13  ;;  %p4391_p2 = scmp.eq.s32.totalorder %s3359_s24, 0 }
  0xa5   : > { %p372_p5 = scmp.eq.s32.totalorder %s3359_s24, 1  ;;  %p378_p7 = scmp.eq.s32.totalorder %s2552_s13, 1 }
  0xa6   : > { %p3539_p6 = por %p4391_p2, %p54_p1  ;;  %p2852_p9 = scmp.lt.s32.totalorder %s3241_s21, 2 }
  0xa7   : > { %s490_s27 = sand.u32 1, %s3237_s20   ;;  %p3546_p10 = por %p372_p5, %p48_p13 }
  0xa8   : > { %p3550_p11 = por %p378_p7, %p54_p1  ;;  %s2561_s22 = sshll.u32 %s490_s27, 7 }
  0xa9   : > { %s4393_s8 = scalar_select %p3546_p10, 1, 0 }
  0xaa   : > { %s4394_s29 = scalar_select %p3550_p11, 1, 0 }
  0xab   : > { %s2631_s17 = sshll.u32 %s3241_s21, 11  ;;  %s4395_s0 = sld [smem:[#allocation20_spill]] }
  0xac   : > { %s494_s13 = scalar_lea.vmem [#allocation2], %s2561_s22  ;;  %p3564_p12 = pnand %p2852_p9, %p3533_p3 }
  0xad   : > { %s502_s14 = sshll.u32 %s494_s13, 4  ;;  %s3568_s2 = scalar_lea.sflag [#allocation3], %s490_s27  ;;  %s3560_s14 = int_to_ptr.vmem [resolvable:$true] %s502_s14 }
  0xae   : > { %p3135_p8 = pneg %p3564_p12 }
  0xb1   : > { %s3558_s11 = scalar_lea.hbm %s4395_s0, %s2631_s17  ;;  %s3138_s30 = scalar_lea.hbm %s4395_s0, 4096 }
  0xb2   : > { %s3133_s28 = scalar_lea.hbm %s3558_s11, 2048  ;;  %p3139_p1 = scmp.lt.u32.totalorder %s3558_s11, %s4395_s0 }
  0xb3   : > { %p3134_p4 = scmp.ne.s32.totalorder %s3558_s11, %s3133_s28  ;;  %p3140_p3 = scmp.lt.u32.totalorder %s3138_s30, %s3133_s28 }
  0xb4   : > { %p3142_p5 = scmp.lt.u32.totalorder %s3133_s28, %s3558_s11 }
  0xb5   : > { %p3136_p13 = pnand %p3135_p8, %p3134_p4  ;;  %p3141_p2 = por %p3140_p3, %p3139_p1 }
  0xb7   : > { %p3137_p0 = pneg %p3136_p13  ;;  %p3143_p7 = por %p3142_p5, %p3141_p2 }
  0xb9   : > { %p3144_p9 = pnand %p3143_p7, %p3137_p0 }
  0xbb   : > { %3147 = shalt.err (!%p3144_p9)
}
  0xbc   : > { %s3148_s27 = scalar_lea.vmem %s3560_s14, 2048  ;;  %s3251_s22 = smov [#allocation2]  }
  0xbd   : > { %p3149_p4 = scmp.ne.s32.totalorder %s3560_s14, %s3148_s27  ;;  %s3153_s17 = sshll.u32 %s3251_s22, 4  ;;  %s3154_s17 = int_to_ptr.vmem [resolvable:$false] %s3153_s17 }
  0xbe   : > { %s3155_s12 = scalar_lea.vmem %s3154_s17, 4096  ;;  %p3156_p10 = scmp.lt.s32.totalorder %s3560_s14, %s3154_s17 }
  0xbf   : > { %p3151_p13 = pnand %p3149_p4, %p3135_p8  ;;  %p3157_p1 = scmp.lt.s32.totalorder %s3155_s12, %s3148_s27 }
  0xc1   : > { %p3152_p11 = pneg %p3151_p13  ;;  %p3158_p3 = por %p3157_p1, %p3156_p10 }
  0xc3   : > { %p3159_p2 = pnand %p3158_p3, %p3152_p11 }
  0xc5   : > { %3162 = shalt.err (!%p3159_p2)
}
  0xc6   : > { %s3252_s28 = smov 128   ;;  %s3253_s30 = smov 8  }
  0xc7   : > { %2841 = dma.hbm_to_vmem [thread:$0]  (!%p3564_p12), %s3558_s11, 2048, %s3560_s14, %s3568_s2, %s3252_s28, %s3252_s28, %s3253_s30  }
  0xc8   : > { %p4397_p8 = scmp.ne.s32.totalorder %s4386_s25, 0 }
  0xc9   : > { %s3599_s13 = sand.u32 (!%p4397_p8), 1, %s3233_s19  }
  0xca   : > { %514 = sbr.rel (%p4397_p8) target bundleno = 1298 (0x512), region = 80  ;;  %s2566_s27 = sshll.u32 (!%p4397_p8), %s3599_s13, 7 }
  0xcb   : > { %s517_s22 = scalar_lea.sflag (!%p4397_p8), [#allocation3], %s3599_s13  ;;  %s3603_s17 = scalar_lea.vmem (!%p4397_p8), [#allocation2], %s2566_s27 }
  0xd1   : > { %3208 = dma.done.wait (%p3539_p6), %s517_s22, 2048  }
  0xd2   : > { %3210 = vsyncadd (%p3539_p6), %s517_s22, 4294965248  ;;  %p4398_p10 = scmp.eq.s32.totalorder %s3359_s24, 0 }
  0xd4   : > { %3212 = dma.done.wait (%p4398_p10), [#allocation6], 32   ;;  %p4399_p11 = pmov %p4398_p10 }
  0xd5   : > { %p4400_p12 = pmov %p4398_p10 }
  0xd6   : > { %3214 = vsyncadd (%p4399_p11), [#allocation6], 4294967264 }
  0xd7   : > { %3216 = dma.done.wait (%p4400_p12), [#allocation9], 32   ;;  %p4401_p0 = pmov %p4398_p10 }
  0xd9   : > { %3218 = vsyncadd (%p4401_p0), [#allocation9], 4294967264  ;;  %p4402_p5 = pmov %p4401_p0 }
  0xda   : > { %p4403_p7 = pmov %p4401_p0 }
  0xdb   : > { %3220 = dma.done.wait (%p4402_p5), [#allocation12], 272  }
  0xdc   : > { %3222 = vsyncadd (%p4403_p7), [#allocation12], 4294967024  ;;  %v4375_v0 = vmov 0.0   ;;  %vm3255_vm0 = vmmov 0   ;;  %v2905_v1 = vld [vmem:[%s4358_s6] sm:$0xff]   ;;  %vm635_vm1 = vcmask 261120  }
  0xdd   : > { %2682 = vmatprep.subr.bf16.mxu0 %v4375_v0  ;;  %2686 = vmatprep.mubr.msk.bf16.mxu0 %vm3255_vm0, %v4375_v0  ;;  %v2906_v2 = vld [vmem:[%s4358_s6 + $0x8] sm:$0xff]   ;;  %v593_v3 = vld [vmem:[%s3603_s17] sm:$0xff]  ;;  %s4404_s1 = sld [smem:[#allocation21_spill]]  ;;  %v595_v10 = vld [vmem:[%s3603_s17 + $0x10] sm:$0xff]  ;;  %s4405_s11 = sld [smem:[#allocation23_spill]]  ;;  %vm751_vm2 = vcmask 1041409  }
  0xde   : > { %2690 = vmatprep.subr.bf16.mxu1 %v2905_v1  ;;  %v594_v4 = vld [vmem:[%s3603_s17 + $0x8] sm:$0xff]  ;;  %v636_v8 = vsel %vm635_vm1, %v593_v3, 0.0  ;;  %v596_v11 = vld [vmem:[%s3603_s17 + $0x18] sm:$0xff]  ;;  %v597_v16 = vld [vmem:[%s3603_s17 + $0x20] sm:$0xff]  ;;  %v645_v18 = vsel %vm635_vm1, %v595_v10, 0.0  ;;  %vm753_vm3 = vcmask 1042434  }
  0xdf   : > { %2691 = vmatpush3.bf16.msra.mxu1 %v2905_v1  ;;  %v637_v9 = vsel %vm635_vm1, %v594_v4, 0.0  ;;  %v598_v17 = vld [vmem:[%s3603_s17 + $0x28] sm:$0xff]  ;;  %v646_v19 = vsel %vm635_vm1, %v596_v11, 0.0  ;;  %v2907_v22 = vld [vmem:[%s4357_s5] sm:$0xff]   ;;  %v599_v27 = vld [vmem:[%s3603_s17 + $0x30] sm:$0xff]  ;;  %v654_v30 = vsel %vm635_vm1, %v597_v16, 0.0 }
  0xe0   : > { %2692 = vmatprep.subr.bf16.mxu1 %v2906_v2  ;;  %v638_v13 = vadd.f32 %v637_v9, %v636_v8  ;;  %v647_v26 = vadd.f32 %v646_v19, %v645_v18  ;;  %v600_v28 = vld [vmem:[%s3603_s17 + $0x38] sm:$0xff]  ;;  %v655_v31 = vsel %vm635_vm1, %v598_v17, 0.0  ;;  %2683 = vmatpush3.bf16.msra.mxu0 %v2907_v22  ;;  %v601_v33 = vld [vmem:[%s3603_s17 + $0x40] sm:$0xff]  ;;  %v602_v38 = vld [vmem:[%s3603_s17 + $0x48] sm:$0xff]  ;;  %v663_v40 = vsel %vm635_vm1, %v599_v27, 0.0  ;;  %s4406_s28 = sld [smem:[#allocation25_spill]] }
  0xe1   : > { %v656_v36 = vadd.f32 %v655_v31, %v654_v30  ;;  %2684 = vmatprep.subr.bf16.mxu0 %v4375_v0  ;;  %v2908_v39 = vld [vmem:[%s4357_s5 + $0x8] sm:$0xff]   ;;  %v664_v41 = vsel %vm635_vm1, %v600_v28, 0.0  ;;  %v603_v44 = vld [vmem:[%s3603_s17 + $0x50] sm:$0xff]  ;;  %v604_v49 = vld [vmem:[%s3603_s17 + $0x58] sm:$0xff]  ;;  %v672_v52 = vsel %vm635_vm1, %v601_v33, 0.0  ;;  %v673_v53 = vsel %vm635_vm1, %v602_v38, 0.0 }
  0xe2   : > { %v639_v24 = vrot.slane %v638_v13, 4  ;;  %v648_v35 = vrot.slane %v647_v26, 4  ;;  %v665_v50 = vadd.f32 %v664_v41, %v663_v40  ;;  %v605_v54 = vld [vmem:[%s3603_s17 + $0x60] sm:$0xff]  ;;  %v674_v59 = vadd.f32 %v673_v53, %v672_v52  ;;  %v3702_v60 = vld [vmem:[%s3603_s17 + $0x68] sm:$0xff]  ;;  %v3709_v8 = vld [vmem:[%s3603_s17 + $0x70] sm:$0xff]  ;;  %s4407_s25 = sld [smem:[#allocation26_spill]] }
  0xe3   : > { %v3635_v5 = vld [vmem:[%s4404_s1] sm:$0xff]  ;;  %v3640_v6 = vld [vmem:[%s4404_s1 + $0x8] sm:$0xff]  ;;  %2693 = vmatpush3.bf16.msra.mxu1 %v2906_v2  ;;  %v657_v47 = vrot.slane %v656_v36, 4  ;;  %v681_v1 = vsel %vm635_vm1, %v603_v44, 0.0  ;;  %vm755_vm4 = vcmask 1043459   ;;  %vm757_vm5 = vcmask 1044484  }
  0xe4   : > { %v611_v7 = vadd.f32 %v3635_v5, %v593_v3  ;;  %v612_v12 = vadd.f32 %v3640_v6, %v594_v4  ;;  %v613_v14 = vadd.f32 %v3635_v5, %v595_v10  ;;  %v614_v15 = vadd.f32 %v3640_v6, %v596_v11  ;;  %2685 = vmatpush3.bf16.msra.mxu0 %v2908_v39  ;;  %v3699_v55 = vld [vmem:[%s4405_s11] sm:$0xff]   ;;  %s4408_s14 = sld [smem:[#allocation27_spill]]  ;;  %s2573_s30 = sshll.u32 %s3599_s13, 3 }
  0xe5   : > { %v615_v20 = vadd.f32 %v3635_v5, %v597_v16  ;;  %v616_v21 = vadd.f32 %v3640_v6, %v598_v17  ;;  %v617_v32 = vadd.f32 %v3635_v5, %v599_v27  ;;  %v640_v34 = vadd.f32 %v639_v24, %v638_v13  ;;  %2710 = vmatprep.subr.bf16.mxu0 %v3699_v55  ;;  %v608_v17 = vld [vmem:[%s3603_s17 + $0x78] sm:$0xff]  ;;  %s4411_s2 = sld [smem:[#allocation24_spill]]  ;;  %s590_s26 = scalar_lea.vmem [#allocation14], %s2573_s30 }
  0xe6   : > { %v3659_v23 = vpack.c.bf16 %v612_v12, %v611_v7  ;;  %v3661_v25 = vpack.c.bf16 %v614_v15, %v613_v14  ;;  %v618_v37 = vadd.f32 %v3640_v6, %v600_v28  ;;  %v619_v42 = vadd.f32 %v3635_v5, %v601_v33  ;;  %s2425_s17 = sshll.u32 %s590_s26, 4  ;;  %s4412_s0 = sld [smem:[#allocation28_spill]]  ;;  %s4310_s17 = int_to_ptr.vmem [resolvable:$true] %s2425_s17 }
  0xe7   : > { %v3665_v29 = vpack.c.bf16 %v616_v21, %v615_v20  ;;  %v620_v43 = vadd.f32 %v3640_v6, %v602_v38  ;;  %v641_v45 = vrot.slane %v640_v34, 2  ;;  %v649_v46 = vadd.f32 %v648_v35, %v647_v26  ;;  %s2412_s27 = scalar_lea.sflag [#allocation4], %s3599_s13  ;;  %p4413_p9 = scmp.ne.s32.totalorder %s4393_s8, 0 }
  0xe8   : > { %2694 = vmatprep.mubr.msk.bf16.mxu1 %vm635_vm1, %v3659_v23  ;;  %v3686_v48 = vpack.c.bf16 %v618_v37, %v617_v32  ;;  %v658_v58 = vadd.f32 %v657_v47, %v656_v36  ;;  %v666_v61 = vrot.slane %v665_v50, 4  ;;  %v621_v62 = vadd.f32 %v3635_v5, %v603_v44  ;;  %s3257_s30 = smov [#allocation14]  }
  0xe9   : > { %2695 = vmatmul.mubr.msk.bf16.vlgmr.msra.gmra.mrb[0].mxu1 %vm635_vm1, %v3661_v25  ;;  %v3691_v51 = vpack.c.bf16 %v620_v43, %v619_v42  ;;  %v642_v56 = vadd.f32 %v641_v45, %v640_v34  ;;  %v650_v57 = vrot.slane %v649_v46, 2  ;;  %v622_v63 = vadd.f32 %v3640_v6, %v604_v49  ;;  %s3167_s22 = sshll.u32 %s3257_s30, 4  ;;  %s3168_s22 = int_to_ptr.vmem [resolvable:$false] %s3167_s22 }
  0xea   : > { %2698 = vmatprep.mubr.msk.bf16.mxu1 %vm635_vm1, %v3665_v29  ;;  %v659_v4 = vrot.slane %v658_v58, 2  ;;  %v675_v7 = vrot.slane %v674_v59, 4  ;;  %v667_v9 = vadd.f32 %v666_v61, %v665_v50  ;;  %v682_v11 = vsel %vm635_vm1, %v604_v49, 0.0  ;;  %p3170_p1 = scmp.lt.s32.totalorder %s4310_s17, %s3168_s22 }
  0xeb   : > { %v643_v2 = vrot.slane %v642_v56, 1  ;;  %v651_v3 = vadd.f32 %v650_v57, %v649_v46  ;;  %v3711_v10 = vpack.c.bf16 %v622_v63, %v621_v62  ;;  %v690_v12 = vsel %vm635_vm1, %v605_v54, 0.0 }
  0xec   : > { %v660_v15 = vadd.f32 %v659_v4, %v658_v58  ;;  %v676_v16 = vadd.f32 %v675_v7, %v674_v59  ;;  %v668_v18 = vrot.slane %v667_v9, 2  ;;  %v683_v19 = vadd.f32 %v682_v11, %v681_v1 }
  0xed   : > { %v644_v13 = vadd.f32 %v643_v2, %v642_v56  ;;  %v652_v14 = vrot.slane %v651_v3, 1  ;;  %v691_v20 = vsel %vm635_vm1, %v3702_v60, 0.0  ;;  %v699_v21 = vsel %vm635_vm1, %v3709_v8, 0.0 }
  0xee   : > { %v661_v26 = vrot.slane %v660_v15, 1  ;;  %v677_v27 = vrot.slane %v676_v16, 2  ;;  %v669_v28 = vadd.f32 %v668_v18, %v667_v9  ;;  %v684_v30 = vrot.slane %v683_v19, 4 }
  0xef   : > { %v708_v22 = vmul.f32 0.0625, %v644_v13  ;;  %v653_v24 = vadd.f32 %v652_v14, %v651_v3  ;;  %v692_v31 = vadd.f32 %v691_v20, %v690_v12  ;;  %v700_v32 = vsel %vm635_vm1, %v608_v17, 0.0 }
  0xf0   : > { %v662_v35 = vadd.f32 %v661_v26, %v660_v15  ;;  %v678_v36 = vadd.f32 %v677_v27, %v676_v16  ;;  %v670_v37 = vrot.slane %v669_v28, 1  ;;  %v685_v38 = vadd.f32 %v684_v30, %v683_v19 }
  0xf1   : > { %2699 = vmatmul.mubr.msk.bf16.gmra.mrb[4].mxu1 %vm635_vm1, %v3686_v48  ;;  %v716_v33 = vpack.c.bf16 %v708_v22, %v708_v22  ;;  %v709_v34 = vmul.f32 0.0625, %v653_v24  ;;  %v693_v39 = vrot.slane %v692_v31, 4  ;;  %v701_v40 = vadd.f32 %v700_v32, %v699_v21 }
  0xf2   : > { %2702 = vmatprep.mubr.msk.bf16.mxu1 %vm635_vm1, %v3691_v51  ;;  %v710_v43 = vmul.f32 0.0625, %v662_v35  ;;  %v679_v44 = vrot.slane %v678_v36, 1  ;;  %v671_v45 = vadd.f32 %v670_v37, %v669_v28  ;;  %v686_v46 = vrot.slane %v685_v38, 2 }
  0xf3   : > { %v743_v41 = vunpack.c.l.b16 %v716_v33  ;;  %v717_v42 = vpack.c.bf16 %v709_v34, %v709_v34  ;;  %v694_v47 = vadd.f32 %v693_v39, %v692_v31  ;;  %v702_v49 = vrot.slane %v701_v40, 4 }
  0xf4   : > { %v718_v52 = vpack.c.bf16 %v710_v43, %v710_v43  ;;  %v680_v53 = vadd.f32 %v679_v44, %v678_v36  ;;  %v623_v56 = vadd.f32 %v3635_v5, %v605_v54  ;;  %v711_v57 = vmul.f32 0.0625, %v671_v45 }
  0xf5   : > { %v744_v50 = vunpack.c.l.b16 %v717_v42  ;;  %v687_v58 = vadd.f32 %v686_v46, %v685_v38  ;;  %v695_v59 = vrot.slane %v694_v47, 2  ;;  %v703_v61 = vadd.f32 %v702_v49, %v701_v40  ;;  %v2910_v38 = vld [vmem:[%s4405_s11 + $0x8] sm:$0xff]  }
  0xf6   : > { %v745_v62 = vunpack.c.l.b16 %v718_v52  ;;  %v712_v63 = vmul.f32 0.0625, %v680_v53  ;;  %v624_v2 = vadd.f32 %v3640_v6, %v3702_v60  ;;  %v719_v3 = vpack.c.bf16 %v711_v57, %v711_v57 }
  0xf7   : > { %v752_v1 = vsel %vm751_vm2, %v744_v50, %v743_v41  ;;  %v688_v4 = vrot.slane %v687_v58, 1  ;;  %v696_v7 = vadd.f32 %v695_v59, %v694_v47  ;;  %v704_v9 = vrot.slane %v703_v61, 2 }
  0xf8   : > { %v720_v11 = vpack.c.bf16 %v712_v63, %v712_v63  ;;  %v754_v54 = vsel %vm753_vm3, %v745_v62, %v752_v1  ;;  %v633_v12 = vpack.c.bf16 %v624_v2, %v623_v56  ;;  %v625_v13 = vadd.f32 %v3635_v5, %v3709_v8 }
  0xf9   : > { %2703 = vmatmul.mubr.msk.bf16.gmra.mrb[8].mxu1 %vm635_vm1, %v3711_v10  ;;  %v746_v14 = vunpack.c.l.b16 %v719_v3  ;;  %v689_v15 = vadd.f32 %v688_v4, %v687_v58  ;;  %v697_v16 = vrot.slane %v696_v7, 1  ;;  %v705_v18 = vadd.f32 %v704_v9, %v703_v61 }
  0xfa   : > { %v747_v19 = vunpack.c.l.b16 %v720_v11  ;;  %2706 = vmatprep.mubr.msk.bf16.mxu1 %vm635_vm1, %v633_v12  ;;  %v626_v60 = vadd.f32 %v3640_v6, %v608_v17  ;;  %vm759_vm6 = vcmask 1045509   ;;  %vm761_vm7 = vcmask 1046534  }
  0xfb   : > { %v698_v20 = vadd.f32 %v697_v16, %v696_v7  ;;  %v706_v21 = vrot.slane %v705_v18, 1  ;;  %v713_v22 = vmul.f32 0.0625, %v689_v15  ;;  %v756_v24 = vsel %vm755_vm4, %v746_v14, %v754_v54 }
  0xfc   : > { %v634_v26 = vpack.c.bf16 %v626_v60, %v625_v13  ;;  %v758_v5 = vsel %vm757_vm5, %v747_v19, %v756_v24  ;;  %vm763_vm8 = vcmask 1047559   ;;  %vm2024_vm9 = vcmask 1041408  }
  0xfd   : > { %v707_v27 = vadd.f32 %v706_v21, %v705_v18  ;;  %v714_v28 = vmul.f32 0.0625, %v698_v20  ;;  %v721_v30 = vpack.c.bf16 %v713_v22, %v713_v22  ;;  %vm1612_vm10 = vcmask 31744  }
  0xff   : > { %v715_v8 = vmul.f32 0.0625, %v707_v27  ;;  %v722_v31 = vpack.c.bf16 %v714_v28, %v714_v28  ;;  %v748_v32 = vunpack.c.l.b16 %v721_v30  ;;  %v3820_v30 = vld [vmem:[#allocation7] ss:$0 sm:$0xff] }
 0x101   : > { %2707 = vmatmul.mubr.msk.bf16.gmra.mrb[12].mxu1 %vm635_vm1, %v634_v26  ;;  %v723_v33 = vpack.c.bf16 %v715_v8, %v715_v8  ;;  %v749_v6 = vunpack.c.l.b16 %v722_v31  ;;  %v760_v17 = vsel %vm759_vm6, %v748_v32, %v758_v5 }
 0x103   : > { %v750_v34 = vunpack.c.l.b16 %v723_v33  ;;  %v762_v35 = vsel %vm761_vm7, %v749_v6, %v760_v17 }
 0x105   : > { %v764_v36 = vsel %vm763_vm8, %v750_v34, %v762_v35 }
 0x106   : > { %v765_v37 = vpack.c.b16 %v764_v36, %v764_v36 }
 0x108   : > { %2687 = vmatmul.mubr.msk.bf16.vlgmr.msra.gmra.mrb[0].mxu0 %vm635_vm1, %v765_v37 }
 0x109   : > { %2711 = vmatpush3.bf16.msra.mxu0 %v3699_v55  ;;  %2714 = vmatprep.mubr.msk.bf16.mxu0 %vm635_vm1, %v3659_v23  ;;  %v2911_v23 = vld [vmem:[%s4406_s28] sm:$0xff]  }
 0x10a   : > { %2712 = vmatprep.subr.bf16.mxu0 %v2910_v38  ;;  %2730 = vmatprep.subr.bf16.mxu1 %v2911_v23 }
 0x10b   : > { %2731 = vmatpush3.bf16.msra.mxu1 %v2911_v23 }
 0x10d   : > { %2713 = vmatpush3.bf16.msra.mxu0 %v2910_v38 }
 0x10e   : > { %2750 = vmatprep.subr.bf16.mxu0 %v4375_v0 }
 0x110   : > { %2715 = vmatmul.mubr.msk.bf16.vlgmr.msra.gmra.mrb[4].mxu0 %vm635_vm1, %v3661_v25  ;;  %v2912_v25 = vld [vmem:[%s4406_s28 + $0x8] sm:$0xff]  }
 0x111   : > { %2718 = vmatprep.mubr.msk.bf16.mxu0 %vm635_vm1, %v3665_v29  ;;  %2751 = vmatpush3.bf16.msra.mxu0 %v2911_v23  ;;  %v3772_v29 = vld [vmem:[#allocation10] ss:$0 sm:$0xff]  ;;  %v3256_v23 = vmov 1966171168  }
 0x112   : > { %2752 = vmatprep.subr.bf16.mxu0 %v4375_v0  ;;  %2732 = vmatprep.subr.bf16.mxu1 %v2912_v25 }
 0x113   : > { %2733 = vmatpush3.bf16.msra.mxu1 %v2912_v25 }
 0x114   : > { %2776 = vmatprep.subr.bf16.mxu1 %v4375_v0 }
 0x115   : > { %2753 = vmatpush3.bf16.msra.mxu0 %v2912_v25  ;;  %v1282_v25 = vunpack.c.l.s4 %v3256_v23 }
 0x118   : > { %2719 = vmatmul.mubr.msk.bf16.gmra.mrb[8].mxu0 %vm635_vm1, %v3686_v48 }
 0x119   : > { %2722 = vmatprep.mubr.msk.bf16.mxu0 %vm635_vm1, %v3691_v51 }
 0x120   : > { %2723 = vmatmul.mubr.msk.bf16.gmra.mrb[12].mxu0 %vm635_vm1, %v3711_v10 }
 0x121   : > { %2726 = vmatprep.mubr.msk.bf16.mxu0 %vm635_vm1, %v633_v12 }
 0x128   : > { %2727 = vmatmul.mubr.msk.bf16.gmra.mrb[16].mxu0 %vm635_vm1, %v634_v26 }
 0x129   : > { %2754 = vmatprep.mubr.msk.bf16.mxu0 %vm3255_vm0, %v4375_v0 }
 0x1bc   : > { %v2696_v48 = vpop.f32.mrb[0].mxu1 }
 0x1bd   : > { %v3775_v51 = vadd.f32 %v2696_v48, %v3772_v29  ;;  %v902_v55 = vpop.f32.mrb[1].mxu1 }
 0x1be   : > { %v3778_v10 = vadd.f32 %v3772_v29, %v902_v55  ;;  %v2697_v39 = vpop.f32.mrb[2].mxu1 }
 0x1bf   : > { %v1094_v40 = vsel %vm635_vm1, %v3775_v51, 0.0  ;;  %v3783_v41 = vadd.f32 %v2697_v39, %v3772_v29  ;;  %v905_v42 = vpop.f32.mrb[3].mxu1 }
 0x1c0   : > { %v1085_v43 = vsel %vm635_vm1, %v3778_v10, 0.0  ;;  %v3788_v44 = vadd.f32 %v3772_v29, %v905_v42 }
 0x1c1   : > { %v1095_v45 = vsel %vm635_vm1, %v3783_v41, 0.0 }
 0x1c2   : > { %v1096_v46 = vadd.f32 %v1095_v45, %v1094_v40  ;;  %v1086_v47 = vsel %vm635_vm1, %v3788_v44, 0.0 }
 0x1c3   : > { %v1087_v49 = vadd.f32 %v1086_v47, %v1085_v43 }
 0x1c4   : > { %v1097_v50 = vrot.slane %v1096_v46, 4  ;;  %v2700_v52 = vpop.f32.mrb[4].mxu1 }
 0x1c5   : > { %v1088_v53 = vrot.slane %v1087_v49, 4  ;;  %v3795_v56 = vadd.f32 %v2700_v52, %v3772_v29  ;;  %v918_v57 = vpop.f32.mrb[5].mxu1 }
 0x1c6   : > { %v1098_v58 = vadd.f32 %v1097_v50, %v1096_v46  ;;  %v3798_v59 = vadd.f32 %v3772_v29, %v918_v57  ;;  %v2701_v61 = vpop.f32.mrb[6].mxu1  ;;  %v1284_v50 = vlaneseq }
 0x1c7   : > { %v1089_v62 = vadd.f32 %v1088_v53, %v1087_v49  ;;  %v1112_v63 = vsel %vm635_vm1, %v3795_v56, 0.0  ;;  %v3803_v1 = vadd.f32 %v2701_v61, %v3772_v29  ;;  %v921_v2 = vpop.f32.mrb[7].mxu1 }
 0x1c8   : > { %v1099_v3 = vrot.slane %v1098_v58, 2  ;;  %v1103_v4 = vsel %vm635_vm1, %v3798_v59, 0.0  ;;  %v3808_v7 = vadd.f32 %v3772_v29, %v921_v2 }
 0x1c9   : > { %v1090_v9 = vrot.slane %v1089_v62, 2  ;;  %v1113_v11 = vsel %vm635_vm1, %v3803_v1, 0.0 }
 0x1ca   : > { %v1100_v54 = vadd.f32 %v1099_v3, %v1098_v58  ;;  %v1114_v12 = vadd.f32 %v1113_v11, %v1112_v63  ;;  %v1104_v13 = vsel %vm635_vm1, %v3808_v7, 0.0  ;;  %v1283_v58 = vunpack.c.0.s8 %v1282_v25 }
 0x1cb   : > { %v1091_v14 = vadd.f32 %v1090_v9, %v1089_v62  ;;  %v1105_v15 = vadd.f32 %v1104_v13, %v1103_v4 }
 0x1cc   : > { %v1101_v16 = vrot.slane %v1100_v54, 1  ;;  %v1115_v18 = vrot.slane %v1114_v12, 4  ;;  %v2704_v19 = vpop.f32.mrb[8].mxu1 }
 0x1cd   : > { %v1092_v60 = vrot.slane %v1091_v14, 1  ;;  %v1106_v20 = vrot.slane %v1105_v15, 4  ;;  %v3815_v21 = vadd.f32 %v2704_v19, %v3772_v29  ;;  %v934_v22 = vpop.f32.mrb[9].mxu1 }
 0x1ce   : > { %v1102_v24 = vadd.f32 %v1101_v16, %v1100_v54  ;;  %v1116_v26 = vadd.f32 %v1115_v18, %v1114_v12  ;;  %v3818_v27 = vadd.f32 %v3772_v29, %v934_v22  ;;  %v2705_v28 = vpop.f32.mrb[10].mxu1  ;;  %v1285_v22 = vshrl.u32 %v1284_v50, 7 }
 0x1cf   : > { %v1093_v5 = vadd.f32 %v1092_v60, %v1091_v14  ;;  %v1107_v8 = vadd.f32 %v1106_v20, %v1105_v15  ;;  %v1130_v31 = vsel %vm635_vm1, %v3815_v21, 0.0  ;;  %v3825_v32 = vadd.f32 %v2705_v28, %v3772_v29  ;;  %v937_v33 = vpop.f32.mrb[11].mxu1 }
 0x1d0   : > { %v1158_v6 = vmul.f32 0.0625, %v1102_v24  ;;  %v1117_v17 = vrot.slane %v1116_v26, 2  ;;  %v1121_v34 = vsel %vm635_vm1, %v3818_v27, 0.0  ;;  %v3830_v35 = vadd.f32 %v3772_v29, %v937_v33 }
 0x1d1   : > { %v1157_v36 = vmul.f32 0.0625, %v1093_v5  ;;  %v1108_v37 = vrot.slane %v1107_v8, 2  ;;  %v1131_v38 = vsel %vm635_vm1, %v3825_v32, 0.0  ;;  %v1286_v23 = vsub.s32 %v1283_v58, %v1285_v22 }
 0x1d2   : > { %v1173_v48 = vadd.f32 %v3820_v30, %v1158_v6  ;;  %v1118_v55 = vadd.f32 %v1117_v17, %v1116_v26  ;;  %v1132_v39 = vadd.f32 %v1131_v38, %v1130_v31  ;;  %v1122_v40 = vsel %vm635_vm1, %v3830_v35, 0.0 }
 0x1d3   : > { %v1172_v42 = vadd.f32 %v3820_v30, %v1157_v36  ;;  %v1109_v43 = vadd.f32 %v1108_v37, %v1107_v8  ;;  %v1123_v45 = vadd.f32 %v1122_v40, %v1121_v34  ;;  %v2574_v34 = vld [vmem:[#allocation5] ss:$0 sm:$0xff] }
 0x1d4   : > { %v1534_v46 = vrot.slane %v1173_v48, 7  ;;  %v1119_v47 = vrot.slane %v1118_v55, 1  ;;  %v1133_v49 = vrot.slane %v1132_v39, 4  ;;  %v2708_v52 = vpop.f32.mrb[12].mxu1 }
 0x1d5   : > { %v1110_v53 = vrot.slane %v1109_v43, 1  ;;  %v1124_v57 = vrot.slane %v1123_v45, 4  ;;  %v3839_v61 = vadd.f32 %v2708_v52, %v3772_v29  ;;  %v950_v62 = vpop.f32.mrb[13].mxu1 }
 0x1d6   : > { %v1535_v63 = vsel %vm751_vm2, %v1534_v46, %v1172_v42  ;;  %v1120_v2 = vadd.f32 %v1119_v47, %v1118_v55  ;;  %v1134_v3 = vadd.f32 %v1133_v49, %v1132_v39  ;;  %v3843_v4 = vadd.f32 %v3772_v29, %v950_v62  ;;  %v2709_v9 = vpop.f32.mrb[14].mxu1 }
 0x1d7   : > { %v1111_v11 = vadd.f32 %v1110_v53, %v1109_v43  ;;  %v1125_v54 = vadd.f32 %v1124_v57, %v1123_v45  ;;  %v1148_v12 = vsel %vm635_vm1, %v3839_v61, 0.0  ;;  %v3848_v13 = vadd.f32 %v2709_v9, %v3772_v29  ;;  %v953_v14 = vpop.f32.mrb[15].mxu1 }
 0x1d8   : > { %v1160_v15 = vmul.f32 0.0625, %v1120_v2  ;;  %v1135_v16 = vrot.slane %v1134_v3, 2  ;;  %v1139_v18 = vsel %vm635_vm1, %v3843_v4, 0.0  ;;  %v3853_v19 = vadd.f32 %v3772_v29, %v953_v14 }
 0x1d9   : > { %v1159_v60 = vmul.f32 0.0625, %v1111_v11  ;;  %v1126_v20 = vrot.slane %v1125_v54, 2  ;;  %v1149_v24 = vsel %vm635_vm1, %v3848_v13, 0.0 }
 0x1da   : > { %v1175_v26 = vadd.f32 %v3820_v30, %v1160_v15  ;;  %v1136_v28 = vadd.f32 %v1135_v16, %v1134_v3  ;;  %v1150_v5 = vadd.f32 %v1149_v24, %v1148_v12  ;;  %v1140_v8 = vsel %vm635_vm1, %v3853_v19, 0.0 }
 0x1db   : > { %v1174_v31 = vadd.f32 %v3820_v30, %v1159_v60  ;;  %v1127_v33 = vadd.f32 %v1126_v20, %v1125_v54  ;;  %v1141_v6 = vadd.f32 %v1140_v8, %v1139_v18  ;;  %v815_v55 = vpop.f32.mrb[0].mxu0  ;;  %v3869_v3 = vsub.s32 0, %v1285_v22 }
 0x1dc   : > { %v1538_v17 = vrot.slane %v1175_v26, 5  ;;  %v1137_v29 = vrot.slane %v1136_v28, 1  ;;  %v1151_v36 = vrot.slane %v1150_v5, 4  ;;  %v3862_v43 = vadd.f32 %v2574_v34, %v815_v55  ;;  %v2688_v45 = vpop.f32.mrb[1].mxu0 }
 0x1dd   : > { %v1536_v37 = vrot.slane %v1174_v31, 6  ;;  %v1128_v38 = vrot.slane %v1127_v33, 1  ;;  %v1142_v25 = vrot.slane %v1141_v6, 4  ;;  %v818_v50 = vpop.f32.mrb[2].mxu0 }
 0x1de   : > { %v1138_v48 = vadd.f32 %v1137_v29, %v1136_v28  ;;  %v1152_v39 = vadd.f32 %v1151_v36, %v1150_v5  ;;  %v1280_v57 = vcombine.high %v3862_v43, %v3862_v43  ;;  %v1287_v58 = vrot.slane %v3862_v43, %v1286_v23  ;;  %v2689_v62 = vpop.f32.mrb[3].mxu0 }
 0x1df   : > { %v1537_v40 = vsel %vm753_vm3, %v1536_v37, %v1535_v63  ;;  %v1129_v42 = vadd.f32 %v1128_v38, %v1127_v33  ;;  %v1143_v46 = vadd.f32 %v1142_v25, %v1141_v6 }
 0x1e0   : > { %v1162_v47 = vmul.f32 0.0625, %v1138_v48  ;;  %v1539_v49 = vsel %vm755_vm4, %v1538_v17, %v1537_v40  ;;  %v1153_v52 = vrot.slane %v1152_v39, 2  ;;  %v1294_v54 = vrot.slane %v1280_v57, %v1286_v23 }
 0x1e1   : > { %v1161_v53 = vmul.f32 0.0625, %v1129_v42  ;;  %v1144_v2 = vrot.slane %v1143_v46, 2  ;;  %v1295_v12 = vcombine.high %v1287_v58, %v1287_v58  ;;  %v1303_v14 = vrot.slane %v1287_v58, %v1286_v23 }
 0x1e2   : > { %v1177_v63 = vadd.f32 %v3820_v30, %v1162_v47  ;;  %v1154_v9 = vadd.f32 %v1153_v52, %v1152_v39  ;;  %v1296_v20 = vcombine.high %v1294_v54, %v1294_v54  ;;  %v1310_v5 = vrot.slane %v1294_v54, %v1286_v23 }
 0x1e3   : > { %v1176_v11 = vadd.f32 %v3820_v30, %v1161_v53  ;;  %v1145_v18 = vadd.f32 %v1144_v2, %v1143_v46  ;;  %v1317_v24 = vrot.slane %v1295_v12, %v1286_v23  ;;  %v1325_v26 = vcombine.high %v1303_v14, %v1303_v14 }
 0x1e4   : > { %v1542_v15 = vrot.slane %v1177_v63, 3  ;;  %v1155_v16 = vrot.slane %v1154_v9, 1  ;;  %v1332_v28 = vrot.slane %v1303_v14, %v3869_v3  ;;  %v1324_v29 = vrot.slane %v1296_v20, %v1286_v23 }
 0x1e5   : > { %v1540_v60 = vrot.slane %v1176_v11, 4  ;;  %v1146_v31 = vrot.slane %v1145_v18, 1  ;;  %v1327_v33 = vcombine.high %v1317_v24, %v1317_v24  ;;  %v1336_v6 = vrot.slane %v1317_v24, %v3869_v3 }
 0x1e6   : > { %v1156_v8 = vadd.f32 %v1155_v16, %v1154_v9  ;;  %v1340_v17 = vrot.slane %v1325_v26, %v3869_v3  ;;  %v1326_v34 = vcombine.high %v1310_v5, %v1310_v5  ;;  %v1348_v36 = vrot.slane %v1310_v5, %v3869_v3 }
 0x1e7   : > { %v1541_v22 = vsel %vm757_vm5, %v1540_v60, %v1539_v49  ;;  %v1371_v38 = vmul.f32 %v1336_v6, %v3775_v51  ;;  %v1372_v25 = vmul.f32 %v1336_v6, %v3783_v41  ;;  %v1147_v48 = vadd.f32 %v1146_v31, %v1145_v18 }
 0x1e8   : > { %v1164_v37 = vmul.f32 0.0625, %v1156_v8  ;;  %v1543_v55 = vsel %vm759_vm6, %v1542_v15, %v1541_v22  ;;  %v1328_v39 = vcombine.high %v1324_v29, %v1324_v29  ;;  %v1352_v40 = vrot.slane %v1324_v29, %v3869_v3 }
 0x1e9   : > { %v1356_v42 = vrot.slane %v1326_v34, %v3869_v3  ;;  %v1386_v46 = vpack.c.bf16 %v1372_v25, %v1371_v38  ;;  %v1163_v23 = vmul.f32 0.0625, %v1147_v48  ;;  %v1369_v47 = vmul.f32 %v1332_v28, %v3778_v10 }
 0x1ea   : > { %v1179_v45 = vadd.f32 %v3820_v30, %v1164_v37  ;;  %v1370_v49 = vmul.f32 %v1332_v28, %v3788_v44  ;;  %v1360_v51 = vrot.slane %v1328_v39, %v3869_v3  ;;  %v1373_v58 = vmul.f32 %v1340_v17, %v3798_v59 }
 0x1eb   : > { %v1381_v41 = vmul.f32 %v1356_v42, %v3843_v4  ;;  %v1382_v52 = vmul.f32 %v1356_v42, %v3853_v19  ;;  %v1178_v53 = vadd.f32 %v3820_v30, %v1163_v23  ;;  %v1374_v62 = vmul.f32 %v1340_v17, %v3808_v7 }
 0x1ec   : > { %v1546_v50 = vrot.slane %v1179_v45, 1  ;;  %v1385_v57 = vpack.c.bf16 %v1370_v49, %v1369_v47  ;;  %v1383_v2 = vmul.f32 %v1360_v51, %v3839_v61  ;;  %v1384_v10 = vmul.f32 %v1360_v51, %v3848_v13 }
 0x1ed   : > { %v1391_v63 = vpack.c.bf16 %v1382_v52, %v1381_v41  ;;  %v1344_v44 = vrot.slane %v1327_v33, %v3869_v3  ;;  %v1544_v9 = vrot.slane %v1178_v53, 2  ;;  %v1387_v4 = vpack.c.bf16 %v1374_v62, %v1373_v58 }
 0x1ee   : > { %2734 = vmatprep.mubr.msk.bf16.mxu1 %vm635_vm1, %v1385_v57  ;;  %v1377_v19 = vmul.f32 %v1348_v36, %v3818_v27  ;;  %v1378_v30 = vmul.f32 %v1348_v36, %v3830_v35  ;;  %v1392_v11 = vpack.c.bf16 %v1384_v10, %v1383_v2  ;;  %v1379_v61 = vmul.f32 %v1352_v40, %v3815_v21 }
 0x1ef   : > { %2735 = vmatmul.mubr.msk.bf16.vlgmr.msra.gmra.mrb[16].mxu1 %vm635_vm1, %v1386_v46  ;;  %v1375_v59 = vmul.f32 %v1344_v44, %v3795_v56  ;;  %v1376_v7 = vmul.f32 %v1344_v44, %v3803_v1  ;;  %v1545_v13 = vsel %vm761_vm7, %v1544_v9, %v1543_v55  ;;  %v1380_v12 = vmul.f32 %v1352_v40, %v3825_v32  ;;  %v2589_v56 = vld [vmem:[#allocation11] ss:$0 sm:$0xff]  ;;  %v2716_v1 = vpop.f32.mrb[4].mxu0 }
 0x1f0   : > { %2738 = vmatprep.mubr.msk.bf16.mxu1 %vm635_vm1, %v1387_v4  ;;  %v1389_v54 = vpack.c.bf16 %v1378_v30, %v1377_v19  ;;  %v1547_v27 = vsel %vm763_vm8, %v1546_v50, %v1545_v13  ;;  %v3914_v21 = vadd.f32 %v2716_v1, %v2589_v56  ;;  %v1022_v32 = vpop.f32.mrb[5].mxu0 }
 0x1f1   : > { %v1388_v14 = vpack.c.bf16 %v1376_v7, %v1375_v59  ;;  %v1390_v35 = vpack.c.bf16 %v1380_v12, %v1379_v61  ;;  %v1549_v15 = vmul.f32 %v1547_v27, %v3862_v43  ;;  %v3916_v43 = vadd.f32 %v2589_v56, %v1022_v32  ;;  %v2717_v18 = vpop.f32.mrb[6].mxu0 }
 0x1f2   : > { %v1189_v60 = vsel %vm635_vm1, %v3914_v21, 0.0  ;;  %v3920_v20 = vadd.f32 %v2717_v18, %v2589_v56  ;;  %v1025_v24 = vpop.f32.mrb[7].mxu0 }
 0x1f3   : > { %v1550_v16 = vpack.c.bf16 %v1549_v15, %v1549_v15  ;;  %v1180_v26 = vsel %vm635_vm1, %v3916_v43, 0.0  ;;  %v3924_v28 = vadd.f32 %v2589_v56, %v1025_v24  ;;  %v2720_v33 = vpop.f32.mrb[8].mxu0 }
 0x1f4   : > { %v1190_v5 = vsel %vm635_vm1, %v3920_v20, 0.0  ;;  %v3930_v6 = vadd.f32 %v2720_v33, %v2589_v56  ;;  %v1038_v17 = vpop.f32.mrb[9].mxu0 }
 0x1f5   : > { %2755 = vmatmul.mubr.msk.bf16.vlgmr.msra.gmra.mrb[20].mxu0 %vm635_vm1, %v1550_v16  ;;  %v1191_v8 = vadd.f32 %v1190_v5, %v1189_v60  ;;  %v1181_v31 = vsel %vm635_vm1, %v3924_v28, 0.0  ;;  %v3932_v29 = vadd.f32 %v2589_v56, %v1038_v17  ;;  %v2721_v34 = vpop.f32.mrb[10].mxu0 }
 0x1f6   : > { %v1182_v22 = vadd.f32 %v1181_v31, %v1180_v26  ;;  %v1207_v36 = vsel %vm635_vm1, %v3930_v6, 0.0  ;;  %v3936_v37 = vadd.f32 %v2721_v34, %v2589_v56  ;;  %v1041_v38 = vpop.f32.mrb[11].mxu0 }
 0x1f7   : > { %2739 = vmatmul.mubr.msk.bf16.gmra.mrb[20].mxu1 %vm635_vm1, %v1388_v14  ;;  %v1198_v25 = vsel %vm635_vm1, %v3932_v29, 0.0  ;;  %v3940_v48 = vadd.f32 %v2589_v56, %v1041_v38  ;;  %v2724_v45 = vpop.f32.mrb[12].mxu0  ;;  %v1192_v14 = vrot.slane %v1191_v8, 4 }
 0x1f8   : > { %2742 = vmatprep.mubr.msk.bf16.mxu1 %vm635_vm1, %v1389_v54  ;;  %v1208_v55 = vsel %vm635_vm1, %v3936_v37, 0.0  ;;  %v3946_v46 = vadd.f32 %v2724_v45, %v2589_v56  ;;  %v1054_v23 = vpop.f32.mrb[13].mxu0  ;;  %v1183_v1 = vrot.slane %v1182_v22, 4 }
 0x1f9   : > { %v1209_v39 = vadd.f32 %v1208_v55, %v1207_v36  ;;  %v1199_v40 = vsel %vm635_vm1, %v3940_v48, 0.0  ;;  %v3948_v47 = vadd.f32 %v2589_v56, %v1054_v23  ;;  %v2725_v49 = vpop.f32.mrb[14].mxu0  ;;  %v1193_v16 = vadd.f32 %v1192_v14, %v1191_v8 }
 0x1fa   : > { %v1200_v42 = vadd.f32 %v1199_v40, %v1198_v25  ;;  %v1225_v51 = vsel %vm635_vm1, %v3946_v46, 0.0  ;;  %v3952_v41 = vadd.f32 %v2725_v49, %v2589_v56  ;;  %v1057_v50 = vpop.f32.mrb[15].mxu0 }
 0x1fb   : > { %v1216_v52 = vsel %vm635_vm1, %v3948_v47, 0.0  ;;  %v3956_v53 = vadd.f32 %v2589_v56, %v1057_v50  ;;  %v2728_v10 = vpop.f32.mrb[16].mxu0  ;;  %v1194_v24 = vrot.slane %v1193_v16, 2 }
 0x1fc   : > { %v1226_v57 = vsel %vm635_vm1, %v3952_v41, 0.0  ;;  %v1070_v44 = vpop.f32.mrb[17].mxu0  ;;  %v1201_v27 = vrot.slane %v1200_v42, 4 }
 0x1fd   : > { %v1227_v58 = vadd.f32 %v1226_v57, %v1225_v51  ;;  %v1217_v62 = vsel %vm635_vm1, %v3956_v53, 0.0  ;;  %v3964_v9 = vadd.f32 %v2589_v56, %v1070_v44  ;;  %v2729_v4 = vpop.f32.mrb[18].mxu0  ;;  %v1195_v34 = vadd.f32 %v1194_v24, %v1193_v16 }
 0x1fe   : > { %v1218_v2 = vadd.f32 %v1217_v62, %v1216_v52  ;;  %v3968_v30 = vadd.f32 %v2729_v4, %v2589_v56  ;;  %v1202_v32 = vadd.f32 %v1201_v27, %v1200_v42 }
 0x1ff   : > { %2743 = vmatmul.mubr.msk.bf16.gmra.mrb[24].mxu1 %vm635_vm1, %v1390_v35  ;;  %v1234_v59 = vsel %vm635_vm1, %v3964_v9, 0.0  ;;  %v1210_v35 = vrot.slane %v1209_v39, 4  ;;  %v1228_v26 = vrot.slane %v1227_v58, 4  ;;  %v1196_v8 = vrot.slane %v1195_v34, 1 }
 0x200   : > { %2746 = vmatprep.mubr.msk.bf16.mxu1 %vm635_vm1, %v1391_v63  ;;  %v3962_v63 = vadd.f32 %v2728_v10, %v2589_v56  ;;  %v1244_v61 = vsel %vm635_vm1, %v3968_v30, 0.0  ;;  %v1219_v15 = vrot.slane %v1218_v2, 4  ;;  %v1203_v5 = vrot.slane %v1202_v32, 2 }
 0x201   : > { %v1211_v18 = vadd.f32 %v1210_v35, %v1209_v39  ;;  %v1229_v38 = vadd.f32 %v1228_v26, %v1227_v58  ;;  %v1197_v57 = vadd.f32 %v1196_v8, %v1195_v34 }
 0x202   : > { %v1243_v19 = vsel %vm635_vm1, %v3962_v63, 0.0  ;;  %v1220_v60 = vadd.f32 %v1219_v15, %v1218_v2  ;;  %v1204_v25 = vadd.f32 %v1203_v5, %v1202_v32 }
 0x203   : > { %v1245_v13 = vadd.f32 %v1244_v61, %v1243_v19  ;;  %v1212_v33 = vrot.slane %v1211_v18, 2  ;;  %v1230_v42 = vrot.slane %v1229_v38, 2 }
 0x204   : > { %v1221_v17 = vrot.slane %v1220_v60, 2  ;;  %v1205_v39 = vrot.slane %v1204_v25, 1 }
 0x205   : > { %v1213_v40 = vadd.f32 %v1212_v33, %v1211_v18  ;;  %v1246_v45 = vrot.slane %v1245_v13, 4  ;;  %v1231_v2 = vadd.f32 %v1230_v42, %v1229_v38 }
 0x206   : > { %v1222_v23 = vadd.f32 %v1221_v17, %v1220_v60  ;;  %v1206_v10 = vadd.f32 %v1205_v39, %v1204_v25 }
 0x207   : > { %2747 = vmatmul.mubr.msk.bf16.gmra.mrb[28].mxu1 %vm635_vm1, %v1392_v11  ;;  %v1073_v11 = vpop.f32.mrb[19].mxu0  ;;  %v1214_v50 = vrot.slane %v1213_v40, 1  ;;  %v1232_v61 = vrot.slane %v1231_v2, 1 }
 0x208   : > { %2778 = vmatprep.mubr.msk.bf16.mxu1 %vm3255_vm0, %v4375_v0  ;;  %v3972_v7 = vadd.f32 %v2589_v56, %v1073_v11  ;;  %v1184_v56 = vadd.f32 %v1183_v1, %v1182_v22  ;;  %v1247_v22 = vadd.f32 %v1246_v45, %v1245_v13  ;;  %v1223_v52 = vrot.slane %v1222_v23, 1 }
 0x209   : > { %v1215_v4 = vadd.f32 %v1214_v50, %v1213_v40  ;;  %v1253_v11 = vmul.f32 0.0625, %v1197_v57  ;;  %v1233_v1 = vadd.f32 %v1232_v61, %v1231_v2 }
 0x20a   : > { %v1235_v54 = vsel %vm635_vm1, %v3972_v7, 0.0  ;;  %v1185_v36 = vrot.slane %v1184_v56, 2  ;;  %v1248_v58 = vrot.slane %v1247_v22, 2  ;;  %v1224_v19 = vadd.f32 %v1223_v52, %v1222_v23 }
 0x20b   : > { %v1236_v12 = vadd.f32 %v1235_v54, %v1234_v59  ;;  %v2601_v54 = vld [vmem:[#allocation8] ss:$0 sm:$0xff]  ;;  %v1255_v27 = vmul.f32 0.0625, %v1215_v4  ;;  %v3999_v4 = vld [vmem:[%s4408_s14 + $0x8] sm:$0xff] }
 0x20c   : > { %v1186_v49 = vadd.f32 %v1185_v36, %v1184_v56  ;;  %v1249_v35 = vadd.f32 %v1248_v58, %v1247_v22  ;;  %v1256_v15 = vmul.f32 0.0625, %v1224_v19  ;;  %v1268_v16 = vadd.f32 %v2601_v54, %v1253_v11 }
 0x20d   : > { %v1237_v31 = vrot.slane %v1236_v12, 4  ;;  %v1270_v60 = vadd.f32 %v2601_v54, %v1255_v27 }
 0x20e   : > { %v1187_v62 = vrot.slane %v1186_v49, 1  ;;  %v1250_v24 = vrot.slane %v1249_v35, 1  ;;  %v1271_v56 = vadd.f32 %v2601_v54, %v1256_v15  ;;  %v2265_v26 = vrot.slane %v1268_v16, 7 }
 0x20f   : > { %v1238_v55 = vadd.f32 %v1237_v31, %v1236_v12  ;;  %v1254_v12 = vmul.f32 0.0625, %v1206_v10  ;;  %v1257_v31 = vmul.f32 0.0625, %v1233_v1  ;;  %v2269_v34 = vrot.slane %v1270_v60, 5  ;;  %v3994_v10 = vld [vmem:[%s4408_s14] sm:$0xff] }
 0x210   : > { %v1188_v59 = vadd.f32 %v1187_v62, %v1186_v49  ;;  %v1251_v36 = vadd.f32 %v1250_v24, %v1249_v35  ;;  %v2271_v38 = vrot.slane %v1271_v56, 4  ;;  %v1991_v62 = vld [vmem:[%s4407_s25] sm:$0x3]  ;;  %s2627_s25 = sshll.u32 %s3359_s24, 7  ;;  %s3163_s24 = scalar_lea.vmem %s4310_s17, 128 }
 0x211   : > { %v1239_v51 = vrot.slane %v1238_v55, 2  ;;  %v1269_v32 = vadd.f32 %v2601_v54, %v1254_v12  ;;  %2790 = vmatprep.subr.msk.bf16.mxu0 %vm2024_vm9, %v1991_v62  ;;  %v2026_v2 = vsel %vm2024_vm9, %v1991_v62, 0  ;;  %s4308_s1 = scalar_lea.hbm %s4412_s0, %s2627_s25  ;;  %p3164_p6 = scmp.ne.s32.totalorder %s4310_s17, %s3163_s24 }
 0x212   : > { %v1252_v13 = vmul.f32 0.0625, %v1188_v59  ;;  %v1259_v25 = vmul.f32 0.0625, %v1251_v36  ;;  %2759 = vmatpush3.bf16.msra.mxu0 %v2026_v2  ;;  %2777 = vmatpush3.bf16.msra.mxu1 %v2026_v2 }
 0x213   : > { %v1240_v44 = vadd.f32 %v1239_v51, %v1238_v55  ;;  %v2267_v33 = vrot.slane %v1269_v32, 6  ;;  %v1272_v55 = vadd.f32 %v2601_v54, %v1257_v31  ;;  %2782 = vmatprep.subr.bf16.mxu1 %v4375_v0  ;;  %p3165_p4 = pnand %p3164_p6, %p4413_p9 }
 0x214   : > { %v1267_v5 = vadd.f32 %v2601_v54, %v1252_v13  ;;  %v1274_v8 = vadd.f32 %v2601_v54, %v1259_v25 }
 0x215   : > { %v1241_v14 = vrot.slane %v1240_v44, 1  ;;  %v2273_v42 = vrot.slane %v1272_v55, 3  ;;  %p3166_p13 = pneg %p3165_p4 }
 0x216   : > { %v2266_v40 = vsel %vm751_vm2, %v2265_v26, %v1267_v5  ;;  %v2277_v22 = vrot.slane %v1274_v8, 1 }
 0x217   : > { %v1242_v18 = vadd.f32 %v1241_v14, %v1240_v44  ;;  %v2268_v23 = vsel %vm753_vm3, %v2267_v33, %v2266_v40 }
 0x218   : > { %v2270_v49 = vsel %vm755_vm4, %v2269_v34, %v2268_v23 }
 0x219   : > { %v1258_v17 = vmul.f32 0.0625, %v1242_v18  ;;  %v2272_v39 = vsel %vm757_vm5, %v2271_v38, %v2270_v49 }
 0x21a   : > { %v2274_v50 = vsel %vm759_vm6, %v2273_v42, %v2272_v39 }
 0x21b   : > { %v1273_v45 = vadd.f32 %v2601_v54, %v1258_v17 }
 0x21d   : > { %v2275_v51 = vrot.slane %v1273_v45, 2 }
 0x21f   : > { %v2276_v52 = vsel %vm761_vm7, %v2275_v51, %v2274_v50 }
 0x220   : > { %v3985_v57 = vsel %vm763_vm8, %v2277_v22, %v2276_v52 }
 0x2c2   : > { %v2736_v44 = vpop.f32.mrb[16].mxu1 }
 0x2c3   : > { %v4002_v58 = vadd.f32 %v2736_v44, %v3994_v10  ;;  %v1463_v19 = vpop.f32.mrb[17].mxu1 }
 0x2c4   : > { %v4005_v11 = vadd.f32 %v3994_v10, %v1463_v19  ;;  %v2737_v59 = vpop.f32.mrb[18].mxu1 }
 0x2c5   : > { %v4008_v61 = vadd.f32 %v2737_v59, %v3999_v4  ;;  %v1466_v54 = vpop.f32.mrb[19].mxu1  ;;  %v1622_v14 = vsel %vm1612_vm10, %v4002_v58, -inf }
 0x2c6   : > { %v4011_v12 = vadd.f32 %v3999_v4, %v1466_v54  ;;  %v1613_v35 = vsel %vm1612_vm10, %v4005_v11, -inf }
 0x2c7   : > { %v1623_v27 = vsel %vm1612_vm10, %v4008_v61, -inf }
 0x2c8   : > { %v1624_v15 = vmax.f32 %v1622_v14, %v1623_v27  ;;  %v1614_v16 = vsel %vm1612_vm10, %v4011_v12, -inf  ;;  %v4021_v1 = vpop.f32.mrb[20].mxu0 }
 0x2c9   : > { %v1615_v13 = vmax.f32 %v1613_v35, %v1614_v16  ;;  %v2756_v60 = vpop.f32.mrb[21].mxu0  ;;  %v1686_v44 = vrot.slane %v4021_v1, 1  ;;  %v1687_v19 = vrot.slane %v4021_v1, 2  ;;  %v1688_v35 = vrot.slane %v4021_v1, 3 }
 0x2ca   : > { %v1625_v32 = vrot.slane %v1624_v15, 4  ;;  %v2740_v18 = vpop.f32.mrb[20].mxu1  ;;  %v1591_v5 = vpop.f32.mrb[22].mxu0 }
 0x2cb   : > { %v1616_v24 = vrot.slane %v1615_v13, 4  ;;  %v4024_v56 = vadd.f32 %v2740_v18, %v3994_v10  ;;  %v1479_v26 = vpop.f32.mrb[21].mxu1  ;;  %v2757_v34 = vpop.f32.mrb[23].mxu0  ;;  %v1689_v18 = vrot.slane %v4021_v1, 4 }
 0x2cc   : > { %v1626_v31 = vmax.f32 %v1624_v15, %v1625_v32  ;;  %v4027_v33 = vadd.f32 %v3994_v10, %v1479_v26  ;;  %v2741_v17 = vpop.f32.mrb[22].mxu1 }
 0x2cd   : > { %v1617_v36 = vmax.f32 %v1615_v13, %v1616_v24  ;;  %v4030_v38 = vadd.f32 %v2741_v17, %v3999_v4  ;;  %v1482_v25 = vpop.f32.mrb[23].mxu1  ;;  %v1640_v23 = vsel %vm1612_vm10, %v4024_v56, -inf }
 0x2ce   : > { %v1627_v55 = vrot.slane %v1626_v31, 2  ;;  %v4033_v40 = vadd.f32 %v3999_v4, %v1482_v25  ;;  %v1631_v42 = vsel %vm1612_vm10, %v4027_v33, -inf }
 0x2cf   : > { %v1618_v45 = vrot.slane %v1617_v36, 2  ;;  %v1641_v8 = vsel %vm1612_vm10, %v4030_v38, -inf }
 0x2d0   : > { %v1628_v49 = vmax.f32 %v1626_v31, %v1627_v55  ;;  %v1642_v39 = vmax.f32 %v1640_v23, %v1641_v8  ;;  %v1632_v51 = vsel %vm1612_vm10, %v4033_v40, -inf }
 0x2d1   : > { %v1619_v50 = vmax.f32 %v1617_v36, %v1618_v45  ;;  %v1633_v22 = vmax.f32 %v1631_v42, %v1632_v51 }
 0x2d2   : > { %v1629_v52 = vrot.slane %v1628_v49, 1  ;;  %v1643_v62 = vrot.slane %v1642_v39, 4  ;;  %v2744_v2 = vpop.f32.mrb[24].mxu1 }
 0x2d3   : > { %v1620_v59 = vrot.slane %v1619_v50, 1  ;;  %v1634_v54 = vrot.slane %v1633_v22, 4  ;;  %v4046_v14 = vadd.f32 %v2744_v2, %v3994_v10  ;;  %v1495_v27 = vpop.f32.mrb[25].mxu1 }
 0x2d4   : > { %v1630_v15 = vmax.f32 %v1628_v49, %v1629_v52  ;;  %v1644_v16 = vmax.f32 %v1642_v39, %v1643_v62  ;;  %v4050_v13 = vadd.f32 %v3994_v10, %v1495_v27  ;;  %v2745_v32 = vpop.f32.mrb[26].mxu1  ;;  %v1690_v52 = vrot.slane %v4021_v1, 5 }
 0x2d5   : > { %v1621_v60 = vmax.f32 %v1619_v50, %v1620_v59  ;;  %v1635_v24 = vmax.f32 %v1633_v22, %v1634_v54  ;;  %v4054_v26 = vadd.f32 %v2745_v32, %v3999_v4  ;;  %v1498_v5 = vpop.f32.mrb[27].mxu1  ;;  %v1658_v34 = vsel %vm1612_vm10, %v4046_v14, -inf }
 0x2d6   : > { %v1645_v17 = vrot.slane %v1644_v16, 2  ;;  %v4060_v36 = vadd.f32 %v3999_v4, %v1498_v5  ;;  %v1702_v25 = vmax.f32 %v1630_v15, %v1686_v44  ;;  %v1649_v45 = vsel %vm1612_vm10, %v4050_v13, -inf }
 0x2d7   : > { %v1636_v55 = vrot.slane %v1635_v24, 2  ;;  %v1659_v23 = vsel %vm1612_vm10, %v4054_v26, -inf  ;;  %v1701_v8 = vmax.f32 %v1621_v60, %v4021_v1 }
 0x2d8   : > { %v1646_v49 = vmax.f32 %v1644_v16, %v1645_v17  ;;  %v1660_v42 = vmax.f32 %v1658_v34, %v1659_v23  ;;  %v1650_v39 = vsel %vm1612_vm10, %v4060_v36, -inf  ;;  %v1797_v51 = vrot.slane %v1702_v25, 7 }
 0x2d9   : > { %v1637_v50 = vmax.f32 %v1635_v24, %v1636_v55  ;;  %v1651_v22 = vmax.f32 %v1649_v45, %v1650_v39  ;;  %v1712_v62 = vrot.slane %v1701_v8, %v3869_v3  ;;  %v1716_v27 = vrot.slane %v1702_v25, %v3869_v3 }
 0x2da   : > { %v1647_v2 = vrot.slane %v1646_v49, 1  ;;  %v1661_v44 = vrot.slane %v1660_v42, 4  ;;  %v2748_v59 = vpop.f32.mrb[28].mxu1  ;;  %v1798_v54 = vsel %vm751_vm2, %v1797_v51, %v1701_v8 }
 0x2db   : > { %v1638_v15 = vrot.slane %v1637_v50, 1  ;;  %v1652_v16 = vrot.slane %v1651_v22, 4  ;;  %v4074_v32 = vadd.f32 %v2748_v59, %v3994_v10  ;;  %v1511_v60 = vpop.f32.mrb[29].mxu1  ;;  %v1741_v24 = vsub.f32 %v4005_v11, %v1712_v62 }
 0x2dc   : > { %v1648_v5 = vmax.f32 %v1646_v49, %v1647_v2  ;;  %v1662_v17 = vmax.f32 %v1660_v42, %v1661_v44  ;;  %v4078_v34 = vadd.f32 %v3994_v10, %v1511_v60  ;;  %v2749_v55 = vpop.f32.mrb[30].mxu1  ;;  %v1742_v45 = vsub.f32 %v4011_v12, %v1712_v62 }
 0x2dd   : > { %v1639_v23 = vmax.f32 %v1637_v50, %v1638_v15  ;;  %v1653_v8 = vmax.f32 %v1651_v22, %v1652_v16  ;;  %v1676_v25 = vsel %vm1612_vm10, %v4074_v32, -inf  ;;  %v4084_v39 = vadd.f32 %v2749_v55, %v3999_v4  ;;  %v1514_v51 = vpop.f32.mrb[31].mxu1 }
 0x2de   : > { %v1663_v59 = vrot.slane %v1662_v17, 2  ;;  %v1667_v11 = vsel %vm1612_vm10, %v4078_v34, -inf  ;;  %v4089_v49 = vadd.f32 %v3999_v4, %v1514_v51  ;;  %v1704_v10 = vmax.f32 %v1648_v5, %v1688_v35 }
 0x2df   : > { %v1654_v42 = vrot.slane %v1653_v8, 2  ;;  %v1703_v2 = vmax.f32 %v1639_v23, %v1687_v19  ;;  %v1677_v12 = vsel %vm1612_vm10, %v4084_v39, -inf  ;;  %v1757_v50 = vmul.f32 1.442695, %v1741_v24 }
 0x2e0   : > { %v1664_v22 = vmax.f32 %v1662_v17, %v1663_v59  ;;  %v1678_v62 = vmax.f32 %v1676_v25, %v1677_v12  ;;  %v1668_v44 = vsel %vm1612_vm10, %v4089_v49, -inf  ;;  %v1801_v15 = vrot.slane %v1704_v10, 5 }
 0x2e1   : > { %v1655_v16 = vmax.f32 %v1653_v8, %v1654_v42  ;;  %v1669_v60 = vmax.f32 %v1667_v11, %v1668_v44  ;;  %v1799_v55 = vrot.slane %v1703_v2, 6  ;;  %2915 = vpow2.f32 %v1757_v50 }
 0x2e2   : > { %v1665_v0 = vrot.slane %v1664_v22, 1  ;;  %v1679_v4 = vrot.slane %v1678_v62, 4  ;;  %v1759_v51 = vmul.f32 1.442695, %v1742_v45  ;;  %v1743_v35 = vsub.f32 %v4002_v58, %v1716_v27 }
 0x2e3   : > { %v1656_v19 = vrot.slane %v1655_v16, 1  ;;  %v1670_v5 = vrot.slane %v1669_v60, 4  ;;  %v1800_v23 = vsel %vm753_vm3, %v1799_v55, %v1798_v54  ;;  %v1744_v24 = vsub.f32 %v4008_v61, %v1716_v27 }
 0x2e4   : > { %v1666_v17 = vmax.f32 %v1664_v22, %v1665_v0  ;;  %v1680_v25 = vmax.f32 %v1678_v62, %v1679_v4  ;;  %v1802_v59 = vsel %vm755_vm4, %v1801_v15, %v1800_v23  ;;  %2917 = vpow2.f32 %v1759_v51 }
 0x2e5   : > { %v1657_v8 = vmax.f32 %v1655_v16, %v1656_v19  ;;  %v1671_v11 = vmax.f32 %v1669_v60, %v1670_v5  ;;  %v1761_v42 = vmul.f32 1.442695, %v1743_v35  ;;  %v1763_v12 = vmul.f32 1.442695, %v1744_v24 }
 0x2e6   : > { %v1681_v50 = vrot.slane %v1680_v25, 2  ;;  %v1706_v44 = vmax.f32 %v1666_v17, %v1690_v52  ;;  %v1720_v45 = vrot.slane %v1703_v2, %v3869_v3  ;;  %v4101_v58 = vrot.slane %v1704_v10, %v3869_v3 }
 0x2e7   : > { %v1672_v31 = vrot.slane %v1671_v11, 2  ;;  %v1691_v54 = vrot.slane %v4021_v1, 6  ;;  %v1705_v0 = vmax.f32 %v1657_v8, %v1689_v18  ;;  %2919 = vpow2.f32 %v1761_v42 }
 0x2e8   : > { %v1682_v61 = vmax.f32 %v1680_v25, %v1681_v50  ;;  %v1732_v27 = vrot.slane %v1706_v44, %v3869_v3  ;;  %v1805_v22 = vrot.slane %v1706_v44, 3  ;;  %2921 = vpow2.f32 %v1763_v12 }
 0x2e9   : > { %v1673_v62 = vmax.f32 %v1671_v11, %v1672_v31  ;;  %v1803_v15 = vrot.slane %v1705_v0, 4  ;;  %v1745_v52 = vsub.f32 %v4027_v33, %v1720_v45  ;;  %v1746_v2 = vsub.f32 %v4033_v40, %v1720_v45 }
 0x2ea   : > { %v1683_v10 = vrot.slane %v1682_v61, 1  ;;  %v1751_v16 = vsub.f32 %v4046_v14, %v1732_v27  ;;  %v1752_v60 = vsub.f32 %v4054_v26, %v1732_v27  ;;  %v1747_v18 = vsub.f32 %v4024_v56, %v4101_v58 }
 0x2eb   : > { %v4113_v55 = vpop.eup %2915  ;;  %v1674_v4 = vrot.slane %v1673_v62, 1  ;;  %v1804_v51 = vsel %vm757_vm5, %v1803_v15, %v1802_v59  ;;  %v1765_v35 = vmul.f32 1.442695, %v1745_v52  ;;  %v1767_v31 = vmul.f32 1.442695, %v1746_v2 }
 0x2ec   : > { %v1684_v19 = vmax.f32 %v1682_v61, %v1683_v10  ;;  %v1777_v5 = vmul.f32 1.442695, %v1751_v16  ;;  %v1779_v33 = vmul.f32 1.442695, %v1752_v60  ;;  %v1806_v40 = vsel %vm759_vm6, %v1805_v22, %v1804_v51 }
 0x2ed   : > { %v1675_v23 = vmax.f32 %v1673_v62, %v1674_v4  ;;  %v1815_v14 = vsel %vm1612_vm10, %v4113_v55, 0.0  ;;  %2923 = vpow2.f32 %v1765_v35  ;;  %v1748_v56 = vsub.f32 %v4030_v38, %v4101_v58 }
 0x2ee   : > { %v4121_v26 = vpop.eup %2917  ;;  %v4409_v24 = vrot.slane %v4021_v1, 7  ;;  %2925 = vpow2.f32 %v1777_v5  ;;  %v1769_v25 = vmul.f32 1.442695, %v1747_v18  ;;  %v1728_v59 = vrot.slane %v1705_v0, %v3869_v3 }
 0x2ef   : > { %v1707_v8 = vmax.f32 %v1675_v23, %v1691_v54  ;;  %2927 = vpow2.f32 %v1779_v33  ;;  %v1816_v11 = vsel %vm1612_vm10, %v4121_v26, 0.0 }
 0x2f0   : > { %v1708_v17 = vmax.f32 %v1684_v19, %v4409_v24  ;;  %v1817_v50 = vadd.f32 %v1816_v11, %v1815_v14  ;;  %2929 = vpow2.f32 %v1767_v31  ;;  %v1749_v58 = vsub.f32 %v4050_v13, %v1728_v59 }
 0x2f1   : > { %v4129_v38 = vpop.eup %2919  ;;  %v1736_v44 = vrot.slane %v1707_v8, %v3869_v3  ;;  %v1807_v45 = vrot.slane %v1707_v8, 2  ;;  %2931 = vpow2.f32 %v1769_v25  ;;  %v1771_v19 = vmul.f32 1.442695, %v1748_v56 }
 0x2f2   : > { %v1740_v42 = vrot.slane %v1708_v17, %v3869_v3  ;;  %v1809_v12 = vrot.slane %v1708_v17, 1  ;;  %v4133_v61 = vpop.eup %2921  ;;  %v1818_v27 = vrot.slane %v1817_v50, 4  ;;  %v1824_v22 = vsel %vm1612_vm10, %v4129_v38, 0.0 }
 0x2f3   : > { %v1753_v62 = vsub.f32 %v4078_v34, %v1736_v44  ;;  %v1754_v15 = vsub.f32 %v4089_v49, %v1736_v44  ;;  %v1808_v52 = vsel %vm761_vm7, %v1807_v45, %v1806_v40  ;;  %v1825_v2 = vsel %vm1612_vm10, %v4133_v61, 0.0 }
 0x2f4   : > { %v1755_v54 = vsub.f32 %v4074_v32, %v1740_v42  ;;  %v1756_v0 = vsub.f32 %v4084_v39, %v1740_v42  ;;  %v1810_v16 = vsel %vm763_vm8, %v1809_v12, %v1808_v52  ;;  %v1819_v32 = vadd.f32 %v1818_v27, %v1817_v50 }
 0x2f5   : > { %v1781_v60 = vmul.f32 1.442695, %v1753_v62  ;;  %v1783_v39 = vmul.f32 1.442695, %v1754_v15  ;;  %v1812_v18 = vsub.f32 %v4021_v1, %v1810_v16  ;;  %v1826_v4 = vadd.f32 %v1825_v2, %v1824_v22 }
 0x2f6   : > { %v1785_v13 = vmul.f32 1.442695, %v1755_v54  ;;  %v1787_v10 = vmul.f32 1.442695, %v1756_v0  ;;  %v1820_v51 = vrot.slane %v1819_v32, 2  ;;  %v1750_v34 = vsub.f32 %v4060_v36, %v1728_v59 }
 0x2f7   : > { %v4147_v49 = vpop.eup %2923  ;;  %v1813_v35 = vmul.f32 1.442695, %v1812_v18  ;;  %v1827_v31 = vrot.slane %v1826_v4, 4  ;;  %v1773_v40 = vmul.f32 1.442695, %v1749_v58 }
 0x2f8   : > { %2933 = vpow2.f32 %v1785_v13  ;;  %v4149_v5 = vpop.eup %2925  ;;  %v1833_v33 = vsel %vm1612_vm10, %v4147_v49, 0.0  ;;  %v1775_v14 = vmul.f32 1.442695, %v1750_v34  ;;  %v1821_v17 = vadd.f32 %v1820_v51, %v1819_v32 }
 0x2f9   : > { %2935 = vpow2.f32 %v1787_v10  ;;  %v4153_v23 = vpop.eup %2927  ;;  %v1860_v1 = vsel %vm1612_vm10, %v4149_v5, 0.0  ;;  %v1828_v36 = vadd.f32 %v1827_v31, %v1826_v4 }
 0x2fa   : > { %2937 = vpow2.f32 %v1781_v60  ;;  %v4157_v24 = vpop.eup %2929  ;;  %v1861_v56 = vsel %vm1612_vm10, %v4153_v23, 0.0  ;;  %v1822_v58 = vrot.slane %v1821_v17, 1 }
 0x2fb   : > { %2939 = vpow2.f32 %v1783_v39  ;;  %v4161_v25 = vpop.eup %2931  ;;  %v1862_v59 = vadd.f32 %v1861_v56, %v1860_v1  ;;  %v1829_v8 = vrot.slane %v1828_v36, 2  ;;  %v1834_v11 = vsel %vm1612_vm10, %v4157_v24, 0.0 }
 0x2fc   : > { %2941 = vpow2.f32 %v1813_v35  ;;  %v1835_v42 = vadd.f32 %v1834_v11, %v1833_v33  ;;  %v1823_v60 = vadd.f32 %v1822_v58, %v1821_v17  ;;  %v1842_v34 = vsel %vm1612_vm10, %v4161_v25, 0.0 }
 0x2fd   : > { %2943 = vpow2.f32 %v1771_v19  ;;  %v1863_v12 = vrot.slane %v1862_v59, 4  ;;  %v1830_v50 = vadd.f32 %v1829_v8, %v1828_v36 }
 0x2fe   : > { %2945 = vpow2.f32 %v1773_v40  ;;  %v1836_v44 = vrot.slane %v1835_v42, 4 }
 0x2ff   : > { %2947 = vpow2.f32 %v1775_v14  ;;  %v1864_v45 = vadd.f32 %v1863_v12, %v1862_v59  ;;  %v1831_v0 = vrot.slane %v1830_v50, 1 }
 0x300   : > { %v1837_v27 = vadd.f32 %v1836_v44, %v1835_v42 }
 0x301   : > { %v1865_v15 = vrot.slane %v1864_v45, 2  ;;  %v1832_v4 = vadd.f32 %v1831_v0, %v1830_v50 }
 0x302   : > { %v4165_v54 = vpop.eup %2933  ;;  %v1838_v13 = vrot.slane %v1837_v27, 2 }
 0x303   : > { %v4167_v22 = vpop.eup %2935  ;;  %v1878_v62 = vsel %vm1612_vm10, %v4165_v54, 0.0  ;;  %v1866_v19 = vadd.f32 %v1865_v15, %v1864_v45 }
 0x304   : > { %v4171_v52 = vpop.eup %2937  ;;  %v1879_v2 = vsel %vm1612_vm10, %v4167_v22, 0.0  ;;  %v1839_v51 = vadd.f32 %v1838_v13, %v1837_v27 }
 0x305   : > { %v4175_v10 = vpop.eup %2939  ;;  %v1880_v16 = vadd.f32 %v1879_v2, %v1878_v62  ;;  %v1869_v32 = vsel %vm1612_vm10, %v4171_v52, 0.0 }
 0x306   : > { %v4179_v39 = vpop.eup %2941  ;;  %v1870_v18 = vsel %vm1612_vm10, %v4175_v10, 0.0  ;;  %v1840_v14 = vrot.slane %v1839_v51, 1 }
 0x307   : > { %v4185_v35 = vpop.eup %2943  ;;  %v1881_v31 = vrot.slane %v1880_v16, 4  ;;  %v1871_v33 = vadd.f32 %v1870_v18, %v1869_v32  ;;  %v1903_v40 = vadd.f32 %v4179_v39, %v1823_v60  ;;  %v1888_v36 = vrot.slane %v4179_v39, 1 }
 0x308   : > { %v4188_v1 = vpop.eup %2945  ;;  %v1889_v56 = vrot.slane %v4179_v39, 2  ;;  %v1843_v17 = vsel %vm1612_vm10, %v4185_v35, 0.0  ;;  %v1841_v50 = vadd.f32 %v1840_v14, %v1839_v51  ;;  %v1867_v32 = vrot.slane %v1866_v19, 1 }
 0x309   : > { %v4194_v59 = vpop.eup %2947  ;;  %v1882_v8 = vadd.f32 %v1881_v31, %v1880_v16  ;;  %v1872_v11 = vrot.slane %v1871_v33, 4  ;;  %2949 = vrcp.f32 %v1903_v40  ;;  %v1844_v42 = vadd.f32 %v1843_v17, %v1842_v34 }
 0x30a   : > { %v1904_v12 = vadd.f32 %v1888_v36, %v1832_v4  ;;  %v1851_v44 = vsel %vm1612_vm10, %v4188_v1, 0.0  ;;  %v1852_v27 = vsel %vm1612_vm10, %v4194_v59, 0.0  ;;  %v1905_v62 = vadd.f32 %v1889_v56, %v1841_v50 }
 0x30b   : > { %v1883_v45 = vrot.slane %v1882_v8, 2  ;;  %v1873_v58 = vadd.f32 %v1872_v11, %v1871_v33  ;;  %v1845_v0 = vrot.slane %v1844_v42, 4  ;;  %v1853_v15 = vadd.f32 %v1852_v27, %v1851_v44 }
 0x30c   : > { %2951 = vrcp.f32 %v1904_v12  ;;  %v1892_v18 = vrot.slane %v4179_v39, 5  ;;  %v1868_v31 = vadd.f32 %v1867_v32, %v1866_v19  ;;  %v1894_v40 = vrot.slane %v4179_v39, 7 }
 0x30d   : > { %v1884_v2 = vadd.f32 %v1883_v45, %v1882_v8  ;;  %v1874_v13 = vrot.slane %v1873_v58, 2  ;;  %v1846_v16 = vadd.f32 %v1845_v0, %v1844_v42  ;;  %2953 = vrcp.f32 %v1905_v62 }
 0x30e   : > { %v1854_v60 = vrot.slane %v1853_v15, 4  ;;  %v1908_v56 = vadd.f32 %v1892_v18, %v1868_v31  ;;  %v1893_v8 = vrot.slane %v4179_v39, 6  ;;  %v1890_v11 = vrot.slane %v4179_v39, 3 }
 0x30f   : > { %v1885_v4 = vrot.slane %v1884_v2, 1  ;;  %v1875_v51 = vadd.f32 %v1874_v13, %v1873_v58  ;;  %v1847_v34 = vrot.slane %v1846_v16, 2 }
 0x310   : > { %v1855_v33 = vadd.f32 %v1854_v60, %v1853_v15  ;;  %2955 = vrcp.f32 %v1908_v56 }
 0x311   : > { %v1886_v36 = vadd.f32 %v1885_v4, %v1884_v2  ;;  %v1876_v14 = vrot.slane %v1875_v51, 1  ;;  %v1848_v17 = vadd.f32 %v1847_v34, %v1846_v16  ;;  %v1891_v34 = vrot.slane %v4179_v39, 4 }
 0x312   : > { %v1856_v42 = vrot.slane %v1855_v33, 2 }
 0x313   : > { %v2950_v12 = vpop.eup %2949  ;;  %v1877_v50 = vadd.f32 %v1876_v14, %v1875_v51  ;;  %v1849_v44 = vrot.slane %v1848_v17, 1  ;;  %v1910_v45 = vadd.f32 %v1894_v40, %v1886_v36 }
 0x314   : > { %v1922_v58 = vrot.slane %v2950_v12, %v3869_v3  ;;  %v1857_v19 = vadd.f32 %v1856_v42, %v1855_v33 }
 0x315   : > { %v1909_v0 = vadd.f32 %v1893_v8, %v1877_v50  ;;  %v1850_v27 = vadd.f32 %v1849_v44, %v1848_v17  ;;  %2957 = vrcp.f32 %v1910_v45 }
 0x316   : > { %v2952_v62 = vpop.eup %2951  ;;  %v1951_v15 = vmul.f32 %v4113_v55, %v1922_v58  ;;  %v1952_v2 = vmul.f32 %v4121_v26, %v1922_v58  ;;  %v1858_v13 = vrot.slane %v1857_v19, 1 }
 0x317   : > { %2959 = vrcp.f32 %v1909_v0  ;;  %v1926_v16 = vrot.slane %v2952_v62, %v3869_v3  ;;  %v1906_v32 = vadd.f32 %v1890_v11, %v1850_v27  ;;  %v1975_v60 = vrot.slane %v2952_v62, 7  ;;  %v2954_v18 = vpop.eup %2953 }
 0x318   : > { %v1992_v4 = vpack.c.bf16 %v1952_v2, %v1951_v15  ;;  %v1859_v51 = vadd.f32 %v1858_v13, %v1857_v19  ;;  %v1930_v40 = vrot.slane %v2954_v18, %v3869_v3  ;;  %v1977_v55 = vrot.slane %v2954_v18, 6 }
 0x319   : > { %v1953_v31 = vmul.f32 %v4129_v38, %v1926_v16  ;;  %v1954_v33 = vmul.f32 %v4133_v61, %v1926_v16  ;;  %2961 = vrcp.f32 %v1906_v32  ;;  %v1976_v36 = vsel %vm751_vm2, %v1975_v60, %v2950_v12 }
 0x31a   : > { %2760 = vmatprep.mubr.msk.bf16.mxu0 %vm1612_vm10, %v1992_v4  ;;  %v1907_v26 = vadd.f32 %v1891_v34, %v1859_v51  ;;  %v1955_v17 = vmul.f32 %v4147_v49, %v1930_v40  ;;  %v1956_v56 = vmul.f32 %v4157_v24, %v1930_v40  ;;  %v1978_v8 = vsel %vm753_vm3, %v1977_v55, %v1976_v36  ;;  %v2956_v38 = vpop.eup %2955  ;;  %v2913_v55 = vld [vmem:[#allocation13] sm:$0xff]  }
 0x31b   : > { %v1993_v14 = vpack.c.bf16 %v1954_v33, %v1953_v31  ;;  %v1942_v11 = vrot.slane %v2956_v38, %v3869_v3  ;;  %v1983_v51 = vrot.slane %v2956_v38, 3 }
 0x31c   : > { %2963 = vrcp.f32 %v1907_v26  ;;  %v1994_v61 = vpack.c.bf16 %v1956_v56, %v1955_v17  ;;  %v2914_v26 = vld [vmem:[#allocation13 + $0x8] sm:$0xff]  }
 0x31d   : > { %2761 = vmatmul.mubr.msk.bf16.vlgmr.msra.gmra.mrb[24].mxu0 %vm1612_vm10, %v1993_v14  ;;  %v1961_v50 = vmul.f32 %v4149_v5, %v1942_v11  ;;  %v1962_v12 = vmul.f32 %v4153_v23, %v1942_v11 }
 0x31e   : > { %2764 = vmatprep.mubr.msk.bf16.mxu0 %vm1612_vm10, %v1994_v61 }
 0x31f   : > { %v2958_v42 = vpop.eup %2957  ;;  %v1997_v24 = vpack.c.bf16 %v1962_v12, %v1961_v50 }
 0x320   : > { %v1950_v49 = vrot.slane %v2958_v42, %v3869_v3 }
 0x321   : > { %v2960_v44 = vpop.eup %2959 }
 0x322   : > { %v1946_v45 = vrot.slane %v2960_v44, %v3869_v3  ;;  %v1965_v58 = vmul.f32 %v4165_v54, %v1950_v49  ;;  %v1966_v19 = vmul.f32 %v4167_v22, %v1950_v49  ;;  %v1985_v18 = vrot.slane %v2960_v44, 2 }
 0x323   : > { %v2962_v0 = vpop.eup %2961 }
 0x324   : > { %v1963_v27 = vmul.f32 %v4171_v52, %v1946_v45  ;;  %v1964_v62 = vmul.f32 %v4175_v10, %v1946_v45  ;;  %v1934_v15 = vrot.slane %v2962_v0, %v3869_v3  ;;  %v1979_v5 = vrot.slane %v2962_v0, 5 }
 0x325   : > { %v1999_v2 = vpack.c.bf16 %v1966_v19, %v1965_v58 }
 0x326   : > { %v2964_v23 = vpop.eup %2963  ;;  %v1998_v13 = vpack.c.bf16 %v1964_v62, %v1963_v27  ;;  %v1957_v16 = vmul.f32 %v4161_v25, %v1934_v15  ;;  %v1958_v32 = vmul.f32 %v4185_v35, %v1934_v15  ;;  %v1980_v54 = vsel %vm755_vm4, %v1979_v5, %v1978_v8 }
 0x327   : > { %v1938_v60 = vrot.slane %v2964_v23, %v3869_v3  ;;  %v1981_v22 = vrot.slane %v2964_v23, 4  ;;  %v1987_v35 = vrot.slane %v2958_v42, 1 }
 0x328   : > { %v1995_v4 = vpack.c.bf16 %v1958_v32, %v1957_v16 }
 0x329   : > { %v1959_v52 = vmul.f32 %v4188_v1, %v1938_v60  ;;  %v1960_v10 = vmul.f32 %v4194_v59, %v1938_v60  ;;  %v1982_v34 = vsel %vm757_vm5, %v1981_v22, %v1980_v54  ;;  %v4410_v59 = vmov 0.0  }
 0x32a   : > { %2765 = vmatmul.mubr.msk.bf16.gmra.mrb[28].mxu0 %vm1612_vm10, %v1995_v4  ;;  %v1984_v25 = vsel %vm759_vm6, %v1983_v51, %v1982_v34 }
 0x32b   : > { %v1996_v31 = vpack.c.bf16 %v1960_v10, %v1959_v52  ;;  %v1986_v3 = vsel %vm761_vm7, %v1985_v18, %v1984_v25 }
 0x32c   : > { %v1988_v33 = vsel %vm763_vm8, %v1987_v35, %v1986_v3 }
 0x32d   : > { %2768 = vmatprep.mubr.msk.bf16.mxu0 %vm1612_vm10, %v1996_v31  ;;  %v1990_v40 = vmul.f32 %v4179_v39, %v1988_v33 }
 0x32f   : > { %v2125_v1 = vpack.c.bf16 %v1990_v40, %v1990_v40 }
 0x331   : > { %2779 = vmatmul.mubr.msk.bf16.vlgmr.msra.gmra.mrb[32].mxu1 %vm1612_vm10, %v2125_v1 }
 0x332   : > { %2769 = vmatmul.mubr.msk.bf16.gmra.mrb[32].mxu0 %vm1612_vm10, %v1997_v24  ;;  %2786 = vmatprep.mubr.msk.bf16.mxu1 %vm3255_vm0, %v4410_v59 }
 0x333   : > { %2772 = vmatprep.mubr.msk.bf16.mxu0 %vm1612_vm10, %v1998_v13  ;;  %2783 = vmatpush3.bf16.msra.mxu1 %v2913_v55 }
 0x334   : > { %2784 = vmatprep.subr.bf16.mxu1 %v4410_v59 }
 0x337   : > { %2785 = vmatpush3.bf16.msra.mxu1 %v2914_v26 }
 0x33a   : > { %2773 = vmatmul.mubr.msk.bf16.gmra.mrb[36].mxu0 %vm1612_vm10, %v1999_v2 }
 0x3f0   : > { %v2762_v36 = vpop.f32.mrb[24].mxu0 }
 0x3f1   : > { %v2171_v39 = vmul.f32 %v2762_v36, %v3914_v21  ;;  %v2062_v14 = vpop.f32.mrb[25].mxu0 }
 0x3f2   : > { %v2169_v17 = vmul.f32 %v2062_v14, %v3916_v43  ;;  %v2763_v56 = vpop.f32.mrb[26].mxu0 }
 0x3f3   : > { %v2172_v8 = vmul.f32 %v2763_v56, %v3920_v20  ;;  %v2065_v38 = vpop.f32.mrb[27].mxu0  ;;  %v2194_v11 = vsel %vm635_vm1, %v2171_v39, 0.0 }
 0x3f4   : > { %v2170_v61 = vmul.f32 %v2065_v38, %v3924_v28  ;;  %v2185_v50 = vsel %vm635_vm1, %v2169_v17, 0.0 }
 0x3f5   : > { %v2195_v42 = vsel %vm635_vm1, %v2172_v8, 0.0 }
 0x3f6   : > { %v2196_v12 = vadd.f32 %v2195_v42, %v2194_v11  ;;  %v2186_v49 = vsel %vm635_vm1, %v2170_v61, 0.0 }
 0x3f7   : > { %v2187_v44 = vadd.f32 %v2186_v49, %v2185_v50 }
 0x3f8   : > { %v2197_v21 = vrot.slane %v2196_v12, 4 }
 0x3f9   : > { %v2188_v24 = vrot.slane %v2187_v44, 4 }
 0x3fa   : > { %v2198_v45 = vadd.f32 %v2197_v21, %v2196_v12 }
 0x3fb   : > { %v2189_v43 = vadd.f32 %v2188_v24, %v2187_v44 }
 0x3fc   : > { %v2199_v58 = vrot.slane %v2198_v45, 2 }
 0x3fd   : > { %v2190_v19 = vrot.slane %v2189_v43, 2  ;;  %v2766_v20 = vpop.f32.mrb[28].mxu0 }
 0x3fe   : > { %v2175_v28 = vmul.f32 %v2766_v20, %v3930_v6  ;;  %v2078_v27 = vpop.f32.mrb[29].mxu0  ;;  %v2200_v62 = vadd.f32 %v2199_v58, %v2198_v45 }
 0x3ff   : > { %v2191_v0 = vadd.f32 %v2190_v19, %v2189_v43  ;;  %v2173_v15 = vmul.f32 %v2078_v27, %v3932_v29  ;;  %v2767_v5 = vpop.f32.mrb[30].mxu0 }
 0x400   : > { %v2176_v2 = vmul.f32 %v2767_v5, %v3936_v37  ;;  %v2081_v23 = vpop.f32.mrb[31].mxu0  ;;  %v2212_v32 = vsel %vm635_vm1, %v2175_v28, 0.0  ;;  %v2201_v54 = vrot.slane %v2200_v62, 1 }
 0x401   : > { %v2174_v13 = vmul.f32 %v2081_v23, %v3940_v48  ;;  %v2192_v16 = vrot.slane %v2191_v0, 1  ;;  %v2203_v22 = vsel %vm635_vm1, %v2173_v15, 0.0 }
 0x402   : > { %v2213_v60 = vsel %vm635_vm1, %v2176_v2, 0.0  ;;  %v2202_v3 = vadd.f32 %v2201_v54, %v2200_v62 }
 0x403   : > { %v2214_v18 = vadd.f32 %v2213_v60, %v2212_v32  ;;  %v2204_v6 = vsel %vm635_vm1, %v2174_v13, 0.0  ;;  %v2193_v48 = vadd.f32 %v2192_v16, %v2191_v0 }
 0x404   : > { %v2205_v4 = vadd.f32 %v2204_v6, %v2203_v22  ;;  %v2163_v52 = vpop.f32.mrb[32].mxu1 }
 0x405   : > { %v2215_v29 = vrot.slane %v2214_v18, 4  ;;  %v4266_v10 = vmul.f32 %v3985_v57, %v2163_v52  ;;  %v2780_v37 = vpop.f32.mrb[33].mxu1  ;;  %v2770_v51 = vpop.f32.mrb[32].mxu0 }
 0x406   : > { %v2206_v34 = vrot.slane %v2205_v4, 4  ;;  %v2166_v31 = vpop.f32.mrb[34].mxu1  ;;  %v2179_v25 = vmul.f32 %v2770_v51, %v3946_v46  ;;  %v2094_v35 = vpop.f32.mrb[33].mxu0 }
 0x407   : > { %v2216_v33 = vadd.f32 %v2215_v29, %v2214_v18  ;;  %v2781_v40 = vpop.f32.mrb[35].mxu1  ;;  %v2177_v1 = vmul.f32 %v2094_v35, %v3948_v47  ;;  %v2771_v59 = vpop.f32.mrb[34].mxu0  ;;  %v2282_v17 = vrot.slane %v4266_v10, 1  ;;  %v2297_v38 = vadd.f32 %v4266_v10, %v2193_v48 }
 0x408   : > { %v2207_v55 = vadd.f32 %v2206_v34, %v2205_v4  ;;  %v2180_v26 = vmul.f32 %v2771_v59, %v3952_v41  ;;  %v2097_v36 = vpop.f32.mrb[35].mxu0  ;;  %v2230_v39 = vsel %vm635_vm1, %v2179_v25, 0.0  ;;  %v2283_v23 = vrot.slane %v4266_v10, 2 }
 0x409   : > { %v2217_v57 = vrot.slane %v2216_v33, 2  ;;  %v2178_v14 = vmul.f32 %v2097_v36, %v3956_v53  ;;  %v2221_v46 = vsel %vm635_vm1, %v2177_v1, 0.0  ;;  %v2298_v41 = vadd.f32 %v2282_v17, %v2202_v3 }
 0x40a   : > { %v2208_v56 = vrot.slane %v2207_v55, 2  ;;  %v2231_v8 = vsel %vm635_vm1, %v2180_v26, 0.0  ;;  %v2305_v12 = vpack.c.bf16 %v2297_v38, %v2297_v38  ;;  %v2284_v53 = vrot.slane %v4266_v10, 3 }
 0x40b   : > { %v2218_v47 = vadd.f32 %v2217_v57, %v2216_v33  ;;  %v2232_v61 = vadd.f32 %v2231_v8, %v2230_v39  ;;  %v2222_v11 = vsel %vm635_vm1, %v2178_v14, 0.0  ;;  %v2306_v21 = vpack.c.bf16 %v2298_v41, %v2298_v41 }
 0x40c   : > { %v2209_v42 = vadd.f32 %v2208_v56, %v2207_v55  ;;  %v2223_v50 = vadd.f32 %v2222_v11, %v2221_v46  ;;  %v2332_v58 = vunpack.c.l.b16 %v2305_v12  ;;  %v2285_v36 = vrot.slane %v4266_v10, 4 }
 0x40d   : > { %v2219_v49 = vrot.slane %v2218_v47, 1  ;;  %v2233_v44 = vrot.slane %v2232_v61, 4  ;;  %v2774_v24 = vpop.f32.mrb[36].mxu0  ;;  %v2333_v27 = vunpack.c.l.b16 %v2306_v21 }
 0x40e   : > { %v2210_v45 = vrot.slane %v2209_v42, 1  ;;  %v2224_v43 = vrot.slane %v2223_v50, 4  ;;  %v2183_v19 = vmul.f32 %v2774_v24, %v3962_v63  ;;  %v2110_v20 = vpop.f32.mrb[37].mxu0 }
 0x40f   : > { %v2220_v0 = vadd.f32 %v2219_v49, %v2218_v47  ;;  %v2234_v28 = vadd.f32 %v2233_v44, %v2232_v61  ;;  %v2181_v62 = vmul.f32 %v2110_v20, %v3964_v9  ;;  %v2775_v15 = vpop.f32.mrb[38].mxu0  ;;  %v2340_v54 = vrot.slane %v2333_v27, 7 }
 0x410   : > { %v2211_v5 = vadd.f32 %v2210_v45, %v2209_v42  ;;  %v2225_v2 = vadd.f32 %v2224_v43, %v2223_v50  ;;  %v2184_v13 = vmul.f32 %v2775_v15, %v3968_v30  ;;  %v2113_v16 = vpop.f32.mrb[39].mxu0  ;;  %v2248_v22 = vsel %vm635_vm1, %v2183_v19, 0.0 }
 0x411   : > { %v2235_v32 = vrot.slane %v2234_v28, 2  ;;  %v2300_v60 = vadd.f32 %v2284_v53, %v2220_v0  ;;  %v2182_v4 = vmul.f32 %v2113_v16, %v3972_v7  ;;  %v2341_v29 = vsel %vm751_vm2, %v2340_v54, %v2332_v58 }
 0x412   : > { %v2226_v63 = vrot.slane %v2225_v2, 2  ;;  %v2299_v18 = vadd.f32 %v2283_v23, %v2211_v5  ;;  %v2249_v6 = vsel %vm635_vm1, %v2184_v13, 0.0  ;;  %v2239_v30 = vsel %vm635_vm1, %v2181_v62, 0.0 }
 0x413   : > { %v2236_v9 = vadd.f32 %v2235_v32, %v2234_v28  ;;  %v2308_v52 = vpack.c.bf16 %v2300_v60, %v2300_v60  ;;  %v2250_v37 = vadd.f32 %v2249_v6, %v2248_v22  ;;  %v2240_v34 = vsel %vm635_vm1, %v2182_v4, 0.0 }
 0x414   : > { %v2227_v51 = vadd.f32 %v2226_v63, %v2225_v2  ;;  %v2307_v48 = vpack.c.bf16 %v2299_v18, %v2299_v18  ;;  %v2241_v3 = vadd.f32 %v2240_v34, %v2239_v30  ;;  %v2286_v7 = vrot.slane %v4266_v10, 5 }
 0x415   : > { %v2237_v31 = vrot.slane %v2236_v9, 1  ;;  %v2335_v25 = vunpack.c.l.b16 %v2308_v52  ;;  %v2251_v35 = vrot.slane %v2250_v37, 4  ;;  %v2288_v53 = vrot.slane %v4266_v10, 7 }
 0x416   : > { %v2228_v33 = vrot.slane %v2227_v51, 1  ;;  %v2334_v40 = vunpack.c.l.b16 %v2307_v48  ;;  %v2242_v55 = vrot.slane %v2241_v3, 4  ;;  %v2287_v19 = vrot.slane %v4266_v10, 6  ;;  %v2622_v10 = vld [vmem:[%s4411_s2] ss:$0 sm:$0xff]  ;;  %s3169_s2 = scalar_lea.vmem %s3168_s22, 256 }
 0x417   : > { %v2238_v1 = vadd.f32 %v2237_v31, %v2236_v9  ;;  %v2252_v59 = vadd.f32 %v2251_v35, %v2250_v37  ;;  %v2344_v14 = vrot.slane %v2335_v25, 5  ;;  %p3171_p3 = scmp.lt.s32.totalorder %s3169_s2, %s3163_s24 }
 0x418   : > { %v2229_v26 = vadd.f32 %v2228_v33, %v2227_v51  ;;  %v2342_v57 = vrot.slane %v2334_v40, 6  ;;  %v2243_v56 = vadd.f32 %v2242_v55, %v2241_v3 }
 0x419   : > { %v2302_v39 = vadd.f32 %v2286_v7, %v2238_v1  ;;  %v2253_v17 = vrot.slane %v2252_v59, 2  ;;  %p3172_p2 = por %p3171_p3, %p3170_p1 }
 0x41a   : > { %v2301_v46 = vadd.f32 %v2285_v36, %v2229_v26  ;;  %v2343_v8 = vsel %vm753_vm3, %v2342_v57, %v2341_v29  ;;  %v2244_v11 = vrot.slane %v2243_v56, 2 }
 0x41b   : > { %v2310_v38 = vpack.c.bf16 %v2302_v39, %v2302_v39  ;;  %v2345_v47 = vsel %vm755_vm4, %v2344_v14, %v2343_v8  ;;  %v2254_v61 = vadd.f32 %v2253_v17, %v2252_v59  ;;  %p3173_p8 = pnand %p3172_p2, %p3166_p13 }
 0x41c   : > { %v2309_v41 = vpack.c.bf16 %v2301_v46, %v2301_v46  ;;  %v2245_v12 = vadd.f32 %v2244_v11, %v2243_v56 }
 0x41d   : > { %v2337_v42 = vunpack.c.l.b16 %v2310_v38  ;;  %v2255_v50 = vrot.slane %v2254_v61, 1 }
 0x41e   : > { %v2336_v49 = vunpack.c.l.b16 %v2309_v41  ;;  %v2246_v21 = vrot.slane %v2245_v12, 1 }
 0x41f   : > { %v2256_v44 = vadd.f32 %v2255_v50, %v2254_v61  ;;  %v2348_v45 = vrot.slane %v2337_v42, 3 }
 0x420   : > { %v2346_v24 = vrot.slane %v2336_v49, 4  ;;  %v2247_v58 = vadd.f32 %v2246_v21, %v2245_v12 }
 0x421   : > { %v2304_v43 = vadd.f32 %v2288_v53, %v2256_v44 }
 0x422   : > { %v2347_v20 = vsel %vm757_vm5, %v2346_v24, %v2345_v47  ;;  %v2303_v28 = vadd.f32 %v2287_v19, %v2247_v58 }
 0x423   : > { %v2312_v0 = vpack.c.bf16 %v2304_v43, %v2304_v43  ;;  %v2349_v27 = vsel %vm759_vm6, %v2348_v45, %v2347_v20 }
 0x424   : > { %v2311_v62 = vpack.c.bf16 %v2303_v28, %v2303_v28 }
 0x425   : > { %v2339_v15 = vunpack.c.l.b16 %v2312_v0 }
 0x426   : > { %v2338_v5 = vunpack.c.l.b16 %v2311_v62 }
 0x427   : > { %v2352_v23 = vrot.slane %v2339_v15, 1 }
 0x428   : > { %v2350_v2 = vrot.slane %v2338_v5, 2 }
 0x42a   : > { %v2351_v13 = vsel %vm761_vm7, %v2350_v2, %v2349_v27 }
 0x42b   : > { %v2353_v16 = vsel %vm763_vm8, %v2352_v23, %v2351_v13 }
 0x42c   : > { %v2354_v32 = vpack.c.b16 %v2353_v16, %v2353_v16 }
 0x42e   : > { %2787 = vmatmul.mubr.msk.bf16.vlgmr.msra.gmra.mrb[36].mxu1 %vm635_vm1, %v2354_v32 }
 0x501   : > { %v2404_v60 = vpop.f32.mrb[36].mxu1 }
 0x502   : > { %v2405_v54 = vadd.f32 %v2622_v10, %v2404_v60  ;;  %v2788_v22 = vpop.f32.mrb[37].mxu1 }
 0x503   : > { %v2407_v63 = vpop.f32.mrb[38].mxu1 }
 0x504   : > { %2410 = vst [vmem:[%s590_s26] sm:$0xff] %v2405_v54  ;;  %v2789_v18 = vpop.f32.mrb[39].mxu1 }
 0x505   : > { %3176 = shalt.err (!%p3173_p8)
}
 0x506   : > { %s3177_s13 = scalar_lea.hbm %s4308_s1, 128  ;;  %s3181_s15 = scalar_lea.hbm %s4412_s0, 256 }
 0x507   : > { %p3178_p10 = scmp.ne.s32.totalorder %s4308_s1, %s3177_s13  ;;  %p3182_p0 = scmp.lt.u32.totalorder %s4308_s1, %s4412_s0 }
 0x508   : > { %p3183_p5 = scmp.lt.u32.totalorder %s3181_s15, %s3177_s13  ;;  %p3185_p6 = scmp.lt.u32.totalorder %s3177_s13, %s4308_s1 }
 0x509   : > { %p3179_p11 = pnand %p3178_p10, %p4413_p9 }
 0x50a   : > { %p3184_p7 = por %p3183_p5, %p3182_p0 }
 0x50b   : > { %p3180_p12 = pneg %p3179_p11 }
 0x50c   : > { %p3186_p4 = por %p3185_p6, %p3184_p7 }
 0x50e   : > { %p3187_p13 = pnand %p3186_p4, %p3180_p12 }
 0x510   : > { %3190 = shalt.err (!%p3187_p13)
}
 0x511   : > { %2817 = dma.vmem_to_hbm [thread:$0]  (%p4413_p9), %s4310_s17, 128, %s4308_s1, %s2412_s27  }
 0x512 PF: > { %s2437_s24 = sand.u32 1, %s3229_s18   ;;  %p4414_p1 = scmp.ne.s32.totalorder %s4394_s29, 0 }
 0x513   : > { %p4415_p3 = scmp.ge.s32.totalorder %s3241_s21, 2  ;;  %s2438_s22 = scalar_lea.sflag [#allocation4], %s2437_s24 }
 0x515   : > { %p2843_p2 = pnand %p4415_p3, %p4414_p1 }
 0x517   : > { %3224 = dma.done.wait (!%p2843_p2), %s2438_s22, 128  }
 0x518   : > { %3226 = vsyncadd (!%p2843_p2), %s2438_s22, 4294967168  ;;  %p31_p8 = scmp.ge.s32.totalorder %s3520_s16, 4   ;;  %s4416_s18 = smov %s3233_s19 }
 0x519   : > { %s4417_s19 = smov %s3237_s20  ;;  %s4418_s20 = smov %s3531_s23 }
 0x51a   : > { %s4419_s21 = smov %s3520_s16  ;;  %33 = sbr.rel (!%p31_p8) target bundleno = 18 (0x12), region = 149 }
 0x521   :  { %2443 = vsyncpa [#allocation3], 1 }
 0x522   :  { %2445 = vsyncpa [#allocation3 + $0x1], 1 }
 0x523   :  { %2446 = vsyncpa [#allocation6], 1 }
 0x524   :  { %2447 = vsyncpa [#allocation9], 1 }
 0x525   :  { %2448 = vsyncpa [#allocation12], 1 }
 0x526   :  { %2449 = vsyncpa [#allocation4], 1 }
 0x527   :  { %2451 = vsyncpa [#allocation4 + $0x1], 1 }

// kernel: tpu_custom_call.1
= control target key start
LH: loop header
LB: loop body
LE: loop exit
PB: predicated region body
PF: predicated region fallthrough
CT: control target
= control target key end

     0   :  { %s4352_s0 = inlined_call_operand.hbm [shape: f32[16,16,32], index: 0, kind: input, shape index: {}]   ;;  %s4353_s1 = inlined_call_operand.vmem [shape: f32[16,32], index: 1, kind: input, shape index: {}]   ;;  %s4354_s2 = inlined_call_operand.hbm [shape: f32[1,32], index: 2, kind: input, shape index: {}]   ;;  %s4355_s3 = inlined_call_operand.hbm [shape: f32[1,32], index: 3, kind: input, shape index: {}]   ;;  %s4356_s4 = inlined_call_operand.hbm [shape: f32[1,32], index: 4, kind: input, shape index: {}]   ;;  %s4357_s5 = inlined_call_operand.vmem [shape: bf16[32,32], index: 5, kind: input, shape index: {}]   ;;  %s4358_s6 = inlined_call_operand.vmem [shape: bf16[32,32], index: 6, kind: input, shape index: {}]   ;;  %s4359_s7 = inlined_call_operand.hbm [shape: f32[1,32], index: 7, kind: input, shape index: {}]   ;;  %s4360_s8 = inlined_call_operand.vmem [shape: bf16[32,32], index: 8, kind: input, shape index: {}]   ;;  %s4361_s9 = inlined_call_operand.hbm [shape: f32[1,32], index: 9, kind: input, shape index: {}]   ;;  %s4362_s10 = inlined_call_operand.hbm [shape: bf16[32,128], index: 10, kind: input, shape index: {}]   ;;  %s4363_s11 = inlined_call_operand.vmem [shape: f32[1,128], index: 11, kind: input, shape index: {}]   ;;  %s4364_s12 = inlined_call_operand.vmem [shape: bf16[32,4], index: 12, kind: input, shape index: {}]   ;;  %s4365_s13 = inlined_call_operand.vmem [shape: bf16[4,32], index: 13, kind: input, shape index: {}]   ;;  %s4366_s14 = inlined_call_operand.vmem [shape: f32[16,4], index: 14, kind: input, shape index: {}]   ;;  %s4367_s15 = inlined_call_operand.hbm [shape: f32[16,128], index: 15, kind: output, shape index: {}]  }
   0x1   :  { %4377 = sst [smem:[#allocation20_spill]] %s4352_s0 }
   0x2   :  { %4378 = sst [smem:[#allocation21_spill]] %s4353_s1 }
   0x3   :  { %4379 = sst [smem:[#allocation22_spill]] %s4354_s2 }
   0x4   :  { %4380 = sst [smem:[#allocation23_spill]] %s4360_s8 }
   0x5   :  { %4381 = sst [smem:[#allocation24_spill]] %s4363_s11 }
   0x6   :  { %4382 = sst [smem:[#allocation25_spill]] %s4364_s12 }
   0x7   :  { %4383 = sst [smem:[#allocation26_spill]] %s4365_s13 }
   0x8   :  { %4384 = sst [smem:[#allocation27_spill]] %s4366_s14 }
   0x9   :  { %4385 = sst [smem:[#allocation28_spill]] %s4367_s15 }
   0xa   :  { %20 = vsyncpa [#allocation3], 0 }
   0xb   :  { %22 = vsyncpa [#allocation3 + $0x1], 0 }
   0xc   :  { %23 = vsyncpa [#allocation6], 0 }
   0xd   :  { %24 = vsyncpa [#allocation9], 0 }
   0xe   :  { %25 = vsyncpa [#allocation12], 0 }
   0xf   :  { %26 = vsyncpa [#allocation4], 0 }
  0x10   :  { %28 = vsyncpa [#allocation4 + $0x1], 0  ;;  %s3338_s18 = smov 0   ;;  %s3340_s19 = smov 0  }
  0x11   :  { %s3342_s20 = smov 0   ;;  %s3344_s21 = smov 0  }
  0x12 LB: > { %s3243_s22 = smov [#allocation5]   ;;  %s3359_s24 = sadd.s32 4294967295, %s3241_s21   ;;  %s3241_s21 = sphi %s3344_s21, %s4419_s21   ;;  %s3237_s20 = sphi %s3342_s20, %s4418_s20   ;;  %s3233_s19 = sphi %s3340_s19, %s4417_s19   ;;  %s3229_s18 = sphi %s3338_s18, %s4416_s18  }
  0x13   : > { %s401_s23 = sshll.u32 %s3243_s22, 4  ;;  %p2553_p0 = scmp.ge.s32.totalorder %s3241_s21, 1  ;;  %s3364_s23 = int_to_ptr.vmem [resolvable:$true] %s401_s23 }
  0x14   : > { %p4372_p1 = scmp.eq.s32.totalorder %s3359_s24, 0  ;;  %p385_p2 = scmp.lt.s32.totalorder %s3241_s21, 3 }
  0x15   : > { %s3244_s26 = smov [#allocation8]   ;;  %s3245_s28 = smov [#allocation11]  }
  0x16   : > { %p3366_p3 = pnand %p2553_p0, %p385_p2  ;;  %s423_s27 = sshll.u32 %s3244_s26, 4  ;;  %s3373_s27 = int_to_ptr.vmem [resolvable:$true] %s423_s27 }
  0x17   : > { %s454_s29 = sshll.u32 %s3245_s28, 4  ;;  %s3246_s16 = smov [#allocation7]   ;;  %s3381_s29 = int_to_ptr.vmem [resolvable:$true] %s454_s29 }
  0x18   : > { %s4386_s25 = scalar_select %p3366_p3, 1, 0 }
  0x19   : > { %p2819_p5 = pneg %p3366_p3  ;;  %s3383_s17 = sshll.u32 %s3246_s16, 4  ;;  %s413_s17 = int_to_ptr.vmem [resolvable:$true] %s3383_s17 }
  0x1a   : > { %s4388_s2 = sld [smem:[#allocation22_spill]] }
  0x1b   : > { %p3377_p6 = pnand %p2819_p5, %p4372_p1 }
  0x1d   : > { %p3393_p8 = pneg %p3377_p6 }
  0x20   : > { %s2965_s11 = scalar_lea.hbm %s4388_s2, 16 }
  0x21   : > { %p2966_p7 = scmp.ne.s32.totalorder %s4388_s2, %s2965_s11  ;;  %p2972_p11 = scmp.lt.u32.totalorder %s2965_s11, %s4388_s2 }
  0x23   : > { %p2968_p9 = pnand %p3393_p8, %p2966_p7 }
  0x25   : > { %p2969_p10 = pneg %p2968_p9 }
  0x27   : > { %p2974_p12 = pnand %p2972_p11, %p2969_p10 }
  0x29   : > { %2977 = shalt.err (!%p2974_p12)
}
  0x2a   : > { %s2978_s14 = scalar_lea.vmem %s3364_s23, 16  ;;  %s2985_s15 = scalar_lea.vmem %s3364_s23, 32 }
  0x2b   : > { %p2979_p13 = scmp.ne.s32.totalorder %s3364_s23, %s2978_s14  ;;  %p2986_p5 = scmp.lt.s32.totalorder %s3364_s23, %s3364_s23 }
  0x2c   : > { %p2987_p7 = scmp.lt.s32.totalorder %s2985_s15, %s2978_s14 }
  0x2d   : > { %p2981_p0 = pnand %p2979_p13, %p3393_p8 }
  0x2e   : > { %p2988_p9 = por %p2987_p7, %p2986_p5 }
  0x2f   : > { %p2982_p2 = pneg %p2981_p0 }
  0x31   : > { %p2989_p4 = pnand %p2988_p9, %p2982_p2 }
  0x33   : > { %2992 = shalt.err (!%p2989_p4)
}
  0x34   : > { %2822 = dma.hbm_to_vmem [thread:$0]  (!%p3377_p6), %s4388_s2, 16, %s3364_s23, [#allocation6]  }
  0x35   : > { %s2993_s16 = scalar_lea.hbm %s4356_s4, 16 }
  0x36   : > { %p2994_p10 = scmp.ne.s32.totalorder %s4356_s4, %s2993_s16  ;;  %p3000_p4 = scmp.lt.u32.totalorder %s2993_s16, %s4356_s4 }
  0x38   : > { %p2996_p11 = pnand %p2994_p10, %p3393_p8 }
  0x3a   : > { %p2997_p12 = pneg %p2996_p11 }
  0x3c   : > { %p3002_p13 = pnand %p3000_p4, %p2997_p12 }
  0x3e   : > { %3005 = shalt.err (!%p3002_p13)
}
  0x3f   : > { %s3006_s23 = scalar_lea.vmem %s3373_s27, 16  ;;  %s3013_s8 = scalar_lea.vmem %s3373_s27, 32 }
  0x40   : > { %p3007_p0 = scmp.ne.s32.totalorder %s3373_s27, %s3006_s23  ;;  %p3014_p7 = scmp.lt.s32.totalorder %s3373_s27, %s3373_s27 }
  0x41   : > { %p3015_p9 = scmp.lt.s32.totalorder %s3013_s8, %s3006_s23 }
  0x42   : > { %p3009_p2 = pnand %p3007_p0, %p3393_p8 }
  0x43   : > { %p3016_p10 = por %p3015_p9, %p3014_p7 }
  0x44   : > { %p3010_p5 = pneg %p3009_p2 }
  0x46   : > { %p3017_p11 = pnand %p3016_p10, %p3010_p5 }
  0x48   : > { %3020 = shalt.err (!%p3017_p11)
}
  0x49   : > { %2828 = dma.hbm_to_vmem [thread:$0]  (!%p3377_p6), %s4356_s4, 16, %s3373_s27, [#allocation9]  }
  0x4a   : > { %s3021_s26 = scalar_lea.hbm %s4361_s9, 16 }
  0x4b   : > { %p3022_p12 = scmp.ne.s32.totalorder %s4361_s9, %s3021_s26  ;;  %p3028_p0 = scmp.lt.u32.totalorder %s3021_s26, %s4361_s9 }
  0x4d   : > { %p3024_p4 = pnand %p3022_p12, %p3393_p8 }
  0x4f   : > { %p3025_p13 = pneg %p3024_p4 }
  0x51   : > { %p3030_p2 = pnand %p3028_p0, %p3025_p13 }
  0x53   : > { %3033 = shalt.err (!%p3030_p2)
}
  0x54   : > { %s3034_s27 = scalar_lea.vmem %s3381_s29, 16  ;;  %s3041_s8 = scalar_lea.vmem %s3381_s29, 32 }
  0x55   : > { %p3035_p5 = scmp.ne.s32.totalorder %s3381_s29, %s3034_s27  ;;  %p3042_p10 = scmp.lt.s32.totalorder %s3381_s29, %s3381_s29 }
  0x56   : > { %p3043_p11 = scmp.lt.s32.totalorder %s3041_s8, %s3034_s27 }
  0x57   : > { %p3037_p7 = pnand %p3035_p5, %p3393_p8 }
  0x58   : > { %p3044_p12 = por %p3043_p11, %p3042_p10 }
  0x59   : > { %p3038_p9 = pneg %p3037_p7 }
  0x5b   : > { %p3045_p4 = pnand %p3044_p12, %p3038_p9 }
  0x5d   : > { %3048 = shalt.err (!%p3045_p4)
}
  0x5e   : > { %2834 = dma.hbm_to_vmem [thread:$0]  (!%p3377_p6), %s4361_s9, 16, %s3381_s29, [#allocation12]  }
  0x5f   : > { %s3247_s13 = smov [#allocation10]   ;;  %s3049_s14 = scalar_lea.hbm %s4355_s3, 16 }
  0x60   : > { %s440_s22 = sshll.u32 %s3247_s13, 4  ;;  %p3050_p13 = scmp.ne.s32.totalorder %s4355_s3, %s3049_s14  ;;  %s441_s22 = int_to_ptr.vmem [resolvable:$true] %s440_s22 }
  0x61   : > { %p3056_p5 = scmp.lt.u32.totalorder %s3049_s14, %s4355_s3 }
  0x62   : > { %p3052_p0 = pnand %p3050_p13, %p3393_p8 }
  0x64   : > { %p3053_p2 = pneg %p3052_p0 }
  0x66   : > { %p3058_p7 = pnand %p3056_p5, %p3053_p2 }
  0x68   : > { %3061 = shalt.err (!%p3058_p7)
}
  0x69   : > { %s3062_s29 = scalar_lea.vmem %s413_s17, 16  ;;  %s3069_s12 = scalar_lea.vmem %s413_s17, 32 }
  0x6a   : > { %p3063_p9 = scmp.ne.s32.totalorder %s413_s17, %s3062_s29  ;;  %p3070_p12 = scmp.lt.s32.totalorder %s413_s17, %s413_s17 }
  0x6b   : > { %p3071_p4 = scmp.lt.s32.totalorder %s3069_s12, %s3062_s29 }
  0x6c   : > { %p3065_p10 = pnand %p3063_p9, %p3393_p8 }
  0x6d   : > { %p3072_p1 = por %p3071_p4, %p3070_p12 }
  0x6e   : > { %p3066_p11 = pneg %p3065_p10 }
  0x70   : > { %p3073_p3 = pnand %p3072_p1, %p3066_p11 }
  0x72   : > { %3076 = shalt.err (!%p3073_p3)
}
  0x73   : > { %2825 = dma.hbm_to_vmem [thread:$0]  (!%p3377_p6), %s4355_s3, 16, %s413_s17, [#allocation6]  }
  0x74   : > { %s3077_s14 = scalar_lea.hbm %s4359_s7, 16 }
  0x75   : > { %p3078_p13 = scmp.ne.s32.totalorder %s4359_s7, %s3077_s14  ;;  %p3084_p3 = scmp.lt.u32.totalorder %s3077_s14, %s4359_s7 }
  0x77   : > { %p3080_p0 = pnand %p3078_p13, %p3393_p8 }
  0x79   : > { %p3081_p1 = pneg %p3080_p0 }
  0x7b   : > { %p3086_p2 = pnand %p3084_p3, %p3081_p1 }
  0x7d   : > { %3089 = shalt.err (!%p3086_p2)
}
  0x7e   : > { %s3090_s29 = scalar_lea.vmem %s441_s22, 16  ;;  %s3097_s17 = scalar_lea.vmem %s441_s22, 32 }
  0x7f   : > { %p3091_p5 = scmp.ne.s32.totalorder %s441_s22, %s3090_s29  ;;  %p3098_p10 = scmp.lt.s32.totalorder %s441_s22, %s441_s22 }
  0x80   : > { %p3099_p11 = scmp.lt.s32.totalorder %s3097_s17, %s3090_s29 }
  0x81   : > { %p3093_p7 = pnand %p3091_p5, %p3393_p8 }
  0x82   : > { %p3100_p12 = por %p3099_p11, %p3098_p10 }
  0x83   : > { %p3094_p9 = pneg %p3093_p7 }
  0x85   : > { %p3101_p4 = pnand %p3100_p12, %p3094_p9 }
  0x87   : > { %3104 = shalt.err (!%p3101_p4)
}
  0x88   : > { %2831 = dma.hbm_to_vmem [thread:$0]  (!%p3377_p6), %s4359_s7, 16, %s441_s22, [#allocation9]  }
  0x89   : > { %s3248_s13 = smov [#allocation13]   ;;  %s3105_s15 = scalar_lea.hbm %s4362_s10, 256 }
  0x8a   : > { %s464_s26 = sshll.u32 %s3248_s13, 4  ;;  %p3106_p13 = scmp.ne.s32.totalorder %s4362_s10, %s3105_s15  ;;  %s465_s26 = int_to_ptr.vmem [resolvable:$true] %s464_s26 }
  0x8b   : > { %p3112_p3 = scmp.lt.u32.totalorder %s3105_s15, %s4362_s10 }
  0x8c   : > { %p3108_p0 = pnand %p3106_p13, %p3393_p8 }
  0x8e   : > { %p3109_p1 = pneg %p3108_p0 }
  0x90   : > { %p3114_p2 = pnand %p3112_p3, %p3109_p1 }
  0x92   : > { %3117 = shalt.err (!%p3114_p2)
}
  0x93   : > { %s3118_s22 = scalar_lea.vmem %s465_s26, 256  ;;  %p3126_p10 = scmp.lt.s32.totalorder %s465_s26, %s465_s26 }
  0x94   : > { %p3119_p5 = scmp.ne.s32.totalorder %s465_s26, %s3118_s22  ;;  %p3127_p11 = scmp.lt.s32.totalorder %s3118_s22, %s3118_s22 }
  0x96   : > { %p3121_p7 = pnand %p3119_p5, %p3393_p8  ;;  %p3128_p12 = por %p3127_p11, %p3126_p10 }
  0x98   : > { %p3122_p9 = pneg %p3121_p7 }
  0x9a   : > { %p3129_p4 = pnand %p3128_p12, %p3122_p9 }
  0x9c   : > { %3132 = shalt.err (!%p3129_p4)
}
  0x9d   : > { %s3249_s17 = smov 64   ;;  %s3250_s28 = smov 4  }
  0x9e   : > { %2837 = dma.hbm_to_vmem [thread:$0]  (!%p3377_p6), %s4362_s10, 256, %s465_s26, [#allocation12], %s3249_s17, %s3249_s17, %s3250_s28  }
  0x9f   : > { %s2552_s13 = sadd.s32 4294967294, %s3241_s21   ;;  %s3520_s16 = sadd.s32 1, %s3241_s21  }
  0xa0   : > { %s38_s14 = ssub.s32 %s3241_s21, %s3520_s16  ;;  %s41_s15 = sadd.s32 1, %s3237_s20 }
  0xa1   : > { %p39_p8 = scmp.eq.s32.totalorder %s38_s14, 0  ;;  %p48_p13 = scmp.ne.s32.totalorder %s3237_s20, %s3233_s19 }
  0xa2   : > { %p49_p0 = scmp.eq.s32.totalorder %s3241_s21, 0  ;;  %p54_p1 = scmp.ne.s32.totalorder %s3233_s19, %s3229_s18 }
  0xa3   : > { %s3531_s23 = scalar_select %p39_p8, %s3237_s20, %s41_s15  }
  0xa4   : > { %p3533_p3 = por %p49_p0, %p48_p13  ;;  %p4391_p2 = scmp.eq.s32.totalorder %s3359_s24, 0 }
  0xa5   : > { %p372_p5 = scmp.eq.s32.totalorder %s3359_s24, 1  ;;  %p378_p7 = scmp.eq.s32.totalorder %s2552_s13, 1 }
  0xa6   : > { %p3539_p6 = por %p4391_p2, %p54_p1  ;;  %p2852_p9 = scmp.lt.s32.totalorder %s3241_s21, 2 }
  0xa7   : > { %s490_s27 = sand.u32 1, %s3237_s20   ;;  %p3546_p10 = por %p372_p5, %p48_p13 }
  0xa8   : > { %p3550_p11 = por %p378_p7, %p54_p1  ;;  %s2561_s22 = sshll.u32 %s490_s27, 7 }
  0xa9   : > { %s4393_s8 = scalar_select %p3546_p10, 1, 0 }
  0xaa   : > { %s4394_s29 = scalar_select %p3550_p11, 1, 0 }
  0xab   : > { %s2631_s17 = sshll.u32 %s3241_s21, 11  ;;  %s4395_s0 = sld [smem:[#allocation20_spill]] }
  0xac   : > { %s494_s13 = scalar_lea.vmem [#allocation2], %s2561_s22  ;;  %p3564_p12 = pnand %p2852_p9, %p3533_p3 }
  0xad   : > { %s502_s14 = sshll.u32 %s494_s13, 4  ;;  %s3568_s2 = scalar_lea.sflag [#allocation3], %s490_s27  ;;  %s3560_s14 = int_to_ptr.vmem [resolvable:$true] %s502_s14 }
  0xae   : > { %p3135_p8 = pneg %p3564_p12 }
  0xb1   : > { %s3558_s11 = scalar_lea.hbm %s4395_s0, %s2631_s17  ;;  %s3138_s30 = scalar_lea.hbm %s4395_s0, 4096 }
  0xb2   : > { %s3133_s28 = scalar_lea.hbm %s3558_s11, 2048  ;;  %p3139_p1 = scmp.lt.u32.totalorder %s3558_s11, %s4395_s0 }
  0xb3   : > { %p3134_p4 = scmp.ne.s32.totalorder %s3558_s11, %s3133_s28  ;;  %p3140_p3 = scmp.lt.u32.totalorder %s3138_s30, %s3133_s28 }
  0xb4   : > { %p3142_p5 = scmp.lt.u32.totalorder %s3133_s28, %s3558_s11 }
  0xb5   : > { %p3136_p13 = pnand %p3135_p8, %p3134_p4  ;;  %p3141_p2 = por %p3140_p3, %p3139_p1 }
  0xb7   : > { %p3137_p0 = pneg %p3136_p13  ;;  %p3143_p7 = por %p3142_p5, %p3141_p2 }
  0xb9   : > { %p3144_p9 = pnand %p3143_p7, %p3137_p0 }
  0xbb   : > { %3147 = shalt.err (!%p3144_p9)
}
  0xbc   : > { %s3148_s27 = scalar_lea.vmem %s3560_s14, 2048  ;;  %s3251_s22 = smov [#allocation2]  }
  0xbd   : > { %p3149_p4 = scmp.ne.s32.totalorder %s3560_s14, %s3148_s27  ;;  %s3153_s17 = sshll.u32 %s3251_s22, 4  ;;  %s3154_s17 = int_to_ptr.vmem [resolvable:$false] %s3153_s17 }
  0xbe   : > { %s3155_s12 = scalar_lea.vmem %s3154_s17, 4096  ;;  %p3156_p10 = scmp.lt.s32.totalorder %s3560_s14, %s3154_s17 }
  0xbf   : > { %p3151_p13 = pnand %p3149_p4, %p3135_p8  ;;  %p3157_p1 = scmp.lt.s32.totalorder %s3155_s12, %s3148_s27 }
  0xc1   : > { %p3152_p11 = pneg %p3151_p13  ;;  %p3158_p3 = por %p3157_p1, %p3156_p10 }
  0xc3   : > { %p3159_p2 = pnand %p3158_p3, %p3152_p11 }
  0xc5   : > { %3162 = shalt.err (!%p3159_p2)
}
  0xc6   : > { %s3252_s28 = smov 128   ;;  %s3253_s30 = smov 8  }
  0xc7   : > { %2841 = dma.hbm_to_vmem [thread:$0]  (!%p3564_p12), %s3558_s11, 2048, %s3560_s14, %s3568_s2, %s3252_s28, %s3252_s28, %s3253_s30  }
  0xc8   : > { %p4397_p8 = scmp.ne.s32.totalorder %s4386_s25, 0 }
  0xc9   : > { %s3599_s13 = sand.u32 (!%p4397_p8), 1, %s3233_s19  }
  0xca   : > { %514 = sbr.rel (%p4397_p8) target bundleno = 1298 (0x512), region = 80  ;;  %s2566_s27 = sshll.u32 (!%p4397_p8), %s3599_s13, 7 }
  0xcb   : > { %s517_s22 = scalar_lea.sflag (!%p4397_p8), [#allocation3], %s3599_s13  ;;  %s3603_s17 = scalar_lea.vmem (!%p4397_p8), [#allocation2], %s2566_s27 }
  0xd1   : > { %3208 = dma.done.wait (%p3539_p6), %s517_s22, 2048  }
  0xd2   : > { %3210 = vsyncadd (%p3539_p6), %s517_s22, 4294965248  ;;  %p4398_p10 = scmp.eq.s32.totalorder %s3359_s24, 0 }
  0xd4   : > { %3212 = dma.done.wait (%p4398_p10), [#allocation6], 32   ;;  %p4399_p11 = pmov %p4398_p10 }
  0xd5   : > { %p4400_p12 = pmov %p4398_p10 }
  0xd6   : > { %3214 = vsyncadd (%p4399_p11), [#allocation6], 4294967264 }
  0xd7   : > { %3216 = dma.done.wait (%p4400_p12), [#allocation9], 32   ;;  %p4401_p0 = pmov %p4398_p10 }
  0xd9   : > { %3218 = vsyncadd (%p4401_p0), [#allocation9], 4294967264  ;;  %p4402_p5 = pmov %p4401_p0 }
  0xda   : > { %p4403_p7 = pmov %p4401_p0 }
  0xdb   : > { %3220 = dma.done.wait (%p4402_p5), [#allocation12], 272  }
  0xdc   : > { %3222 = vsyncadd (%p4403_p7), [#allocation12], 4294967024  ;;  %v4375_v0 = vmov 0.0   ;;  %vm3255_vm0 = vmmov 0   ;;  %v2905_v1 = vld [vmem:[%s4358_s6] sm:$0xff]   ;;  %vm635_vm1 = vcmask 261120  }
  0xdd   : > { %2682 = vmatprep.subr.bf16.mxu0 %v4375_v0  ;;  %2686 = vmatprep.mubr.msk.bf16.mxu0 %vm3255_vm0, %v4375_v0  ;;  %v2906_v2 = vld [vmem:[%s4358_s6 + $0x8] sm:$0xff]   ;;  %v593_v3 = vld [vmem:[%s3603_s17] sm:$0xff]  ;;  %s4404_s1 = sld [smem:[#allocation21_spill]]  ;;  %v595_v10 = vld [vmem:[%s3603_s17 + $0x10] sm:$0xff]  ;;  %s4405_s11 = sld [smem:[#allocation23_spill]]  ;;  %vm751_vm2 = vcmask 1041409  }
  0xde   : > { %2690 = vmatprep.subr.bf16.mxu1 %v2905_v1  ;;  %v594_v4 = vld [vmem:[%s3603_s17 + $0x8] sm:$0xff]  ;;  %v636_v8 = vsel %vm635_vm1, %v593_v3, 0.0  ;;  %v596_v11 = vld [vmem:[%s3603_s17 + $0x18] sm:$0xff]  ;;  %v597_v16 = vld [vmem:[%s3603_s17 + $0x20] sm:$0xff]  ;;  %v645_v18 = vsel %vm635_vm1, %v595_v10, 0.0  ;;  %vm753_vm3 = vcmask 1042434  }
  0xdf   : > { %2691 = vmatpush3.bf16.msra.mxu1 %v2905_v1  ;;  %v637_v9 = vsel %vm635_vm1, %v594_v4, 0.0  ;;  %v598_v17 = vld [vmem:[%s3603_s17 + $0x28] sm:$0xff]  ;;  %v646_v19 = vsel %vm635_vm1, %v596_v11, 0.0  ;;  %v2907_v22 = vld [vmem:[%s4357_s5] sm:$0xff]   ;;  %v599_v27 = vld [vmem:[%s3603_s17 + $0x30] sm:$0xff]  ;;  %v654_v30 = vsel %vm635_vm1, %v597_v16, 0.0 }
  0xe0   : > { %2692 = vmatprep.subr.bf16.mxu1 %v2906_v2  ;;  %v638_v13 = vadd.f32 %v637_v9, %v636_v8  ;;  %v647_v26 = vadd.f32 %v646_v19, %v645_v18  ;;  %v600_v28 = vld [vmem:[%s3603_s17 + $0x38] sm:$0xff]  ;;  %v655_v31 = vsel %vm635_vm1, %v598_v17, 0.0  ;;  %2683 = vmatpush3.bf16.msra.mxu0 %v2907_v22  ;;  %v601_v33 = vld [vmem:[%s3603_s17 + $0x40] sm:$0xff]  ;;  %v602_v38 = vld [vmem:[%s3603_s17 + $0x48] sm:$0xff]  ;;  %v663_v40 = vsel %vm635_vm1, %v599_v27, 0.0  ;;  %s4406_s28 = sld [smem:[#allocation25_spill]] }
  0xe1   : > { %v656_v36 = vadd.f32 %v655_v31, %v654_v30  ;;  %2684 = vmatprep.subr.bf16.mxu0 %v4375_v0  ;;  %v2908_v39 = vld [vmem:[%s4357_s5 + $0x8] sm:$0xff]   ;;  %v664_v41 = vsel %vm635_vm1, %v600_v28, 0.0  ;;  %v603_v44 = vld [vmem:[%s3603_s17 + $0x50] sm:$0xff]  ;;  %v604_v49 = vld [vmem:[%s3603_s17 + $0x58] sm:$0xff]  ;;  %v672_v52 = vsel %vm635_vm1, %v601_v33, 0.0  ;;  %v673_v53 = vsel %vm635_vm1, %v602_v38, 0.0 }
  0xe2   : > { %v639_v24 = vrot.slane %v638_v13, 4  ;;  %v648_v35 = vrot.slane %v647_v26, 4  ;;  %v665_v50 = vadd.f32 %v664_v41, %v663_v40  ;;  %v605_v54 = vld [vmem:[%s3603_s17 + $0x60] sm:$0xff]  ;;  %v674_v59 = vadd.f32 %v673_v53, %v672_v52  ;;  %v3702_v60 = vld [vmem:[%s3603_s17 + $0x68] sm:$0xff]  ;;  %v3709_v8 = vld [vmem:[%s3603_s17 + $0x70] sm:$0xff]  ;;  %s4407_s25 = sld [smem:[#allocation26_spill]] }
  0xe3   : > { %v3635_v5 = vld [vmem:[%s4404_s1] sm:$0xff]  ;;  %v3640_v6 = vld [vmem:[%s4404_s1 + $0x8] sm:$0xff]  ;;  %2693 = vmatpush3.bf16.msra.mxu1 %v2906_v2  ;;  %v657_v47 = vrot.slane %v656_v36, 4  ;;  %v681_v1 = vsel %vm635_vm1, %v603_v44, 0.0  ;;  %vm755_vm4 = vcmask 1043459   ;;  %vm757_vm5 = vcmask 1044484  }
  0xe4   : > { %v611_v7 = vadd.f32 %v3635_v5, %v593_v3  ;;  %v612_v12 = vadd.f32 %v3640_v6, %v594_v4  ;;  %v613_v14 = vadd.f32 %v3635_v5, %v595_v10  ;;  %v614_v15 = vadd.f32 %v3640_v6, %v596_v11  ;;  %2685 = vmatpush3.bf16.msra.mxu0 %v2908_v39  ;;  %v3699_v55 = vld [vmem:[%s4405_s11] sm:$0xff]   ;;  %s4408_s14 = sld [smem:[#allocation27_spill]]  ;;  %s2573_s30 = sshll.u32 %s3599_s13, 3 }
  0xe5   : > { %v615_v20 = vadd.f32 %v3635_v5, %v597_v16  ;;  %v616_v21 = vadd.f32 %v3640_v6, %v598_v17  ;;  %v617_v32 = vadd.f32 %v3635_v5, %v599_v27  ;;  %v640_v34 = vadd.f32 %v639_v24, %v638_v13  ;;  %2710 = vmatprep.subr.bf16.mxu0 %v3699_v55  ;;  %v608_v17 = vld [vmem:[%s3603_s17 + $0x78] sm:$0xff]  ;;  %s4411_s2 = sld [smem:[#allocation24_spill]]  ;;  %s590_s26 = scalar_lea.vmem [#allocation14], %s2573_s30 }
  0xe6   : > { %v3659_v23 = vpack.c.bf16 %v612_v12, %v611_v7  ;;  %v3661_v25 = vpack.c.bf16 %v614_v15, %v613_v14  ;;  %v618_v37 = vadd.f32 %v3640_v6, %v600_v28  ;;  %v619_v42 = vadd.f32 %v3635_v5, %v601_v33  ;;  %s2425_s17 = sshll.u32 %s590_s26, 4  ;;  %s4412_s0 = sld [smem:[#allocation28_spill]]  ;;  %s4310_s17 = int_to_ptr.vmem [resolvable:$true] %s2425_s17 }
  0xe7   : > { %v3665_v29 = vpack.c.bf16 %v616_v21, %v615_v20  ;;  %v620_v43 = vadd.f32 %v3640_v6, %v602_v38  ;;  %v641_v45 = vrot.slane %v640_v34, 2  ;;  %v649_v46 = vadd.f32 %v648_v35, %v647_v26  ;;  %s2412_s27 = scalar_lea.sflag [#allocation4], %s3599_s13  ;;  %p4413_p9 = scmp.ne.s32.totalorder %s4393_s8, 0 }
  0xe8   : > { %2694 = vmatprep.mubr.msk.bf16.mxu1 %vm635_vm1, %v3659_v23  ;;  %v3686_v48 = vpack.c.bf16 %v618_v37, %v617_v32  ;;  %v658_v58 = vadd.f32 %v657_v47, %v656_v36  ;;  %v666_v61 = vrot.slane %v665_v50, 4  ;;  %v621_v62 = vadd.f32 %v3635_v5, %v603_v44  ;;  %s3257_s30 = smov [#allocation14]  }
  0xe9   : > { %2695 = vmatmul.mubr.msk.bf16.vlgmr.msra.gmra.mrb[0].mxu1 %vm635_vm1, %v3661_v25  ;;  %v3691_v51 = vpack.c.bf16 %v620_v43, %v619_v42  ;;  %v642_v56 = vadd.f32 %v641_v45, %v640_v34  ;;  %v650_v57 = vrot.slane %v649_v46, 2  ;;  %v622_v63 = vadd.f32 %v3640_v6, %v604_v49  ;;  %s3167_s22 = sshll.u32 %s3257_s30, 4  ;;  %s3168_s22 = int_to_ptr.vmem [resolvable:$false] %s3167_s22 }
  0xea   : > { %2698 = vmatprep.mubr.msk.bf16.mxu1 %vm635_vm1, %v3665_v29  ;;  %v659_v4 = vrot.slane %v658_v58, 2  ;;  %v675_v7 = vrot.slane %v674_v59, 4  ;;  %v667_v9 = vadd.f32 %v666_v61, %v665_v50  ;;  %v682_v11 = vsel %vm635_vm1, %v604_v49, 0.0  ;;  %p3170_p1 = scmp.lt.s32.totalorder %s4310_s17, %s3168_s22 }
  0xeb   : > { %v643_v2 = vrot.slane %v642_v56, 1  ;;  %v651_v3 = vadd.f32 %v650_v57, %v649_v46  ;;  %v3711_v10 = vpack.c.bf16 %v622_v63, %v621_v62  ;;  %v690_v12 = vsel %vm635_vm1, %v605_v54, 0.0 }
  0xec   : > { %v660_v15 = vadd.f32 %v659_v4, %v658_v58  ;;  %v676_v16 = vadd.f32 %v675_v7, %v674_v59  ;;  %v668_v18 = vrot.slane %v667_v9, 2  ;;  %v683_v19 = vadd.f32 %v682_v11, %v681_v1 }
  0xed   : > { %v644_v13 = vadd.f32 %v643_v2, %v642_v56  ;;  %v652_v14 = vrot.slane %v651_v3, 1  ;;  %v691_v20 = vsel %vm635_vm1, %v3702_v60, 0.0  ;;  %v699_v21 = vsel %vm635_vm1, %v3709_v8, 0.0 }
  0xee   : > { %v661_v26 = vrot.slane %v660_v15, 1  ;;  %v677_v27 = vrot.slane %v676_v16, 2  ;;  %v669_v28 = vadd.f32 %v668_v18, %v667_v9  ;;  %v684_v30 = vrot.slane %v683_v19, 4 }
  0xef   : > { %v708_v22 = vmul.f32 0.0625, %v644_v13  ;;  %v653_v24 = vadd.f32 %v652_v14, %v651_v3  ;;  %v692_v31 = vadd.f32 %v691_v20, %v690_v12  ;;  %v700_v32 = vsel %vm635_vm1, %v608_v17, 0.0 }
  0xf0   : > { %v662_v35 = vadd.f32 %v661_v26, %v660_v15  ;;  %v678_v36 = vadd.f32 %v677_v27, %v676_v16  ;;  %v670_v37 = vrot.slane %v669_v28, 1  ;;  %v685_v38 = vadd.f32 %v684_v30, %v683_v19 }
  0xf1   : > { %2699 = vmatmul.mubr.msk.bf16.gmra.mrb[4].mxu1 %vm635_vm1, %v3686_v48  ;;  %v716_v33 = vpack.c.bf16 %v708_v22, %v708_v22  ;;  %v709_v34 = vmul.f32 0.0625, %v653_v24  ;;  %v693_v39 = vrot.slane %v692_v31, 4  ;;  %v701_v40 = vadd.f32 %v700_v32, %v699_v21 }
  0xf2   : > { %2702 = vmatprep.mubr.msk.bf16.mxu1 %vm635_vm1, %v3691_v51  ;;  %v710_v43 = vmul.f32 0.0625, %v662_v35  ;;  %v679_v44 = vrot.slane %v678_v36, 1  ;;  %v671_v45 = vadd.f32 %v670_v37, %v669_v28  ;;  %v686_v46 = vrot.slane %v685_v38, 2 }
  0xf3   : > { %v743_v41 = vunpack.c.l.b16 %v716_v33  ;;  %v717_v42 = vpack.c.bf16 %v709_v34, %v709_v34  ;;  %v694_v47 = vadd.f32 %v693_v39, %v692_v31  ;;  %v702_v49 = vrot.slane %v701_v40, 4 }
  0xf4   : > { %v718_v52 = vpack.c.bf16 %v710_v43, %v710_v43  ;;  %v680_v53 = vadd.f32 %v679_v44, %v678_v36  ;;  %v623_v56 = vadd.f32 %v3635_v5, %v605_v54  ;;  %v711_v57 = vmul.f32 0.0625, %v671_v45 }
  0xf5   : > { %v744_v50 = vunpack.c.l.b16 %v717_v42  ;;  %v687_v58 = vadd.f32 %v686_v46, %v685_v38  ;;  %v695_v59 = vrot.slane %v694_v47, 2  ;;  %v703_v61 = vadd.f32 %v702_v49, %v701_v40  ;;  %v2910_v38 = vld [vmem:[%s4405_s11 + $0x8] sm:$0xff]  }
  0xf6   : > { %v745_v62 = vunpack.c.l.b16 %v718_v52  ;;  %v712_v63 = vmul.f32 0.0625, %v680_v53  ;;  %v624_v2 = vadd.f32 %v3640_v6, %v3702_v60  ;;  %v719_v3 = vpack.c.bf16 %v711_v57, %v711_v57 }
  0xf7   : > { %v752_v1 = vsel %vm751_vm2, %v744_v50, %v743_v41  ;;  %v688_v4 = vrot.slane %v687_v58, 1  ;;  %v696_v7 = vadd.f32 %v695_v59, %v694_v47  ;;  %v704_v9 = vrot.slane %v703_v61, 2 }
  0xf8   : > { %v720_v11 = vpack.c.bf16 %v712_v63, %v712_v63  ;;  %v754_v54 = vsel %vm753_vm3, %v745_v62, %v752_v1  ;;  %v633_v12 = vpack.c.bf16 %v624_v2, %v623_v56  ;;  %v625_v13 = vadd.f32 %v3635_v5, %v3709_v8 }
  0xf9   : > { %2703 = vmatmul.mubr.msk.bf16.gmra.mrb[8].mxu1 %vm635_vm1, %v3711_v10  ;;  %v746_v14 = vunpack.c.l.b16 %v719_v3  ;;  %v689_v15 = vadd.f32 %v688_v4, %v687_v58  ;;  %v697_v16 = vrot.slane %v696_v7, 1  ;;  %v705_v18 = vadd.f32 %v704_v9, %v703_v61 }
  0xfa   : > { %v747_v19 = vunpack.c.l.b16 %v720_v11  ;;  %2706 = vmatprep.mubr.msk.bf16.mxu1 %vm635_vm1, %v633_v12  ;;  %v626_v60 = vadd.f32 %v3640_v6, %v608_v17  ;;  %vm759_vm6 = vcmask 1045509   ;;  %vm761_vm7 = vcmask 1046534  }
  0xfb   : > { %v698_v20 = vadd.f32 %v697_v16, %v696_v7  ;;  %v706_v21 = vrot.slane %v705_v18, 1  ;;  %v713_v22 = vmul.f32 0.0625, %v689_v15  ;;  %v756_v24 = vsel %vm755_vm4, %v746_v14, %v754_v54 }
  0xfc   : > { %v634_v26 = vpack.c.bf16 %v626_v60, %v625_v13  ;;  %v758_v5 = vsel %vm757_vm5, %v747_v19, %v756_v24  ;;  %vm763_vm8 = vcmask 1047559   ;;  %vm2024_vm9 = vcmask 1041408  }
  0xfd   : > { %v707_v27 = vadd.f32 %v706_v21, %v705_v18  ;;  %v714_v28 = vmul.f32 0.0625, %v698_v20  ;;  %v721_v30 = vpack.c.bf16 %v713_v22, %v713_v22  ;;  %vm1612_vm10 = vcmask 31744  }
  0xff   : > { %v715_v8 = vmul.f32 0.0625, %v707_v27  ;;  %v722_v31 = vpack.c.bf16 %v714_v28, %v714_v28  ;;  %v748_v32 = vunpack.c.l.b16 %v721_v30  ;;  %v3820_v30 = vld [vmem:[#allocation7] ss:$0 sm:$0xff] }
 0x101   : > { %2707 = vmatmul.mubr.msk.bf16.gmra.mrb[12].mxu1 %vm635_vm1, %v634_v26  ;;  %v723_v33 = vpack.c.bf16 %v715_v8, %v715_v8  ;;  %v749_v6 = vunpack.c.l.b16 %v722_v31  ;;  %v760_v17 = vsel %vm759_vm6, %v748_v32, %v758_v5 }
 0x103   : > { %v750_v34 = vunpack.c.l.b16 %v723_v33  ;;  %v762_v35 = vsel %vm761_vm7, %v749_v6, %v760_v17 }
 0x105   : > { %v764_v36 = vsel %vm763_vm8, %v750_v34, %v762_v35 }
 0x106   : > { %v765_v37 = vpack.c.b16 %v764_v36, %v764_v36 }
 0x108   : > { %2687 = vmatmul.mubr.msk.bf16.vlgmr.msra.gmra.mrb[0].mxu0 %vm635_vm1, %v765_v37 }
 0x109   : > { %2711 = vmatpush3.bf16.msra.mxu0 %v3699_v55  ;;  %2714 = vmatprep.mubr.msk.bf16.mxu0 %vm635_vm1, %v3659_v23  ;;  %v2911_v23 = vld [vmem:[%s4406_s28] sm:$0xff]  }
 0x10a   : > { %2712 = vmatprep.subr.bf16.mxu0 %v2910_v38  ;;  %2730 = vmatprep.subr.bf16.mxu1 %v2911_v23 }
 0x10b   : > { %2731 = vmatpush3.bf16.msra.mxu1 %v2911_v23 }
 0x10d   : > { %2713 = vmatpush3.bf16.msra.mxu0 %v2910_v38 }
 0x10e   : > { %2750 = vmatprep.subr.bf16.mxu0 %v4375_v0 }
 0x110   : > { %2715 = vmatmul.mubr.msk.bf16.vlgmr.msra.gmra.mrb[4].mxu0 %vm635_vm1, %v3661_v25  ;;  %v2912_v25 = vld [vmem:[%s4406_s28 + $0x8] sm:$0xff]  }
 0x111   : > { %2718 = vmatprep.mubr.msk.bf16.mxu0 %vm635_vm1, %v3665_v29  ;;  %2751 = vmatpush3.bf16.msra.mxu0 %v2911_v23  ;;  %v3772_v29 = vld [vmem:[#allocation10] ss:$0 sm:$0xff]  ;;  %v3256_v23 = vmov 1966171168  }
 0x112   : > { %2752 = vmatprep.subr.bf16.mxu0 %v4375_v0  ;;  %2732 = vmatprep.subr.bf16.mxu1 %v2912_v25 }
 0x113   : > { %2733 = vmatpush3.bf16.msra.mxu1 %v2912_v25 }
 0x114   : > { %2776 = vmatprep.subr.bf16.mxu1 %v4375_v0 }
 0x115   : > { %2753 = vmatpush3.bf16.msra.mxu0 %v2912_v25  ;;  %v1282_v25 = vunpack.c.l.s4 %v3256_v23 }
 0x118   : > { %2719 = vmatmul.mubr.msk.bf16.gmra.mrb[8].mxu0 %vm635_vm1, %v3686_v48 }
 0x119   : > { %2722 = vmatprep.mubr.msk.bf16.mxu0 %vm635_vm1, %v3691_v51 }
 0x120   : > { %2723 = vmatmul.mubr.msk.bf16.gmra.mrb[12].mxu0 %vm635_vm1, %v3711_v10 }
 0x121   : > { %2726 = vmatprep.mubr.msk.bf16.mxu0 %vm635_vm1, %v633_v12 }
 0x128   : > { %2727 = vmatmul.mubr.msk.bf16.gmra.mrb[16].mxu0 %vm635_vm1, %v634_v26 }
 0x129   : > { %2754 = vmatprep.mubr.msk.bf16.mxu0 %vm3255_vm0, %v4375_v0 }
 0x1bc   : > { %v2696_v48 = vpop.f32.mrb[0].mxu1 }
 0x1bd   : > { %v3775_v51 = vadd.f32 %v2696_v48, %v3772_v29  ;;  %v902_v55 = vpop.f32.mrb[1].mxu1 }
 0x1be   : > { %v3778_v10 = vadd.f32 %v3772_v29, %v902_v55  ;;  %v2697_v39 = vpop.f32.mrb[2].mxu1 }
 0x1bf   : > { %v1094_v40 = vsel %vm635_vm1, %v3775_v51, 0.0  ;;  %v3783_v41 = vadd.f32 %v2697_v39, %v3772_v29  ;;  %v905_v42 = vpop.f32.mrb[3].mxu1 }
 0x1c0   : > { %v1085_v43 = vsel %vm635_vm1, %v3778_v10, 0.0  ;;  %v3788_v44 = vadd.f32 %v3772_v29, %v905_v42 }
 0x1c1   : > { %v1095_v45 = vsel %vm635_vm1, %v3783_v41, 0.0 }
 0x1c2   : > { %v1096_v46 = vadd.f32 %v1095_v45, %v1094_v40  ;;  %v1086_v47 = vsel %vm635_vm1, %v3788_v44, 0.0 }
 0x1c3   : > { %v1087_v49 = vadd.f32 %v1086_v47, %v1085_v43 }
 0x1c4   : > { %v1097_v50 = vrot.slane %v1096_v46, 4  ;;  %v2700_v52 = vpop.f32.mrb[4].mxu1 }
 0x1c5   : > { %v1088_v53 = vrot.slane %v1087_v49, 4  ;;  %v3795_v56 = vadd.f32 %v2700_v52, %v3772_v29  ;;  %v918_v57 = vpop.f32.mrb[5].mxu1 }
 0x1c6   : > { %v1098_v58 = vadd.f32 %v1097_v50, %v1096_v46  ;;  %v3798_v59 = vadd.f32 %v3772_v29, %v918_v57  ;;  %v2701_v61 = vpop.f32.mrb[6].mxu1  ;;  %v1284_v50 = vlaneseq }
 0x1c7   : > { %v1089_v62 = vadd.f32 %v1088_v53, %v1087_v49  ;;  %v1112_v63 = vsel %vm635_vm1, %v3795_v56, 0.0  ;;  %v3803_v1 = vadd.f32 %v2701_v61, %v3772_v29  ;;  %v921_v2 = vpop.f32.mrb[7].mxu1 }
 0x1c8   : > { %v1099_v3 = vrot.slane %v1098_v58, 2  ;;  %v1103_v4 = vsel %vm635_vm1, %v3798_v59, 0.0  ;;  %v3808_v7 = vadd.f32 %v3772_v29, %v921_v2 }
 0x1c9   : > { %v1090_v9 = vrot.slane %v1089_v62, 2  ;;  %v1113_v11 = vsel %vm635_vm1, %v3803_v1, 0.0 }
 0x1ca   : > { %v1100_v54 = vadd.f32 %v1099_v3, %v1098_v58  ;;  %v1114_v12 = vadd.f32 %v1113_v11, %v1112_v63  ;;  %v1104_v13 = vsel %vm635_vm1, %v3808_v7, 0.0  ;;  %v1283_v58 = vunpack.c.0.s8 %v1282_v25 }
 0x1cb   : > { %v1091_v14 = vadd.f32 %v1090_v9, %v1089_v62  ;;  %v1105_v15 = vadd.f32 %v1104_v13, %v1103_v4 }
 0x1cc   : > { %v1101_v16 = vrot.slane %v1100_v54, 1  ;;  %v1115_v18 = vrot.slane %v1114_v12, 4  ;;  %v2704_v19 = vpop.f32.mrb[8].mxu1 }
 0x1cd   : > { %v1092_v60 = vrot.slane %v1091_v14, 1  ;;  %v1106_v20 = vrot.slane %v1105_v15, 4  ;;  %v3815_v21 = vadd.f32 %v2704_v19, %v3772_v29  ;;  %v934_v22 = vpop.f32.mrb[9].mxu1 }
 0x1ce   : > { %v1102_v24 = vadd.f32 %v1101_v16, %v1100_v54  ;;  %v1116_v26 = vadd.f32 %v1115_v18, %v1114_v12  ;;  %v3818_v27 = vadd.f32 %v3772_v29, %v934_v22  ;;  %v2705_v28 = vpop.f32.mrb[10].mxu1  ;;  %v1285_v22 = vshrl.u32 %v1284_v50, 7 }
 0x1cf   : > { %v1093_v5 = vadd.f32 %v1092_v60, %v1091_v14  ;;  %v1107_v8 = vadd.f32 %v1106_v20, %v1105_v15  ;;  %v1130_v31 = vsel %vm635_vm1, %v3815_v21, 0.0  ;;  %v3825_v32 = vadd.f32 %v2705_v28, %v3772_v29  ;;  %v937_v33 = vpop.f32.mrb[11].mxu1 }
 0x1d0   : > { %v1158_v6 = vmul.f32 0.0625, %v1102_v24  ;;  %v1117_v17 = vrot.slane %v1116_v26, 2  ;;  %v1121_v34 = vsel %vm635_vm1, %v3818_v27, 0.0  ;;  %v3830_v35 = vadd.f32 %v3772_v29, %v937_v33 }
 0x1d1   : > { %v1157_v36 = vmul.f32 0.0625, %v1093_v5  ;;  %v1108_v37 = vrot.slane %v1107_v8, 2  ;;  %v1131_v38 = vsel %vm635_vm1, %v3825_v32, 0.0  ;;  %v1286_v23 = vsub.s32 %v1283_v58, %v1285_v22 }
 0x1d2   : > { %v1173_v48 = vadd.f32 %v3820_v30, %v1158_v6  ;;  %v1118_v55 = vadd.f32 %v1117_v17, %v1116_v26  ;;  %v1132_v39 = vadd.f32 %v1131_v38, %v1130_v31  ;;  %v1122_v40 = vsel %vm635_vm1, %v3830_v35, 0.0 }
 0x1d3   : > { %v1172_v42 = vadd.f32 %v3820_v30, %v1157_v36  ;;  %v1109_v43 = vadd.f32 %v1108_v37, %v1107_v8  ;;  %v1123_v45 = vadd.f32 %v1122_v40, %v1121_v34  ;;  %v2574_v34 = vld [vmem:[#allocation5] ss:$0 sm:$0xff] }
 0x1d4   : > { %v1534_v46 = vrot.slane %v1173_v48, 7  ;;  %v1119_v47 = vrot.slane %v1118_v55, 1  ;;  %v1133_v49 = vrot.slane %v1132_v39, 4  ;;  %v2708_v52 = vpop.f32.mrb[12].mxu1 }
 0x1d5   : > { %v1110_v53 = vrot.slane %v1109_v43, 1  ;;  %v1124_v57 = vrot.slane %v1123_v45, 4  ;;  %v3839_v61 = vadd.f32 %v2708_v52, %v3772_v29  ;;  %v950_v62 = vpop.f32.mrb[13].mxu1 }
 0x1d6   : > { %v1535_v63 = vsel %vm751_vm2, %v1534_v46, %v1172_v42  ;;  %v1120_v2 = vadd.f32 %v1119_v47, %v1118_v55  ;;  %v1134_v3 = vadd.f32 %v1133_v49, %v1132_v39  ;;  %v3843_v4 = vadd.f32 %v3772_v29, %v950_v62  ;;  %v2709_v9 = vpop.f32.mrb[14].mxu1 }
 0x1d7   : > { %v1111_v11 = vadd.f32 %v1110_v53, %v1109_v43  ;;  %v1125_v54 = vadd.f32 %v1124_v57, %v1123_v45  ;;  %v1148_v12 = vsel %vm635_vm1, %v3839_v61, 0.0  ;;  %v3848_v13 = vadd.f32 %v2709_v9, %v3772_v29  ;;  %v953_v14 = vpop.f32.mrb[15].mxu1 }
 0x1d8   : > { %v1160_v15 = vmul.f32 0.0625, %v1120_v2  ;;  %v1135_v16 = vrot.slane %v1134_v3, 2  ;;  %v1139_v18 = vsel %vm635_vm1, %v3843_v4, 0.0  ;;  %v3853_v19 = vadd.f32 %v3772_v29, %v953_v14 }
 0x1d9   : > { %v1159_v60 = vmul.f32 0.0625, %v1111_v11  ;;  %v1126_v20 = vrot.slane %v1125_v54, 2  ;;  %v1149_v24 = vsel %vm635_vm1, %v3848_v13, 0.0 }
 0x1da   : > { %v1175_v26 = vadd.f32 %v3820_v30, %v1160_v15  ;;  %v1136_v28 = vadd.f32 %v1135_v16, %v1134_v3  ;;  %v1150_v5 = vadd.f32 %v1149_v24, %v1148_v12  ;;  %v1140_v8 = vsel %vm635_vm1, %v3853_v19, 0.0 }
 0x1db   : > { %v1174_v31 = vadd.f32 %v3820_v30, %v1159_v60  ;;  %v1127_v33 = vadd.f32 %v1126_v20, %v1125_v54  ;;  %v1141_v6 = vadd.f32 %v1140_v8, %v1139_v18  ;;  %v815_v55 = vpop.f32.mrb[0].mxu0  ;;  %v3869_v3 = vsub.s32 0, %v1285_v22 }
 0x1dc   : > { %v1538_v17 = vrot.slane %v1175_v26, 5  ;;  %v1137_v29 = vrot.slane %v1136_v28, 1  ;;  %v1151_v36 = vrot.slane %v1150_v5, 4  ;;  %v3862_v43 = vadd.f32 %v2574_v34, %v815_v55  ;;  %v2688_v45 = vpop.f32.mrb[1].mxu0 }
 0x1dd   : > { %v1536_v37 = vrot.slane %v1174_v31, 6  ;;  %v1128_v38 = vrot.slane %v1127_v33, 1  ;;  %v1142_v25 = vrot.slane %v1141_v6, 4  ;;  %v818_v50 = vpop.f32.mrb[2].mxu0 }
 0x1de   : > { %v1138_v48 = vadd.f32 %v1137_v29, %v1136_v28  ;;  %v1152_v39 = vadd.f32 %v1151_v36, %v1150_v5  ;;  %v1280_v57 = vcombine.high %v3862_v43, %v3862_v43  ;;  %v1287_v58 = vrot.slane %v3862_v43, %v1286_v23  ;;  %v2689_v62 = vpop.f32.mrb[3].mxu0 }
 0x1df   : > { %v1537_v40 = vsel %vm753_vm3, %v1536_v37, %v1535_v63  ;;  %v1129_v42 = vadd.f32 %v1128_v38, %v1127_v33  ;;  %v1143_v46 = vadd.f32 %v1142_v25, %v1141_v6 }
 0x1e0   : > { %v1162_v47 = vmul.f32 0.0625, %v1138_v48  ;;  %v1539_v49 = vsel %vm755_vm4, %v1538_v17, %v1537_v40  ;;  %v1153_v52 = vrot.slane %v1152_v39, 2  ;;  %v1294_v54 = vrot.slane %v1280_v57, %v1286_v23 }
 0x1e1   : > { %v1161_v53 = vmul.f32 0.0625, %v1129_v42  ;;  %v1144_v2 = vrot.slane %v1143_v46, 2  ;;  %v1295_v12 = vcombine.high %v1287_v58, %v1287_v58  ;;  %v1303_v14 = vrot.slane %v1287_v58, %v1286_v23 }
 0x1e2   : > { %v1177_v63 = vadd.f32 %v3820_v30, %v1162_v47  ;;  %v1154_v9 = vadd.f32 %v1153_v52, %v1152_v39  ;;  %v1296_v20 = vcombine.high %v1294_v54, %v1294_v54  ;;  %v1310_v5 = vrot.slane %v1294_v54, %v1286_v23 }
 0x1e3   : > { %v1176_v11 = vadd.f32 %v3820_v30, %v1161_v53  ;;  %v1145_v18 = vadd.f32 %v1144_v2, %v1143_v46  ;;  %v1317_v24 = vrot.slane %v1295_v12, %v1286_v23  ;;  %v1325_v26 = vcombine.high %v1303_v14, %v1303_v14 }
 0x1e4   : > { %v1542_v15 = vrot.slane %v1177_v63, 3  ;;  %v1155_v16 = vrot.slane %v1154_v9, 1  ;;  %v1332_v28 = vrot.slane %v1303_v14, %v3869_v3  ;;  %v1324_v29 = vrot.slane %v1296_v20, %v1286_v23 }
 0x1e5   : > { %v1540_v60 = vrot.slane %v1176_v11, 4  ;;  %v1146_v31 = vrot.slane %v1145_v18, 1  ;;  %v1327_v33 = vcombine.high %v1317_v24, %v1317_v24  ;;  %v1336_v6 = vrot.slane %v1317_v24, %v3869_v3 }
 0x1e6   : > { %v1156_v8 = vadd.f32 %v1155_v16, %v1154_v9  ;;  %v1340_v17 = vrot.slane %v1325_v26, %v3869_v3  ;;  %v1326_v34 = vcombine.high %v1310_v5, %v1310_v5  ;;  %v1348_v36 = vrot.slane %v1310_v5, %v3869_v3 }
 0x1e7   : > { %v1541_v22 = vsel %vm757_vm5, %v1540_v60, %v1539_v49  ;;  %v1371_v38 = vmul.f32 %v1336_v6, %v3775_v51  ;;  %v1372_v25 = vmul.f32 %v1336_v6, %v3783_v41  ;;  %v1147_v48 = vadd.f32 %v1146_v31, %v1145_v18 }
 0x1e8   : > { %v1164_v37 = vmul.f32 0.0625, %v1156_v8  ;;  %v1543_v55 = vsel %vm759_vm6, %v1542_v15, %v1541_v22  ;;  %v1328_v39 = vcombine.high %v1324_v29, %v1324_v29  ;;  %v1352_v40 = vrot.slane %v1324_v29, %v3869_v3 }
 0x1e9   : > { %v1356_v42 = vrot.slane %v1326_v34, %v3869_v3  ;;  %v1386_v46 = vpack.c.bf16 %v1372_v25, %v1371_v38  ;;  %v1163_v23 = vmul.f32 0.0625, %v1147_v48  ;;  %v1369_v47 = vmul.f32 %v1332_v28, %v3778_v10 }
 0x1ea   : > { %v1179_v45 = vadd.f32 %v3820_v30, %v1164_v37  ;;  %v1370_v49 = vmul.f32 %v1332_v28, %v3788_v44  ;;  %v1360_v51 = vrot.slane %v1328_v39, %v3869_v3  ;;  %v1373_v58 = vmul.f32 %v1340_v17, %v3798_v59 }
 0x1eb   : > { %v1381_v41 = vmul.f32 %v1356_v42, %v3843_v4  ;;  %v1382_v52 = vmul.f32 %v1356_v42, %v3853_v19  ;;  %v1178_v53 = vadd.f32 %v3820_v30, %v1163_v23  ;;  %v1374_v62 = vmul.f32 %v1340_v17, %v3808_v7 }
 0x1ec   : > { %v1546_v50 = vrot.slane %v1179_v45, 1  ;;  %v1385_v57 = vpack.c.bf16 %v1370_v49, %v1369_v47  ;;  %v1383_v2 = vmul.f32 %v1360_v51, %v3839_v61  ;;  %v1384_v10 = vmul.f32 %v1360_v51, %v3848_v13 }
 0x1ed   : > { %v1391_v63 = vpack.c.bf16 %v1382_v52, %v1381_v41  ;;  %v1344_v44 = vrot.slane %v1327_v33, %v3869_v3  ;;  %v1544_v9 = vrot.slane %v1178_v53, 2  ;;  %v1387_v4 = vpack.c.bf16 %v1374_v62, %v1373_v58 }
 0x1ee   : > { %2734 = vmatprep.mubr.msk.bf16.mxu1 %vm635_vm1, %v1385_v57  ;;  %v1377_v19 = vmul.f32 %v1348_v36, %v3818_v27  ;;  %v1378_v30 = vmul.f32 %v1348_v36, %v3830_v35  ;;  %v1392_v11 = vpack.c.bf16 %v1384_v10, %v1383_v2  ;;  %v1379_v61 = vmul.f32 %v1352_v40, %v3815_v21 }
 0x1ef   : > { %2735 = vmatmul.mubr.msk.bf16.vlgmr.msra.gmra.mrb[16].mxu1 %vm635_vm1, %v1386_v46  ;;  %v1375_v59 = vmul.f32 %v1344_v44, %v3795_v56  ;;  %v1376_v7 = vmul.f32 %v1344_v44, %v3803_v1  ;;  %v1545_v13 = vsel %vm761_vm7, %v1544_v9, %v1543_v55  ;;  %v1380_v12 = vmul.f32 %v1352_v40, %v3825_v32  ;;  %v2589_v56 = vld [vmem:[#allocation11] ss:$0 sm:$0xff]  ;;  %v2716_v1 = vpop.f32.mrb[4].mxu0 }
 0x1f0   : > { %2738 = vmatprep.mubr.msk.bf16.mxu1 %vm635_vm1, %v1387_v4  ;;  %v1389_v54 = vpack.c.bf16 %v1378_v30, %v1377_v19  ;;  %v1547_v27 = vsel %vm763_vm8, %v1546_v50, %v1545_v13  ;;  %v3914_v21 = vadd.f32 %v2716_v1, %v2589_v56  ;;  %v1022_v32 = vpop.f32.mrb[5].mxu0 }
 0x1f1   : > { %v1388_v14 = vpack.c.bf16 %v1376_v7, %v1375_v59  ;;  %v1390_v35 = vpack.c.bf16 %v1380_v12, %v1379_v61  ;;  %v1549_v15 = vmul.f32 %v1547_v27, %v3862_v43  ;;  %v3916_v43 = vadd.f32 %v2589_v56, %v1022_v32  ;;  %v2717_v18 = vpop.f32.mrb[6].mxu0 }
 0x1f2   : > { %v1189_v60 = vsel %vm635_vm1, %v3914_v21, 0.0  ;;  %v3920_v20 = vadd.f32 %v2717_v18, %v2589_v56  ;;  %v1025_v24 = vpop.f32.mrb[7].mxu0 }
 0x1f3   : > { %v1550_v16 = vpack.c.bf16 %v1549_v15, %v1549_v15  ;;  %v1180_v26 = vsel %vm635_vm1, %v3916_v43, 0.0  ;;  %v3924_v28 = vadd.f32 %v2589_v56, %v1025_v24  ;;  %v2720_v33 = vpop.f32.mrb[8].mxu0 }
 0x1f4   : > { %v1190_v5 = vsel %vm635_vm1, %v3920_v20, 0.0  ;;  %v3930_v6 = vadd.f32 %v2720_v33, %v2589_v56  ;;  %v1038_v17 = vpop.f32.mrb[9].mxu0 }
 0x1f5   : > { %2755 = vmatmul.mubr.msk.bf16.vlgmr.msra.gmra.mrb[20].mxu0 %vm635_vm1, %v1550_v16  ;;  %v1191_v8 = vadd.f32 %v1190_v5, %v1189_v60  ;;  %v1181_v31 = vsel %vm635_vm1, %v3924_v28, 0.0  ;;  %v3932_v29 = vadd.f32 %v2589_v56, %v1038_v17  ;;  %v2721_v34 = vpop.f32.mrb[10].mxu0 }
 0x1f6   : > { %v1182_v22 = vadd.f32 %v1181_v31, %v1180_v26  ;;  %v1207_v36 = vsel %vm635_vm1, %v3930_v6, 0.0  ;;  %v3936_v37 = vadd.f32 %v2721_v34, %v2589_v56  ;;  %v1041_v38 = vpop.f32.mrb[11].mxu0 }
 0x1f7   : > { %2739 = vmatmul.mubr.msk.bf16.gmra.mrb[20].mxu1 %vm635_vm1, %v1388_v14  ;;  %v1198_v25 = vsel %vm635_vm1, %v3932_v29, 0.0  ;;  %v3940_v48 = vadd.f32 %v2589_v56, %v1041_v38  ;;  %v2724_v45 = vpop.f32.mrb[12].mxu0  ;;  %v1192_v14 = vrot.slane %v1191_v8, 4 }
 0x1f8   : > { %2742 = vmatprep.mubr.msk.bf16.mxu1 %vm635_vm1, %v1389_v54  ;;  %v1208_v55 = vsel %vm635_vm1, %v3936_v37, 0.0  ;;  %v3946_v46 = vadd.f32 %v2724_v45, %v2589_v56  ;;  %v1054_v23 = vpop.f32.mrb[13].mxu0  ;;  %v1183_v1 = vrot.slane %v1182_v22, 4 }
 0x1f9   : > { %v1209_v39 = vadd.f32 %v1208_v55, %v1207_v36  ;;  %v1199_v40 = vsel %vm635_vm1, %v3940_v48, 0.0  ;;  %v3948_v47 = vadd.f32 %v2589_v56, %v1054_v23  ;;  %v2725_v49 = vpop.f32.mrb[14].mxu0  ;;  %v1193_v16 = vadd.f32 %v1192_v14, %v1191_v8 }
 0x1fa   : > { %v1200_v42 = vadd.f32 %v1199_v40, %v1198_v25  ;;  %v1225_v51 = vsel %vm635_vm1, %v3946_v46, 0.0  ;;  %v3952_v41 = vadd.f32 %v2725_v49, %v2589_v56  ;;  %v1057_v50 = vpop.f32.mrb[15].mxu0 }
 0x1fb   : > { %v1216_v52 = vsel %vm635_vm1, %v3948_v47, 0.0  ;;  %v3956_v53 = vadd.f32 %v2589_v56, %v1057_v50  ;;  %v2728_v10 = vpop.f32.mrb[16].mxu0  ;;  %v1194_v24 = vrot.slane %v1193_v16, 2 }
 0x1fc   : > { %v1226_v57 = vsel %vm635_vm1, %v3952_v41, 0.0  ;;  %v1070_v44 = vpop.f32.mrb[17].mxu0  ;;  %v1201_v27 = vrot.slane %v1200_v42, 4 }
 0x1fd   : > { %v1227_v58 = vadd.f32 %v1226_v57, %v1225_v51  ;;  %v1217_v62 = vsel %vm635_vm1, %v3956_v53, 0.0  ;;  %v3964_v9 = vadd.f32 %v2589_v56, %v1070_v44  ;;  %v2729_v4 = vpop.f32.mrb[18].mxu0  ;;  %v1195_v34 = vadd.f32 %v1194_v24, %v1193_v16 }
 0x1fe   : > { %v1218_v2 = vadd.f32 %v1217_v62, %v1216_v52  ;;  %v3968_v30 = vadd.f32 %v2729_v4, %v2589_v56  ;;  %v1202_v32 = vadd.f32 %v1201_v27, %v1200_v42 }
 0x1ff   : > { %2743 = vmatmul.mubr.msk.bf16.gmra.mrb[24].mxu1 %vm635_vm1, %v1390_v35  ;;  %v1234_v59 = vsel %vm635_vm1, %v3964_v9, 0.0  ;;  %v1210_v35 = vrot.slane %v1209_v39, 4  ;;  %v1228_v26 = vrot.slane %v1227_v58, 4  ;;  %v1196_v8 = vrot.slane %v1195_v34, 1 }
 0x200   : > { %2746 = vmatprep.mubr.msk.bf16.mxu1 %vm635_vm1, %v1391_v63  ;;  %v3962_v63 = vadd.f32 %v2728_v10, %v2589_v56  ;;  %v1244_v61 = vsel %vm635_vm1, %v3968_v30, 0.0  ;;  %v1219_v15 = vrot.slane %v1218_v2, 4  ;;  %v1203_v5 = vrot.slane %v1202_v32, 2 }
 0x201   : > { %v1211_v18 = vadd.f32 %v1210_v35, %v1209_v39  ;;  %v1229_v38 = vadd.f32 %v1228_v26, %v1227_v58  ;;  %v1197_v57 = vadd.f32 %v1196_v8, %v1195_v34 }
 0x202   : > { %v1243_v19 = vsel %vm635_vm1, %v3962_v63, 0.0  ;;  %v1220_v60 = vadd.f32 %v1219_v15, %v1218_v2  ;;  %v1204_v25 = vadd.f32 %v1203_v5, %v1202_v32 }
 0x203   : > { %v1245_v13 = vadd.f32 %v1244_v61, %v1243_v19  ;;  %v1212_v33 = vrot.slane %v1211_v18, 2  ;;  %v1230_v42 = vrot.slane %v1229_v38, 2 }
 0x204   : > { %v1221_v17 = vrot.slane %v1220_v60, 2  ;;  %v1205_v39 = vrot.slane %v1204_v25, 1 }
 0x205   : > { %v1213_v40 = vadd.f32 %v1212_v33, %v1211_v18  ;;  %v1246_v45 = vrot.slane %v1245_v13, 4  ;;  %v1231_v2 = vadd.f32 %v1230_v42, %v1229_v38 }
 0x206   : > { %v1222_v23 = vadd.f32 %v1221_v17, %v1220_v60  ;;  %v1206_v10 = vadd.f32 %v1205_v39, %v1204_v25 }
 0x207   : > { %2747 = vmatmul.mubr.msk.bf16.gmra.mrb[28].mxu1 %vm635_vm1, %v1392_v11  ;;  %v1073_v11 = vpop.f32.mrb[19].mxu0  ;;  %v1214_v50 = vrot.slane %v1213_v40, 1  ;;  %v1232_v61 = vrot.slane %v1231_v2, 1 }
 0x208   : > { %2778 = vmatprep.mubr.msk.bf16.mxu1 %vm3255_vm0, %v4375_v0  ;;  %v3972_v7 = vadd.f32 %v2589_v56, %v1073_v11  ;;  %v1184_v56 = vadd.f32 %v1183_v1, %v1182_v22  ;;  %v1247_v22 = vadd.f32 %v1246_v45, %v1245_v13  ;;  %v1223_v52 = vrot.slane %v1222_v23, 1 }
 0x209   : > { %v1215_v4 = vadd.f32 %v1214_v50, %v1213_v40  ;;  %v1253_v11 = vmul.f32 0.0625, %v1197_v57  ;;  %v1233_v1 = vadd.f32 %v1232_v61, %v1231_v2 }
 0x20a   : > { %v1235_v54 = vsel %vm635_vm1, %v3972_v7, 0.0  ;;  %v1185_v36 = vrot.slane %v1184_v56, 2  ;;  %v1248_v58 = vrot.slane %v1247_v22, 2  ;;  %v1224_v19 = vadd.f32 %v1223_v52, %v1222_v23 }
 0x20b   : > { %v1236_v12 = vadd.f32 %v1235_v54, %v1234_v59  ;;  %v2601_v54 = vld [vmem:[#allocation8] ss:$0 sm:$0xff]  ;;  %v1255_v27 = vmul.f32 0.0625, %v1215_v4  ;;  %v3999_v4 = vld [vmem:[%s4408_s14 + $0x8] sm:$0xff] }
 0x20c   : > { %v1186_v49 = vadd.f32 %v1185_v36, %v1184_v56  ;;  %v1249_v35 = vadd.f32 %v1248_v58, %v1247_v22  ;;  %v1256_v15 = vmul.f32 0.0625, %v1224_v19  ;;  %v1268_v16 = vadd.f32 %v2601_v54, %v1253_v11 }
 0x20d   : > { %v1237_v31 = vrot.slane %v1236_v12, 4  ;;  %v1270_v60 = vadd.f32 %v2601_v54, %v1255_v27 }
 0x20e   : > { %v1187_v62 = vrot.slane %v1186_v49, 1  ;;  %v1250_v24 = vrot.slane %v1249_v35, 1  ;;  %v1271_v56 = vadd.f32 %v2601_v54, %v1256_v15  ;;  %v2265_v26 = vrot.slane %v1268_v16, 7 }
 0x20f   : > { %v1238_v55 = vadd.f32 %v1237_v31, %v1236_v12  ;;  %v1254_v12 = vmul.f32 0.0625, %v1206_v10  ;;  %v1257_v31 = vmul.f32 0.0625, %v1233_v1  ;;  %v2269_v34 = vrot.slane %v1270_v60, 5  ;;  %v3994_v10 = vld [vmem:[%s4408_s14] sm:$0xff] }
 0x210   : > { %v1188_v59 = vadd.f32 %v1187_v62, %v1186_v49  ;;  %v1251_v36 = vadd.f32 %v1250_v24, %v1249_v35  ;;  %v2271_v38 = vrot.slane %v1271_v56, 4  ;;  %v1991_v62 = vld [vmem:[%s4407_s25] sm:$0x3]  ;;  %s2627_s25 = sshll.u32 %s3359_s24, 7  ;;  %s3163_s24 = scalar_lea.vmem %s4310_s17, 128 }
 0x211   : > { %v1239_v51 = vrot.slane %v1238_v55, 2  ;;  %v1269_v32 = vadd.f32 %v2601_v54, %v1254_v12  ;;  %2790 = vmatprep.subr.msk.bf16.mxu0 %vm2024_vm9, %v1991_v62  ;;  %v2026_v2 = vsel %vm2024_vm9, %v1991_v62, 0  ;;  %s4308_s1 = scalar_lea.hbm %s4412_s0, %s2627_s25  ;;  %p3164_p6 = scmp.ne.s32.totalorder %s4310_s17, %s3163_s24 }
 0x212   : > { %v1252_v13 = vmul.f32 0.0625, %v1188_v59  ;;  %v1259_v25 = vmul.f32 0.0625, %v1251_v36  ;;  %2759 = vmatpush3.bf16.msra.mxu0 %v2026_v2  ;;  %2777 = vmatpush3.bf16.msra.mxu1 %v2026_v2 }
 0x213   : > { %v1240_v44 = vadd.f32 %v1239_v51, %v1238_v55  ;;  %v2267_v33 = vrot.slane %v1269_v32, 6  ;;  %v1272_v55 = vadd.f32 %v2601_v54, %v1257_v31  ;;  %2782 = vmatprep.subr.bf16.mxu1 %v4375_v0  ;;  %p3165_p4 = pnand %p3164_p6, %p4413_p9 }
 0x214   : > { %v1267_v5 = vadd.f32 %v2601_v54, %v1252_v13  ;;  %v1274_v8 = vadd.f32 %v2601_v54, %v1259_v25 }
 0x215   : > { %v1241_v14 = vrot.slane %v1240_v44, 1  ;;  %v2273_v42 = vrot.slane %v1272_v55, 3  ;;  %p3166_p13 = pneg %p3165_p4 }
 0x216   : > { %v2266_v40 = vsel %vm751_vm2, %v2265_v26, %v1267_v5  ;;  %v2277_v22 = vrot.slane %v1274_v8, 1 }
 0x217   : > { %v1242_v18 = vadd.f32 %v1241_v14, %v1240_v44  ;;  %v2268_v23 = vsel %vm753_vm3, %v2267_v33, %v2266_v40 }
 0x218   : > { %v2270_v49 = vsel %vm755_vm4, %v2269_v34, %v2268_v23 }
 0x219   : > { %v1258_v17 = vmul.f32 0.0625, %v1242_v18  ;;  %v2272_v39 = vsel %vm757_vm5, %v2271_v38, %v2270_v49 }
 0x21a   : > { %v2274_v50 = vsel %vm759_vm6, %v2273_v42, %v2272_v39 }
 0x21b   : > { %v1273_v45 = vadd.f32 %v2601_v54, %v1258_v17 }
 0x21d   : > { %v2275_v51 = vrot.slane %v1273_v45, 2 }
 0x21f   : > { %v2276_v52 = vsel %vm761_vm7, %v2275_v51, %v2274_v50 }
 0x220   : > { %v3985_v57 = vsel %vm763_vm8, %v2277_v22, %v2276_v52 }
 0x2c2   : > { %v2736_v44 = vpop.f32.mrb[16].mxu1 }
 0x2c3   : > { %v4002_v58 = vadd.f32 %v2736_v44, %v3994_v10  ;;  %v1463_v19 = vpop.f32.mrb[17].mxu1 }
 0x2c4   : > { %v4005_v11 = vadd.f32 %v3994_v10, %v1463_v19  ;;  %v2737_v59 = vpop.f32.mrb[18].mxu1 }
 0x2c5   : > { %v4008_v61 = vadd.f32 %v2737_v59, %v3999_v4  ;;  %v1466_v54 = vpop.f32.mrb[19].mxu1  ;;  %v1622_v14 = vsel %vm1612_vm10, %v4002_v58, -inf }
 0x2c6   : > { %v4011_v12 = vadd.f32 %v3999_v4, %v1466_v54  ;;  %v1613_v35 = vsel %vm1612_vm10, %v4005_v11, -inf }
 0x2c7   : > { %v1623_v27 = vsel %vm1612_vm10, %v4008_v61, -inf }
 0x2c8   : > { %v1624_v15 = vmax.f32 %v1622_v14, %v1623_v27  ;;  %v1614_v16 = vsel %vm1612_vm10, %v4011_v12, -inf  ;;  %v4021_v1 = vpop.f32.mrb[20].mxu0 }
 0x2c9   : > { %v1615_v13 = vmax.f32 %v1613_v35, %v1614_v16  ;;  %v2756_v60 = vpop.f32.mrb[21].mxu0  ;;  %v1686_v44 = vrot.slane %v4021_v1, 1  ;;  %v1687_v19 = vrot.slane %v4021_v1, 2  ;;  %v1688_v35 = vrot.slane %v4021_v1, 3 }
 0x2ca   : > { %v1625_v32 = vrot.slane %v1624_v15, 4  ;;  %v2740_v18 = vpop.f32.mrb[20].mxu1  ;;  %v1591_v5 = vpop.f32.mrb[22].mxu0 }
 0x2cb   : > { %v1616_v24 = vrot.slane %v1615_v13, 4  ;;  %v4024_v56 = vadd.f32 %v2740_v18, %v3994_v10  ;;  %v1479_v26 = vpop.f32.mrb[21].mxu1  ;;  %v2757_v34 = vpop.f32.mrb[23].mxu0  ;;  %v1689_v18 = vrot.slane %v4021_v1, 4 }
 0x2cc   : > { %v1626_v31 = vmax.f32 %v1624_v15, %v1625_v32  ;;  %v4027_v33 = vadd.f32 %v3994_v10, %v1479_v26  ;;  %v2741_v17 = vpop.f32.mrb[22].mxu1 }
 0x2cd   : > { %v1617_v36 = vmax.f32 %v1615_v13, %v1616_v24  ;;  %v4030_v38 = vadd.f32 %v2741_v17, %v3999_v4  ;;  %v1482_v25 = vpop.f32.mrb[23].mxu1  ;;  %v1640_v23 = vsel %vm1612_vm10, %v4024_v56, -inf }
 0x2ce   : > { %v1627_v55 = vrot.slane %v1626_v31, 2  ;;  %v4033_v40 = vadd.f32 %v3999_v4, %v1482_v25  ;;  %v1631_v42 = vsel %vm1612_vm10, %v4027_v33, -inf }
 0x2cf   : > { %v1618_v45 = vrot.slane %v1617_v36, 2  ;;  %v1641_v8 = vsel %vm1612_vm10, %v4030_v38, -inf }
 0x2d0   : > { %v1628_v49 = vmax.f32 %v1626_v31, %v1627_v55  ;;  %v1642_v39 = vmax.f32 %v1640_v23, %v1641_v8  ;;  %v1632_v51 = vsel %vm1612_vm10, %v4033_v40, -inf }
 0x2d1   : > { %v1619_v50 = vmax.f32 %v1617_v36, %v1618_v45  ;;  %v1633_v22 = vmax.f32 %v1631_v42, %v1632_v51 }
 0x2d2   : > { %v1629_v52 = vrot.slane %v1628_v49, 1  ;;  %v1643_v62 = vrot.slane %v1642_v39, 4  ;;  %v2744_v2 = vpop.f32.mrb[24].mxu1 }
 0x2d3   : > { %v1620_v59 = vrot.slane %v1619_v50, 1  ;;  %v1634_v54 = vrot.slane %v1633_v22, 4  ;;  %v4046_v14 = vadd.f32 %v2744_v2, %v3994_v10  ;;  %v1495_v27 = vpop.f32.mrb[25].mxu1 }
 0x2d4   : > { %v1630_v15 = vmax.f32 %v1628_v49, %v1629_v52  ;;  %v1644_v16 = vmax.f32 %v1642_v39, %v1643_v62  ;;  %v4050_v13 = vadd.f32 %v3994_v10, %v1495_v27  ;;  %v2745_v32 = vpop.f32.mrb[26].mxu1  ;;  %v1690_v52 = vrot.slane %v4021_v1, 5 }
 0x2d5   : > { %v1621_v60 = vmax.f32 %v1619_v50, %v1620_v59  ;;  %v1635_v24 = vmax.f32 %v1633_v22, %v1634_v54  ;;  %v4054_v26 = vadd.f32 %v2745_v32, %v3999_v4  ;;  %v1498_v5 = vpop.f32.mrb[27].mxu1  ;;  %v1658_v34 = vsel %vm1612_vm10, %v4046_v14, -inf }
 0x2d6   : > { %v1645_v17 = vrot.slane %v1644_v16, 2  ;;  %v4060_v36 = vadd.f32 %v3999_v4, %v1498_v5  ;;  %v1702_v25 = vmax.f32 %v1630_v15, %v1686_v44  ;;  %v1649_v45 = vsel %vm1612_vm10, %v4050_v13, -inf }
 0x2d7   : > { %v1636_v55 = vrot.slane %v1635_v24, 2  ;;  %v1659_v23 = vsel %vm1612_vm10, %v4054_v26, -inf  ;;  %v1701_v8 = vmax.f32 %v1621_v60, %v4021_v1 }
 0x2d8   : > { %v1646_v49 = vmax.f32 %v1644_v16, %v1645_v17  ;;  %v1660_v42 = vmax.f32 %v1658_v34, %v1659_v23  ;;  %v1650_v39 = vsel %vm1612_vm10, %v4060_v36, -inf  ;;  %v1797_v51 = vrot.slane %v1702_v25, 7 }
 0x2d9   : > { %v1637_v50 = vmax.f32 %v1635_v24, %v1636_v55  ;;  %v1651_v22 = vmax.f32 %v1649_v45, %v1650_v39  ;;  %v1712_v62 = vrot.slane %v1701_v8, %v3869_v3  ;;  %v1716_v27 = vrot.slane %v1702_v25, %v3869_v3 }
 0x2da   : > { %v1647_v2 = vrot.slane %v1646_v49, 1  ;;  %v1661_v44 = vrot.slane %v1660_v42, 4  ;;  %v2748_v59 = vpop.f32.mrb[28].mxu1  ;;  %v1798_v54 = vsel %vm751_vm2, %v1797_v51, %v1701_v8 }
 0x2db   : > { %v1638_v15 = vrot.slane %v1637_v50, 1  ;;  %v1652_v16 = vrot.slane %v1651_v22, 4  ;;  %v4074_v32 = vadd.f32 %v2748_v59, %v3994_v10  ;;  %v1511_v60 = vpop.f32.mrb[29].mxu1  ;;  %v1741_v24 = vsub.f32 %v4005_v11, %v1712_v62 }
 0x2dc   : > { %v1648_v5 = vmax.f32 %v1646_v49, %v1647_v2  ;;  %v1662_v17 = vmax.f32 %v1660_v42, %v1661_v44  ;;  %v4078_v34 = vadd.f32 %v3994_v10, %v1511_v60  ;;  %v2749_v55 = vpop.f32.mrb[30].mxu1  ;;  %v1742_v45 = vsub.f32 %v4011_v12, %v1712_v62 }
 0x2dd   : > { %v1639_v23 = vmax.f32 %v1637_v50, %v1638_v15  ;;  %v1653_v8 = vmax.f32 %v1651_v22, %v1652_v16  ;;  %v1676_v25 = vsel %vm1612_vm10, %v4074_v32, -inf  ;;  %v4084_v39 = vadd.f32 %v2749_v55, %v3999_v4  ;;  %v1514_v51 = vpop.f32.mrb[31].mxu1 }
 0x2de   : > { %v1663_v59 = vrot.slane %v1662_v17, 2  ;;  %v1667_v11 = vsel %vm1612_vm10, %v4078_v34, -inf  ;;  %v4089_v49 = vadd.f32 %v3999_v4, %v1514_v51  ;;  %v1704_v10 = vmax.f32 %v1648_v5, %v1688_v35 }
 0x2df   : > { %v1654_v42 = vrot.slane %v1653_v8, 2  ;;  %v1703_v2 = vmax.f32 %v1639_v23, %v1687_v19  ;;  %v1677_v12 = vsel %vm1612_vm10, %v4084_v39, -inf  ;;  %v1757_v50 = vmul.f32 1.442695, %v1741_v24 }
 0x2e0   : > { %v1664_v22 = vmax.f32 %v1662_v17, %v1663_v59  ;;  %v1678_v62 = vmax.f32 %v1676_v25, %v1677_v12  ;;  %v1668_v44 = vsel %vm1612_vm10, %v4089_v49, -inf  ;;  %v1801_v15 = vrot.slane %v1704_v10, 5 }
 0x2e1   : > { %v1655_v16 = vmax.f32 %v1653_v8, %v1654_v42  ;;  %v1669_v60 = vmax.f32 %v1667_v11, %v1668_v44  ;;  %v1799_v55 = vrot.slane %v1703_v2, 6  ;;  %2915 = vpow2.f32 %v1757_v50 }
 0x2e2   : > { %v1665_v0 = vrot.slane %v1664_v22, 1  ;;  %v1679_v4 = vrot.slane %v1678_v62, 4  ;;  %v1759_v51 = vmul.f32 1.442695, %v1742_v45  ;;  %v1743_v35 = vsub.f32 %v4002_v58, %v1716_v27 }
 0x2e3   : > { %v1656_v19 = vrot.slane %v1655_v16, 1  ;;  %v1670_v5 = vrot.slane %v1669_v60, 4  ;;  %v1800_v23 = vsel %vm753_vm3, %v1799_v55, %v1798_v54  ;;  %v1744_v24 = vsub.f32 %v4008_v61, %v1716_v27 }
 0x2e4   : > { %v1666_v17 = vmax.f32 %v1664_v22, %v1665_v0  ;;  %v1680_v25 = vmax.f32 %v1678_v62, %v1679_v4  ;;  %v1802_v59 = vsel %vm755_vm4, %v1801_v15, %v1800_v23  ;;  %2917 = vpow2.f32 %v1759_v51 }
 0x2e5   : > { %v1657_v8 = vmax.f32 %v1655_v16, %v1656_v19  ;;  %v1671_v11 = vmax.f32 %v1669_v60, %v1670_v5  ;;  %v1761_v42 = vmul.f32 1.442695, %v1743_v35  ;;  %v1763_v12 = vmul.f32 1.442695, %v1744_v24 }
 0x2e6   : > { %v1681_v50 = vrot.slane %v1680_v25, 2  ;;  %v1706_v44 = vmax.f32 %v1666_v17, %v1690_v52  ;;  %v1720_v45 = vrot.slane %v1703_v2, %v3869_v3  ;;  %v4101_v58 = vrot.slane %v1704_v10, %v3869_v3 }
 0x2e7   : > { %v1672_v31 = vrot.slane %v1671_v11, 2  ;;  %v1691_v54 = vrot.slane %v4021_v1, 6  ;;  %v1705_v0 = vmax.f32 %v1657_v8, %v1689_v18  ;;  %2919 = vpow2.f32 %v1761_v42 }
 0x2e8   : > { %v1682_v61 = vmax.f32 %v1680_v25, %v1681_v50  ;;  %v1732_v27 = vrot.slane %v1706_v44, %v3869_v3  ;;  %v1805_v22 = vrot.slane %v1706_v44, 3  ;;  %2921 = vpow2.f32 %v1763_v12 }
 0x2e9   : > { %v1673_v62 = vmax.f32 %v1671_v11, %v1672_v31  ;;  %v1803_v15 = vrot.slane %v1705_v0, 4  ;;  %v1745_v52 = vsub.f32 %v4027_v33, %v1720_v45  ;;  %v1746_v2 = vsub.f32 %v4033_v40, %v1720_v45 }
 0x2ea   : > { %v1683_v10 = vrot.slane %v1682_v61, 1  ;;  %v1751_v16 = vsub.f32 %v4046_v14, %v1732_v27  ;;  %v1752_v60 = vsub.f32 %v4054_v26, %v1732_v27  ;;  %v1747_v18 = vsub.f32 %v4024_v56, %v4101_v58 }
 0x2eb   : > { %v4113_v55 = vpop.eup %2915  ;;  %v1674_v4 = vrot.slane %v1673_v62, 1  ;;  %v1804_v51 = vsel %vm757_vm5, %v1803_v15, %v1802_v59  ;;  %v1765_v35 = vmul.f32 1.442695, %v1745_v52  ;;  %v1767_v31 = vmul.f32 1.442695, %v1746_v2 }
 0x2ec   : > { %v1684_v19 = vmax.f32 %v1682_v61, %v1683_v10  ;;  %v1777_v5 = vmul.f32 1.442695, %v1751_v16  ;;  %v1779_v33 = vmul.f32 1.442695, %v1752_v60  ;;  %v1806_v40 = vsel %vm759_vm6, %v1805_v22, %v1804_v51 }
 0x2ed   : > { %v1675_v23 = vmax.f32 %v1673_v62, %v1674_v4  ;;  %v1815_v14 = vsel %vm1612_vm10, %v4113_v55, 0.0  ;;  %2923 = vpow2.f32 %v1765_v35  ;;  %v1748_v56 = vsub.f32 %v4030_v38, %v4101_v58 }
 0x2ee   : > { %v4121_v26 = vpop.eup %2917  ;;  %v4409_v24 = vrot.slane %v4021_v1, 7  ;;  %2925 = vpow2.f32 %v1777_v5  ;;  %v1769_v25 = vmul.f32 1.442695, %v1747_v18  ;;  %v1728_v59 = vrot.slane %v1705_v0, %v3869_v3 }
 0x2ef   : > { %v1707_v8 = vmax.f32 %v1675_v23, %v1691_v54  ;;  %2927 = vpow2.f32 %v1779_v33  ;;  %v1816_v11 = vsel %vm1612_vm10, %v4121_v26, 0.0 }
 0x2f0   : > { %v1708_v17 = vmax.f32 %v1684_v19, %v4409_v24  ;;  %v1817_v50 = vadd.f32 %v1816_v11, %v1815_v14  ;;  %2929 = vpow2.f32 %v1767_v31  ;;  %v1749_v58 = vsub.f32 %v4050_v13, %v1728_v59 }
 0x2f1   : > { %v4129_v38 = vpop.eup %2919  ;;  %v1736_v44 = vrot.slane %v1707_v8, %v3869_v3  ;;  %v1807_v45 = vrot.slane %v1707_v8, 2  ;;  %2931 = vpow2.f32 %v1769_v25  ;;  %v1771_v19 = vmul.f32 1.442695, %v1748_v56 }
 0x2f2   : > { %v1740_v42 = vrot.slane %v1708_v17, %v3869_v3  ;;  %v1809_v12 = vrot.slane %v1708_v17, 1  ;;  %v4133_v61 = vpop.eup %2921  ;;  %v1818_v27 = vrot.slane %v1817_v50, 4  ;;  %v1824_v22 = vsel %vm1612_vm10, %v4129_v38, 0.0 }
 0x2f3   : > { %v1753_v62 = vsub.f32 %v4078_v34, %v1736_v44  ;;  %v1754_v15 = vsub.f32 %v4089_v49, %v1736_v44  ;;  %v1808_v52 = vsel %vm761_vm7, %v1807_v45, %v1806_v40  ;;  %v1825_v2 = vsel %vm1612_vm10, %v4133_v61, 0.0 }
 0x2f4   : > { %v1755_v54 = vsub.f32 %v4074_v32, %v1740_v42  ;;  %v1756_v0 = vsub.f32 %v4084_v39, %v1740_v42  ;;  %v1810_v16 = vsel %vm763_vm8, %v1809_v12, %v1808_v52  ;;  %v1819_v32 = vadd.f32 %v1818_v27, %v1817_v50 }
 0x2f5   : > { %v1781_v60 = vmul.f32 1.442695, %v1753_v62  ;;  %v1783_v39 = vmul.f32 1.442695, %v1754_v15  ;;  %v1812_v18 = vsub.f32 %v4021_v1, %v1810_v16  ;;  %v1826_v4 = vadd.f32 %v1825_v2, %v1824_v22 }
 0x2f6   : > { %v1785_v13 = vmul.f32 1.442695, %v1755_v54  ;;  %v1787_v10 = vmul.f32 1.442695, %v1756_v0  ;;  %v1820_v51 = vrot.slane %v1819_v32, 2  ;;  %v1750_v34 = vsub.f32 %v4060_v36, %v1728_v59 }
 0x2f7   : > { %v4147_v49 = vpop.eup %2923  ;;  %v1813_v35 = vmul.f32 1.442695, %v1812_v18  ;;  %v1827_v31 = vrot.slane %v1826_v4, 4  ;;  %v1773_v40 = vmul.f32 1.442695, %v1749_v58 }
 0x2f8   : > { %2933 = vpow2.f32 %v1785_v13  ;;  %v4149_v5 = vpop.eup %2925  ;;  %v1833_v33 = vsel %vm1612_vm10, %v4147_v49, 0.0  ;;  %v1775_v14 = vmul.f32 1.442695, %v1750_v34  ;;  %v1821_v17 = vadd.f32 %v1820_v51, %v1819_v32 }
 0x2f9   : > { %2935 = vpow2.f32 %v1787_v10  ;;  %v4153_v23 = vpop.eup %2927  ;;  %v1860_v1 = vsel %vm1612_vm10, %v4149_v5, 0.0  ;;  %v1828_v36 = vadd.f32 %v1827_v31, %v1826_v4 }
 0x2fa   : > { %2937 = vpow2.f32 %v1781_v60  ;;  %v4157_v24 = vpop.eup %2929  ;;  %v1861_v56 = vsel %vm1612_vm10, %v4153_v23, 0.0  ;;  %v1822_v58 = vrot.slane %v1821_v17, 1 }
 0x2fb   : > { %2939 = vpow2.f32 %v1783_v39  ;;  %v4161_v25 = vpop.eup %2931  ;;  %v1862_v59 = vadd.f32 %v1861_v56, %v1860_v1  ;;  %v1829_v8 = vrot.slane %v1828_v36, 2  ;;  %v1834_v11 = vsel %vm1612_vm10, %v4157_v24, 0.0 }
 0x2fc   : > { %2941 = vpow2.f32 %v1813_v35  ;;  %v1835_v42 = vadd.f32 %v1834_v11, %v1833_v33  ;;  %v1823_v60 = vadd.f32 %v1822_v58, %v1821_v17  ;;  %v1842_v34 = vsel %vm1612_vm10, %v4161_v25, 0.0 }
 0x2fd   : > { %2943 = vpow2.f32 %v1771_v19  ;;  %v1863_v12 = vrot.slane %v1862_v59, 4  ;;  %v1830_v50 = vadd.f32 %v1829_v8, %v1828_v36 }
 0x2fe   : > { %2945 = vpow2.f32 %v1773_v40  ;;  %v1836_v44 = vrot.slane %v1835_v42, 4 }
 0x2ff   : > { %2947 = vpow2.f32 %v1775_v14  ;;  %v1864_v45 = vadd.f32 %v1863_v12, %v1862_v59  ;;  %v1831_v0 = vrot.slane %v1830_v50, 1 }
 0x300   : > { %v1837_v27 = vadd.f32 %v1836_v44, %v1835_v42 }
 0x301   : > { %v1865_v15 = vrot.slane %v1864_v45, 2  ;;  %v1832_v4 = vadd.f32 %v1831_v0, %v1830_v50 }
 0x302   : > { %v4165_v54 = vpop.eup %2933  ;;  %v1838_v13 = vrot.slane %v1837_v27, 2 }
 0x303   : > { %v4167_v22 = vpop.eup %2935  ;;  %v1878_v62 = vsel %vm1612_vm10, %v4165_v54, 0.0  ;;  %v1866_v19 = vadd.f32 %v1865_v15, %v1864_v45 }
 0x304   : > { %v4171_v52 = vpop.eup %2937  ;;  %v1879_v2 = vsel %vm1612_vm10, %v4167_v22, 0.0  ;;  %v1839_v51 = vadd.f32 %v1838_v13, %v1837_v27 }
 0x305   : > { %v4175_v10 = vpop.eup %2939  ;;  %v1880_v16 = vadd.f32 %v1879_v2, %v1878_v62  ;;  %v1869_v32 = vsel %vm1612_vm10, %v4171_v52, 0.0 }
 0x306   : > { %v4179_v39 = vpop.eup %2941  ;;  %v1870_v18 = vsel %vm1612_vm10, %v4175_v10, 0.0  ;;  %v1840_v14 = vrot.slane %v1839_v51, 1 }
 0x307   : > { %v4185_v35 = vpop.eup %2943  ;;  %v1881_v31 = vrot.slane %v1880_v16, 4  ;;  %v1871_v33 = vadd.f32 %v1870_v18, %v1869_v32  ;;  %v1903_v40 = vadd.f32 %v4179_v39, %v1823_v60  ;;  %v1888_v36 = vrot.slane %v4179_v39, 1 }
 0x308   : > { %v4188_v1 = vpop.eup %2945  ;;  %v1889_v56 = vrot.slane %v4179_v39, 2  ;;  %v1843_v17 = vsel %vm1612_vm10, %v4185_v35, 0.0  ;;  %v1841_v50 = vadd.f32 %v1840_v14, %v1839_v51  ;;  %v1867_v32 = vrot.slane %v1866_v19, 1 }
 0x309   : > { %v4194_v59 = vpop.eup %2947  ;;  %v1882_v8 = vadd.f32 %v1881_v31, %v1880_v16  ;;  %v1872_v11 = vrot.slane %v1871_v33, 4  ;;  %2949 = vrcp.f32 %v1903_v40  ;;  %v1844_v42 = vadd.f32 %v1843_v17, %v1842_v34 }
 0x30a   : > { %v1904_v12 = vadd.f32 %v1888_v36, %v1832_v4  ;;  %v1851_v44 = vsel %vm1612_vm10, %v4188_v1, 0.0  ;;  %v1852_v27 = vsel %vm1612_vm10, %v4194_v59, 0.0  ;;  %v1905_v62 = vadd.f32 %v1889_v56, %v1841_v50 }
 0x30b   : > { %v1883_v45 = vrot.slane %v1882_v8, 2  ;;  %v1873_v58 = vadd.f32 %v1872_v11, %v1871_v33  ;;  %v1845_v0 = vrot.slane %v1844_v42, 4  ;;  %v1853_v15 = vadd.f32 %v1852_v27, %v1851_v44 }
 0x30c   : > { %2951 = vrcp.f32 %v1904_v12  ;;  %v1892_v18 = vrot.slane %v4179_v39, 5  ;;  %v1868_v31 = vadd.f32 %v1867_v32, %v1866_v19  ;;  %v1894_v40 = vrot.slane %v4179_v39, 7 }
 0x30d   : > { %v1884_v2 = vadd.f32 %v1883_v45, %v1882_v8  ;;  %v1874_v13 = vrot.slane %v1873_v58, 2  ;;  %v1846_v16 = vadd.f32 %v1845_v0, %v1844_v42  ;;  %2953 = vrcp.f32 %v1905_v62 }
 0x30e   : > { %v1854_v60 = vrot.slane %v1853_v15, 4  ;;  %v1908_v56 = vadd.f32 %v1892_v18, %v1868_v31  ;;  %v1893_v8 = vrot.slane %v4179_v39, 6  ;;  %v1890_v11 = vrot.slane %v4179_v39, 3 }
 0x30f   : > { %v1885_v4 = vrot.slane %v1884_v2, 1  ;;  %v1875_v51 = vadd.f32 %v1874_v13, %v1873_v58  ;;  %v1847_v34 = vrot.slane %v1846_v16, 2 }
 0x310   : > { %v1855_v33 = vadd.f32 %v1854_v60, %v1853_v15  ;;  %2955 = vrcp.f32 %v1908_v56 }
 0x311   : > { %v1886_v36 = vadd.f32 %v1885_v4, %v1884_v2  ;;  %v1876_v14 = vrot.slane %v1875_v51, 1  ;;  %v1848_v17 = vadd.f32 %v1847_v34, %v1846_v16  ;;  %v1891_v34 = vrot.slane %v4179_v39, 4 }
 0x312   : > { %v1856_v42 = vrot.slane %v1855_v33, 2 }
 0x313   : > { %v2950_v12 = vpop.eup %2949  ;;  %v1877_v50 = vadd.f32 %v1876_v14, %v1875_v51  ;;  %v1849_v44 = vrot.slane %v1848_v17, 1  ;;  %v1910_v45 = vadd.f32 %v1894_v40, %v1886_v36 }
 0x314   : > { %v1922_v58 = vrot.slane %v2950_v12, %v3869_v3  ;;  %v1857_v19 = vadd.f32 %v1856_v42, %v1855_v33 }
 0x315   : > { %v1909_v0 = vadd.f32 %v1893_v8, %v1877_v50  ;;  %v1850_v27 = vadd.f32 %v1849_v44, %v1848_v17  ;;  %2957 = vrcp.f32 %v1910_v45 }
 0x316   : > { %v2952_v62 = vpop.eup %2951  ;;  %v1951_v15 = vmul.f32 %v4113_v55, %v1922_v58  ;;  %v1952_v2 = vmul.f32 %v4121_v26, %v1922_v58  ;;  %v1858_v13 = vrot.slane %v1857_v19, 1 }
 0x317   : > { %2959 = vrcp.f32 %v1909_v0  ;;  %v1926_v16 = vrot.slane %v2952_v62, %v3869_v3  ;;  %v1906_v32 = vadd.f32 %v1890_v11, %v1850_v27  ;;  %v1975_v60 = vrot.slane %v2952_v62, 7  ;;  %v2954_v18 = vpop.eup %2953 }
 0x318   : > { %v1992_v4 = vpack.c.bf16 %v1952_v2, %v1951_v15  ;;  %v1859_v51 = vadd.f32 %v1858_v13, %v1857_v19  ;;  %v1930_v40 = vrot.slane %v2954_v18, %v3869_v3  ;;  %v1977_v55 = vrot.slane %v2954_v18, 6 }
 0x319   : > { %v1953_v31 = vmul.f32 %v4129_v38, %v1926_v16  ;;  %v1954_v33 = vmul.f32 %v4133_v61, %v1926_v16  ;;  %2961 = vrcp.f32 %v1906_v32  ;;  %v1976_v36 = vsel %vm751_vm2, %v1975_v60, %v2950_v12 }
 0x31a   : > { %2760 = vmatprep.mubr.msk.bf16.mxu0 %vm1612_vm10, %v1992_v4  ;;  %v1907_v26 = vadd.f32 %v1891_v34, %v1859_v51  ;;  %v1955_v17 = vmul.f32 %v4147_v49, %v1930_v40  ;;  %v1956_v56 = vmul.f32 %v4157_v24, %v1930_v40  ;;  %v1978_v8 = vsel %vm753_vm3, %v1977_v55, %v1976_v36  ;;  %v2956_v38 = vpop.eup %2955  ;;  %v2913_v55 = vld [vmem:[#allocation13] sm:$0xff]  }
 0x31b   : > { %v1993_v14 = vpack.c.bf16 %v1954_v33, %v1953_v31  ;;  %v1942_v11 = vrot.slane %v2956_v38, %v3869_v3  ;;  %v1983_v51 = vrot.slane %v2956_v38, 3 }
 0x31c   : > { %2963 = vrcp.f32 %v1907_v26  ;;  %v1994_v61 = vpack.c.bf16 %v1956_v56, %v1955_v17  ;;  %v2914_v26 = vld [vmem:[#allocation13 + $0x8] sm:$0xff]  }
 0x31d   : > { %2761 = vmatmul.mubr.msk.bf16.vlgmr.msra.gmra.mrb[24].mxu0 %vm1612_vm10, %v1993_v14  ;;  %v1961_v50 = vmul.f32 %v4149_v5, %v1942_v11  ;;  %v1962_v12 = vmul.f32 %v4153_v23, %v1942_v11 }
 0x31e   : > { %2764 = vmatprep.mubr.msk.bf16.mxu0 %vm1612_vm10, %v1994_v61 }
 0x31f   : > { %v2958_v42 = vpop.eup %2957  ;;  %v1997_v24 = vpack.c.bf16 %v1962_v12, %v1961_v50 }
 0x320   : > { %v1950_v49 = vrot.slane %v2958_v42, %v3869_v3 }
 0x321   : > { %v2960_v44 = vpop.eup %2959 }
 0x322   : > { %v1946_v45 = vrot.slane %v2960_v44, %v3869_v3  ;;  %v1965_v58 = vmul.f32 %v4165_v54, %v1950_v49  ;;  %v1966_v19 = vmul.f32 %v4167_v22, %v1950_v49  ;;  %v1985_v18 = vrot.slane %v2960_v44, 2 }
 0x323   : > { %v2962_v0 = vpop.eup %2961 }
 0x324   : > { %v1963_v27 = vmul.f32 %v4171_v52, %v1946_v45  ;;  %v1964_v62 = vmul.f32 %v4175_v10, %v1946_v45  ;;  %v1934_v15 = vrot.slane %v2962_v0, %v3869_v3  ;;  %v1979_v5 = vrot.slane %v2962_v0, 5 }
 0x325   : > { %v1999_v2 = vpack.c.bf16 %v1966_v19, %v1965_v58 }
 0x326   : > { %v2964_v23 = vpop.eup %2963  ;;  %v1998_v13 = vpack.c.bf16 %v1964_v62, %v1963_v27  ;;  %v1957_v16 = vmul.f32 %v4161_v25, %v1934_v15  ;;  %v1958_v32 = vmul.f32 %v4185_v35, %v1934_v15  ;;  %v1980_v54 = vsel %vm755_vm4, %v1979_v5, %v1978_v8 }
 0x327   : > { %v1938_v60 = vrot.slane %v2964_v23, %v3869_v3  ;;  %v1981_v22 = vrot.slane %v2964_v23, 4  ;;  %v1987_v35 = vrot.slane %v2958_v42, 1 }
 0x328   : > { %v1995_v4 = vpack.c.bf16 %v1958_v32, %v1957_v16 }
 0x329   : > { %v1959_v52 = vmul.f32 %v4188_v1, %v1938_v60  ;;  %v1960_v10 = vmul.f32 %v4194_v59, %v1938_v60  ;;  %v1982_v34 = vsel %vm757_vm5, %v1981_v22, %v1980_v54  ;;  %v4410_v59 = vmov 0.0  }
 0x32a   : > { %2765 = vmatmul.mubr.msk.bf16.gmra.mrb[28].mxu0 %vm1612_vm10, %v1995_v4  ;;  %v1984_v25 = vsel %vm759_vm6, %v1983_v51, %v1982_v34 }
 0x32b   : > { %v1996_v31 = vpack.c.bf16 %v1960_v10, %v1959_v52  ;;  %v1986_v3 = vsel %vm761_vm7, %v1985_v18, %v1984_v25 }
 0x32c   : > { %v1988_v33 = vsel %vm763_vm8, %v1987_v35, %v1986_v3 }
 0x32d   : > { %2768 = vmatprep.mubr.msk.bf16.mxu0 %vm1612_vm10, %v1996_v31  ;;  %v1990_v40 = vmul.f32 %v4179_v39, %v1988_v33 }
 0x32f   : > { %v2125_v1 = vpack.c.bf16 %v1990_v40, %v1990_v40 }
 0x331   : > { %2779 = vmatmul.mubr.msk.bf16.vlgmr.msra.gmra.mrb[32].mxu1 %vm1612_vm10, %v2125_v1 }
 0x332   : > { %2769 = vmatmul.mubr.msk.bf16.gmra.mrb[32].mxu0 %vm1612_vm10, %v1997_v24  ;;  %2786 = vmatprep.mubr.msk.bf16.mxu1 %vm3255_vm0, %v4410_v59 }
 0x333   : > { %2772 = vmatprep.mubr.msk.bf16.mxu0 %vm1612_vm10, %v1998_v13  ;;  %2783 = vmatpush3.bf16.msra.mxu1 %v2913_v55 }
 0x334   : > { %2784 = vmatprep.subr.bf16.mxu1 %v4410_v59 }
 0x337   : > { %2785 = vmatpush3.bf16.msra.mxu1 %v2914_v26 }
 0x33a   : > { %2773 = vmatmul.mubr.msk.bf16.gmra.mrb[36].mxu0 %vm1612_vm10, %v1999_v2 }
 0x3f0   : > { %v2762_v36 = vpop.f32.mrb[24].mxu0 }
 0x3f1   : > { %v2171_v39 = vmul.f32 %v2762_v36, %v3914_v21  ;;  %v2062_v14 = vpop.f32.mrb[25].mxu0 }
 0x3f2   : > { %v2169_v17 = vmul.f32 %v2062_v14, %v3916_v43  ;;  %v2763_v56 = vpop.f32.mrb[26].mxu0 }
 0x3f3   : > { %v2172_v8 = vmul.f32 %v2763_v56, %v3920_v20  ;;  %v2065_v38 = vpop.f32.mrb[27].mxu0  ;;  %v2194_v11 = vsel %vm635_vm1, %v2171_v39, 0.0 }
 0x3f4   : > { %v2170_v61 = vmul.f32 %v2065_v38, %v3924_v28  ;;  %v2185_v50 = vsel %vm635_vm1, %v2169_v17, 0.0 }
 0x3f5   : > { %v2195_v42 = vsel %vm635_vm1, %v2172_v8, 0.0 }
 0x3f6   : > { %v2196_v12 = vadd.f32 %v2195_v42, %v2194_v11  ;;  %v2186_v49 = vsel %vm635_vm1, %v2170_v61, 0.0 }
 0x3f7   : > { %v2187_v44 = vadd.f32 %v2186_v49, %v2185_v50 }
 0x3f8   : > { %v2197_v21 = vrot.slane %v2196_v12, 4 }
 0x3f9   : > { %v2188_v24 = vrot.slane %v2187_v44, 4 }
 0x3fa   : > { %v2198_v45 = vadd.f32 %v2197_v21, %v2196_v12 }
 0x3fb   : > { %v2189_v43 = vadd.f32 %v2188_v24, %v2187_v44 }
 0x3fc   : > { %v2199_v58 = vrot.slane %v2198_v45, 2 }
 0x3fd   : > { %v2190_v19 = vrot.slane %v2189_v43, 2  ;;  %v2766_v20 = vpop.f32.mrb[28].mxu0 }
 0x3fe   : > { %v2175_v28 = vmul.f32 %v2766_v20, %v3930_v6  ;;  %v2078_v27 = vpop.f32.mrb[29].mxu0  ;;  %v2200_v62 = vadd.f32 %v2199_v58, %v2198_v45 }
 0x3ff   : > { %v2191_v0 = vadd.f32 %v2190_v19, %v2189_v43  ;;  %v2173_v15 = vmul.f32 %v2078_v27, %v3932_v29  ;;  %v2767_v5 = vpop.f32.mrb[30].mxu0 }
 0x400   : > { %v2176_v2 = vmul.f32 %v2767_v5, %v3936_v37  ;;  %v2081_v23 = vpop.f32.mrb[31].mxu0  ;;  %v2212_v32 = vsel %vm635_vm1, %v2175_v28, 0.0  ;;  %v2201_v54 = vrot.slane %v2200_v62, 1 }
 0x401   : > { %v2174_v13 = vmul.f32 %v2081_v23, %v3940_v48  ;;  %v2192_v16 = vrot.slane %v2191_v0, 1  ;;  %v2203_v22 = vsel %vm635_vm1, %v2173_v15, 0.0 }
 0x402   : > { %v2213_v60 = vsel %vm635_vm1, %v2176_v2, 0.0  ;;  %v2202_v3 = vadd.f32 %v2201_v54, %v2200_v62 }
 0x403   : > { %v2214_v18 = vadd.f32 %v2213_v60, %v2212_v32  ;;  %v2204_v6 = vsel %vm635_vm1, %v2174_v13, 0.0  ;;  %v2193_v48 = vadd.f32 %v2192_v16, %v2191_v0 }
 0x404   : > { %v2205_v4 = vadd.f32 %v2204_v6, %v2203_v22  ;;  %v2163_v52 = vpop.f32.mrb[32].mxu1 }
 0x405   : > { %v2215_v29 = vrot.slane %v2214_v18, 4  ;;  %v4266_v10 = vmul.f32 %v3985_v57, %v2163_v52  ;;  %v2780_v37 = vpop.f32.mrb[33].mxu1  ;;  %v2770_v51 = vpop.f32.mrb[32].mxu0 }
 0x406   : > { %v2206_v34 = vrot.slane %v2205_v4, 4  ;;  %v2166_v31 = vpop.f32.mrb[34].mxu1  ;;  %v2179_v25 = vmul.f32 %v2770_v51, %v3946_v46  ;;  %v2094_v35 = vpop.f32.mrb[33].mxu0 }
 0x407   : > { %v2216_v33 = vadd.f32 %v2215_v29, %v2214_v18  ;;  %v2781_v40 = vpop.f32.mrb[35].mxu1  ;;  %v2177_v1 = vmul.f32 %v2094_v35, %v3948_v47  ;;  %v2771_v59 = vpop.f32.mrb[34].mxu0  ;;  %v2282_v17 = vrot.slane %v4266_v10, 1  ;;  %v2297_v38 = vadd.f32 %v4266_v10, %v2193_v48 }
 0x408   : > { %v2207_v55 = vadd.f32 %v2206_v34, %v2205_v4  ;;  %v2180_v26 = vmul.f32 %v2771_v59, %v3952_v41  ;;  %v2097_v36 = vpop.f32.mrb[35].mxu0  ;;  %v2230_v39 = vsel %vm635_vm1, %v2179_v25, 0.0  ;;  %v2283_v23 = vrot.slane %v4266_v10, 2 }
 0x409   : > { %v2217_v57 = vrot.slane %v2216_v33, 2  ;;  %v2178_v14 = vmul.f32 %v2097_v36, %v3956_v53  ;;  %v2221_v46 = vsel %vm635_vm1, %v2177_v1, 0.0  ;;  %v2298_v41 = vadd.f32 %v2282_v17, %v2202_v3 }
 0x40a   : > { %v2208_v56 = vrot.slane %v2207_v55, 2  ;;  %v2231_v8 = vsel %vm635_vm1, %v2180_v26, 0.0  ;;  %v2305_v12 = vpack.c.bf16 %v2297_v38, %v2297_v38  ;;  %v2284_v53 = vrot.slane %v4266_v10, 3 }
 0x40b   : > { %v2218_v47 = vadd.f32 %v2217_v57, %v2216_v33  ;;  %v2232_v61 = vadd.f32 %v2231_v8, %v2230_v39  ;;  %v2222_v11 = vsel %vm635_vm1, %v2178_v14, 0.0  ;;  %v2306_v21 = vpack.c.bf16 %v2298_v41, %v2298_v41 }
 0x40c   : > { %v2209_v42 = vadd.f32 %v2208_v56, %v2207_v55  ;;  %v2223_v50 = vadd.f32 %v2222_v11, %v2221_v46  ;;  %v2332_v58 = vunpack.c.l.b16 %v2305_v12  ;;  %v2285_v36 = vrot.slane %v4266_v10, 4 }
 0x40d   : > { %v2219_v49 = vrot.slane %v2218_v47, 1  ;;  %v2233_v44 = vrot.slane %v2232_v61, 4  ;;  %v2774_v24 = vpop.f32.mrb[36].mxu0  ;;  %v2333_v27 = vunpack.c.l.b16 %v2306_v21 }
 0x40e   : > { %v2210_v45 = vrot.slane %v2209_v42, 1  ;;  %v2224_v43 = vrot.slane %v2223_v50, 4  ;;  %v2183_v19 = vmul.f32 %v2774_v24, %v3962_v63  ;;  %v2110_v20 = vpop.f32.mrb[37].mxu0 }
 0x40f   : > { %v2220_v0 = vadd.f32 %v2219_v49, %v2218_v47  ;;  %v2234_v28 = vadd.f32 %v2233_v44, %v2232_v61  ;;  %v2181_v62 = vmul.f32 %v2110_v20, %v3964_v9  ;;  %v2775_v15 = vpop.f32.mrb[38].mxu0  ;;  %v2340_v54 = vrot.slane %v2333_v27, 7 }
 0x410   : > { %v2211_v5 = vadd.f32 %v2210_v45, %v2209_v42  ;;  %v2225_v2 = vadd.f32 %v2224_v43, %v2223_v50  ;;  %v2184_v13 = vmul.f32 %v2775_v15, %v3968_v30  ;;  %v2113_v16 = vpop.f32.mrb[39].mxu0  ;;  %v2248_v22 = vsel %vm635_vm1, %v2183_v19, 0.0 }
 0x411   : > { %v2235_v32 = vrot.slane %v2234_v28, 2  ;;  %v2300_v60 = vadd.f32 %v2284_v53, %v2220_v0  ;;  %v2182_v4 = vmul.f32 %v2113_v16, %v3972_v7  ;;  %v2341_v29 = vsel %vm751_vm2, %v2340_v54, %v2332_v58 }
 0x412   : > { %v2226_v63 = vrot.slane %v2225_v2, 2  ;;  %v2299_v18 = vadd.f32 %v2283_v23, %v2211_v5  ;;  %v2249_v6 = vsel %vm635_vm1, %v2184_v13, 0.0  ;;  %v2239_v30 = vsel %vm635_vm1, %v2181_v62, 0.0 }
 0x413   : > { %v2236_v9 = vadd.f32 %v2235_v32, %v2234_v28  ;;  %v2308_v52 = vpack.c.bf16 %v2300_v60, %v2300_v60  ;;  %v2250_v37 = vadd.f32 %v2249_v6, %v2248_v22  ;;  %v2240_v34 = vsel %vm635_vm1, %v2182_v4, 0.0 }
 0x414   : > { %v2227_v51 = vadd.f32 %v2226_v63, %v2225_v2  ;;  %v2307_v48 = vpack.c.bf16 %v2299_v18, %v2299_v18  ;;  %v2241_v3 = vadd.f32 %v2240_v34, %v2239_v30  ;;  %v2286_v7 = vrot.slane %v4266_v10, 5 }
 0x415   : > { %v2237_v31 = vrot.slane %v2236_v9, 1  ;;  %v2335_v25 = vunpack.c.l.b16 %v2308_v52  ;;  %v2251_v35 = vrot.slane %v2250_v37, 4  ;;  %v2288_v53 = vrot.slane %v4266_v10, 7 }
 0x416   : > { %v2228_v33 = vrot.slane %v2227_v51, 1  ;;  %v2334_v40 = vunpack.c.l.b16 %v2307_v48  ;;  %v2242_v55 = vrot.slane %v2241_v3, 4  ;;  %v2287_v19 = vrot.slane %v4266_v10, 6  ;;  %v2622_v10 = vld [vmem:[%s4411_s2] ss:$0 sm:$0xff]  ;;  %s3169_s2 = scalar_lea.vmem %s3168_s22, 256 }
 0x417   : > { %v2238_v1 = vadd.f32 %v2237_v31, %v2236_v9  ;;  %v2252_v59 = vadd.f32 %v2251_v35, %v2250_v37  ;;  %v2344_v14 = vrot.slane %v2335_v25, 5  ;;  %p3171_p3 = scmp.lt.s32.totalorder %s3169_s2, %s3163_s24 }
 0x418   : > { %v2229_v26 = vadd.f32 %v2228_v33, %v2227_v51  ;;  %v2342_v57 = vrot.slane %v2334_v40, 6  ;;  %v2243_v56 = vadd.f32 %v2242_v55, %v2241_v3 }
 0x419   : > { %v2302_v39 = vadd.f32 %v2286_v7, %v2238_v1  ;;  %v2253_v17 = vrot.slane %v2252_v59, 2  ;;  %p3172_p2 = por %p3171_p3, %p3170_p1 }
 0x41a   : > { %v2301_v46 = vadd.f32 %v2285_v36, %v2229_v26  ;;  %v2343_v8 = vsel %vm753_vm3, %v2342_v57, %v2341_v29  ;;  %v2244_v11 = vrot.slane %v2243_v56, 2 }
 0x41b   : > { %v2310_v38 = vpack.c.bf16 %v2302_v39, %v2302_v39  ;;  %v2345_v47 = vsel %vm755_vm4, %v2344_v14, %v2343_v8  ;;  %v2254_v61 = vadd.f32 %v2253_v17, %v2252_v59  ;;  %p3173_p8 = pnand %p3172_p2, %p3166_p13 }
 0x41c   : > { %v2309_v41 = vpack.c.bf16 %v2301_v46, %v2301_v46  ;;  %v2245_v12 = vadd.f32 %v2244_v11, %v2243_v56 }
 0x41d   : > { %v2337_v42 = vunpack.c.l.b16 %v2310_v38  ;;  %v2255_v50 = vrot.slane %v2254_v61, 1 }
 0x41e   : > { %v2336_v49 = vunpack.c.l.b16 %v2309_v41  ;;  %v2246_v21 = vrot.slane %v2245_v12, 1 }
 0x41f   : > { %v2256_v44 = vadd.f32 %v2255_v50, %v2254_v61  ;;  %v2348_v45 = vrot.slane %v2337_v42, 3 }
 0x420   : > { %v2346_v24 = vrot.slane %v2336_v49, 4  ;;  %v2247_v58 = vadd.f32 %v2246_v21, %v2245_v12 }
 0x421   : > { %v2304_v43 = vadd.f32 %v2288_v53, %v2256_v44 }
 0x422   : > { %v2347_v20 = vsel %vm757_vm5, %v2346_v24, %v2345_v47  ;;  %v2303_v28 = vadd.f32 %v2287_v19, %v2247_v58 }
 0x423   : > { %v2312_v0 = vpack.c.bf16 %v2304_v43, %v2304_v43  ;;  %v2349_v27 = vsel %vm759_vm6, %v2348_v45, %v2347_v20 }
 0x424   : > { %v2311_v62 = vpack.c.bf16 %v2303_v28, %v2303_v28 }
 0x425   : > { %v2339_v15 = vunpack.c.l.b16 %v2312_v0 }
 0x426   : > { %v2338_v5 = vunpack.c.l.b16 %v2311_v62 }
 0x427   : > { %v2352_v23 = vrot.slane %v2339_v15, 1 }
 0x428   : > { %v2350_v2 = vrot.slane %v2338_v5, 2 }
 0x42a   : > { %v2351_v13 = vsel %vm761_vm7, %v2350_v2, %v2349_v27 }
 0x42b   : > { %v2353_v16 = vsel %vm763_vm8, %v2352_v23, %v2351_v13 }
 0x42c   : > { %v2354_v32 = vpack.c.b16 %v2353_v16, %v2353_v16 }
 0x42e   : > { %2787 = vmatmul.mubr.msk.bf16.vlgmr.msra.gmra.mrb[36].mxu1 %vm635_vm1, %v2354_v32 }
 0x501   : > { %v2404_v60 = vpop.f32.mrb[36].mxu1 }
 0x502   : > { %v2405_v54 = vadd.f32 %v2622_v10, %v2404_v60  ;;  %v2788_v22 = vpop.f32.mrb[37].mxu1 }
 0x503   : > { %v2407_v63 = vpop.f32.mrb[38].mxu1 }
 0x504   : > { %2410 = vst [vmem:[%s590_s26] sm:$0xff] %v2405_v54  ;;  %v2789_v18 = vpop.f32.mrb[39].mxu1 }
 0x505   : > { %3176 = shalt.err (!%p3173_p8)
}
 0x506   : > { %s3177_s13 = scalar_lea.hbm %s4308_s1, 128  ;;  %s3181_s15 = scalar_lea.hbm %s4412_s0, 256 }
 0x507   : > { %p3178_p10 = scmp.ne.s32.totalorder %s4308_s1, %s3177_s13  ;;  %p3182_p0 = scmp.lt.u32.totalorder %s4308_s1, %s4412_s0 }
 0x508   : > { %p3183_p5 = scmp.lt.u32.totalorder %s3181_s15, %s3177_s13  ;;  %p3185_p6 = scmp.lt.u32.totalorder %s3177_s13, %s4308_s1 }
 0x509   : > { %p3179_p11 = pnand %p3178_p10, %p4413_p9 }
 0x50a   : > { %p3184_p7 = por %p3183_p5, %p3182_p0 }
 0x50b   : > { %p3180_p12 = pneg %p3179_p11 }
 0x50c   : > { %p3186_p4 = por %p3185_p6, %p3184_p7 }
 0x50e   : > { %p3187_p13 = pnand %p3186_p4, %p3180_p12 }
 0x510   : > { %3190 = shalt.err (!%p3187_p13)
}
 0x511   : > { %2817 = dma.vmem_to_hbm [thread:$0]  (%p4413_p9), %s4310_s17, 128, %s4308_s1, %s2412_s27  }
 0x512 PF: > { %s2437_s24 = sand.u32 1, %s3229_s18   ;;  %p4414_p1 = scmp.ne.s32.totalorder %s4394_s29, 0 }
 0x513   : > { %p4415_p3 = scmp.ge.s32.totalorder %s3241_s21, 2  ;;  %s2438_s22 = scalar_lea.sflag [#allocation4], %s2437_s24 }
 0x515   : > { %p2843_p2 = pnand %p4415_p3, %p4414_p1 }
 0x517   : > { %3224 = dma.done.wait (!%p2843_p2), %s2438_s22, 128  }
 0x518   : > { %3226 = vsyncadd (!%p2843_p2), %s2438_s22, 4294967168  ;;  %p31_p8 = scmp.ge.s32.totalorder %s3520_s16, 4   ;;  %s4416_s18 = smov %s3233_s19 }
 0x519   : > { %s4417_s19 = smov %s3237_s20  ;;  %s4418_s20 = smov %s3531_s23 }
 0x51a   : > { %s4419_s21 = smov %s3520_s16  ;;  %33 = sbr.rel (!%p31_p8) target bundleno = 18 (0x12), region = 149 }
 0x521   :  { %2443 = vsyncpa [#allocation3], 1 }
 0x522   :  { %2445 = vsyncpa [#allocation3 + $0x1], 1 }
 0x523   :  { %2446 = vsyncpa [#allocation6], 1 }
 0x524   :  { %2447 = vsyncpa [#allocation9], 1 }
 0x525   :  { %2448 = vsyncpa [#allocation12], 1 }
 0x526   :  { %2449 = vsyncpa [#allocation4], 1 }
 0x527   :  { %2451 = vsyncpa [#allocation4 + $0x1], 1 }

</bundles_post_ra>
